<compile_context>
chip_gen: v7x
topology: tpu7x:2x2x1
jax: 0.10.0
libtpu: 0.0.40
codegen_flags: <defaults>
</compile_context>

<pallas_src>
import functools
import numpy as np

import jax
import jax.numpy as jnp
from jax import lax
from jax.experimental import pallas as pl
from jax.experimental.pallas import tpu as pltpu


def _round_up(x, m):
    return (x + m - 1) // m * m


# ----------------------------------------------------------------------------
# Pallas conv kernel: stride-1 conv as tap-offset accumulation over the
# row-flattened, spatially padded NHWC activation (in-kernel im2col).
# ----------------------------------------------------------------------------
def _make_conv_kernel(offs, r_out, cout, has_bias, want_stats):
    def kernel(*refs):
        i = 0
        x_ref = refs[i]; i += 1            # (1, R_in, Cin)   bf16 flattened rows
        w_ref = refs[i]; i += 1            # (T, Cin, Cout)   bf16, VMEM-resident
        bias_ref = None
        if has_bias:
            bias_ref = refs[i]; i += 1     # (1, Cout) f32
        mask_ref = None
        if want_stats:
            mask_ref = refs[i]; i += 1     # (R_out, 1) f32 validity mask
        o_ref = refs[i]; i += 1            # (1, R_out, Cout)
        if want_stats:
            sum_ref = refs[i]
            sq_ref = refs[i + 1]

        acc = jnp.zeros((r_out, cout), jnp.float32)
        # Taps fully unrolled: no K grid axis, no K zero-padding, weights stay
        # resident in VMEM for the whole call.
        for t, off in enumerate(offs):
            a = x_ref[0, pl.ds(off, r_out), :]
            acc = acc + jnp.dot(a, w_ref[t],
                                preferred_element_type=jnp.float32)
        if has_bias:
            acc = acc + bias_ref[...]
        o_ref[0] = acc.astype(o_ref.dtype)

        if want_stats:
            # Per-image BN partial sums, masked to valid (non right-pad) rows.
            m = mask_ref[...]
            masked = acc * m
            sum_ref[0] = jnp.sum(masked, axis=0, keepdims=True)
            sq_ref[0] = jnp.sum(masked * acc, axis=0, keepdims=True)
    return kernel


@functools.lru_cache(maxsize=None)
def _build_conv_call(batch, r_in, r_out, cin, cout, offs, has_bias, want_stats,
                     out_dtype_name):
    out_dtype = jnp.dtype(out_dtype_name)
    kernel = _make_conv_kernel(offs, r_out, cout, has_bias, want_stats)

    in_specs = [
        pl.BlockSpec((1, r_in, cin), lambda b: (b, 0, 0)),            # activation
        pl.BlockSpec((len(offs), cin, cout), lambda b: (0, 0, 0)),    # weights (resident)
    ]
    if has_bias:
        in_specs.append(pl.BlockSpec((1, cout), lambda b: (0, 0)))
    if want_stats:
        in_specs.append(pl.BlockSpec((r_out, 1), lambda b: (0, 0)))

    out_spec = pl.BlockSpec((1, r_out, cout), lambda b: (b, 0, 0))
    if want_stats:
        out_shape = (jax.ShapeDtypeStruct((batch, r_out, cout), out_dtype),
                     jax.ShapeDtypeStruct((batch, 1, cout), jnp.float32),
                     jax.ShapeDtypeStruct((batch, 1, cout), jnp.float32))
        out_specs = (out_spec,
                     pl.BlockSpec((1, 1, cout), lambda b: (b, 0, 0)),
                     pl.BlockSpec((1, 1, cout), lambda b: (b, 0, 0)))
    else:
        out_shape = jax.ShapeDtypeStruct((batch, r_out, cout), out_dtype)
        out_specs = out_spec

    return pl.pallas_call(
        kernel,
        out_shape=out_shape,
        grid=(batch,),
        in_specs=in_specs,
        out_specs=out_specs,
        compiler_params=pltpu.CompilerParams(
            dimension_semantics=("parallel",)),   # batch spreads across v7x TCs
    )


def conv2d_stride1_pallas(x, wt, kh, kw, padding, bias=None,
                          want_stats=False, out_dtype=jnp.bfloat16):
    """Stride-1 conv on NHWC `x` with per-tap weights `wt` (kh*kw, Cin, Cout)."""
    B, H, W, Cin = x.shape
    T, Cin2, Cout = wt.shape
    assert T == kh * kw and Cin2 == Cin
    p = padding
    OH = H + 2 * p - kh + 1
    OW = W + 2 * p - kw + 1
    Hp, Wp = H + 2 * p, W + 2 * p
    offs = tuple(dy * Wp + dx for dy in range(kh) for dx in range(kw))
    n_valid = OH * Wp                       # output rows we compute (right-pad cols incl.)
    r_out = _round_up(n_valid, 16)          # bf16 packs 2 rows / sublane
    r_in = _round_up(max(Hp * Wp, r_out + offs[-1]), 16)

    xp = x.astype(jnp.bfloat16)
    if p:
        xp = jnp.pad(xp, ((0, 0), (p, p), (p, p), (0, 0)))
    xf = xp.reshape(B, Hp * Wp, Cin)
    if r_in != Hp * Wp:
        xf = jnp.pad(xf, ((0, 0), (0, r_in - Hp * Wp), (0, 0)))

    inputs = [xf, wt.astype(jnp.bfloat16)]
    has_bias = bias is not None
    if has_bias:
        inputs.append(bias.astype(jnp.float32).reshape(1, Cout))
    if want_stats:
        q = np.arange(r_out)
        mask = (((q % Wp) < OW) & (q < n_valid)).astype(np.float32)
        inputs.append(jnp.asarray(mask.reshape(r_out, 1)))

    call = _build_conv_call(B, r_in, r_out, Cin, Cout, offs, has_bias,
                            want_stats, jnp.dtype(out_dtype).name)
    res = call(*inputs)
    out_flat, ssum, ssq = (res if want_stats else (res, None, None))

    out = out_flat[:, :n_valid, :].reshape(B, OH, Wp, Cout)
    if Wp != OW:
        out = out[:, :, :OW, :]             # drop right-padding columns (garbage)
    if want_stats:
        return out, ssum, ssq
    return out


def _oihw_to_taps(w):
    Cout, Cin, kh, kw = w.shape
    return jnp.transpose(w, (2, 3, 1, 0)).reshape(kh * kw, Cin, Cout)


# ----------------------------------------------------------------------------
# BatchNorm (training-mode batch statistics) + PReLU, fused single-pass apply
# ----------------------------------------------------------------------------
def _bn_scale_shift(bn, ssum, ssq, count, eps=1e-5):
    total = jnp.sum(ssum, axis=(0, 1))                 # (Cout,)
    total_sq = jnp.sum(ssq, axis=(0, 1))
    mean = total / count
    var = jnp.maximum(total_sq / count - mean * mean, 0.0)
    scale = bn["gamma"] * lax.rsqrt(var + eps)
    shift = bn["beta"] - mean * scale
    return scale, shift


def _bn_prelu_apply(x, scale, shift, alpha=None):
    z = x.astype(jnp.float32) * scale + shift          # single fused elementwise pass
    if alpha is not None:
        a = (alpha.reshape((1,) * (x.ndim - 1) + (-1,))
             if alpha.size > 1 else alpha.reshape((1,) * x.ndim))
        z = jnp.where(z >= 0, z, a * z)
    return z.astype(jnp.bfloat16)


def _prelu(x, alpha):
    a = (alpha.reshape((1,) * (x.ndim - 1) + (-1,))
         if alpha.size > 1 else alpha.reshape((1,) * x.ndim))
    return jnp.where(x >= 0, x, a * x)


# ----------------------------------------------------------------------------
# flow_conv / flow_conv_wo_act / FlowResBlock forwards
# ----------------------------------------------------------------------------
def flow_conv_fwd(p, x, padding):
    w = p["conv"]["w"]
    y, ssum, ssq = conv2d_stride1_pallas(x, _oihw_to_taps(w), w.shape[2],
                                         w.shape[3], padding, want_stats=True)
    B, OH, OW, _ = y.shape
    scale, shift = _bn_scale_shift(p["bn"], ssum, ssq, float(B * OH * OW))
    return _bn_prelu_apply(y, scale, shift, p["alpha"])


def flow_conv_woact_fwd(p, x, padding):
    w = p["conv"]["w"]
    y, ssum, ssq = conv2d_stride1_pallas(x, _oihw_to_taps(w), w.shape[2],
                                         w.shape[3], padding, want_stats=True)
    B, OH, OW, _ = y.shape
    scale, shift = _bn_scale_shift(p["bn"], ssum, ssq, float(B * OH * OW))
    return _bn_prelu_apply(y, scale, shift, None)       # bf16, no activation


def flow_conv_stride2_fwd(p, x):
    """flow_conv(in_planes, c, 5, stride=2, padding=2): conv + BN + PReLU."""
    w = p["conv"]["w"]                                  # (Cout, Cin, 5, 5)
    Cout, Cin, kh, kw = w.shape
    s, pad = 2, 2
    B, H, W, _ = x.shape
    OH = (H + 2 * pad - kh) // s + 1
    OW = (W + 2 * pad - kw) // s + 1
    xp = jnp.pad(x.astype(jnp.bfloat16), ((0, 0), (pad, pad), (pad, pad), (0, 0)))
    cols = [xp[:, dy:dy + s * OH:s, dx:dx + s * OW:s, :]
            for dy in range(kh) for dx in range(kw)]
    patches = jnp.concatenate(cols, axis=-1)            # (B, OH, OW, kh*kw*Cin)
    wt = jnp.transpose(w, (2, 3, 1, 0)).reshape(1, kh * kw * Cin, Cout)
    y, ssum, ssq = conv2d_stride1_pallas(patches, wt, 1, 1, 0, want_stats=True)
    scale, shift = _bn_scale_shift(p["bn"], ssum, ssq, float(B * OH * OW))
    return _bn_prelu_apply(y, scale, shift, p["alpha"])


def _se_fc(x, w):                                       # 1x1 conv, no bias, f32
    B, _, _, Cin = x.shape
    Cout = w.shape[0]
    wm = w.reshape(Cout, Cin).T.astype(jnp.float32)
    y = jnp.dot(x.reshape(B, Cin).astype(jnp.float32), wm,
                preferred_element_type=jnp.float32)
    return y.reshape(B, 1, 1, Cout)


def flow_resblock_fwd(p, x):
    if p["conv0"] is None:                              # nn.Identity
        y = x
    else:
        w0 = p["conv0"]["w"]
        y = conv2d_stride1_pallas(x, _oihw_to_taps(w0), w0.shape[2], w0.shape[3],
                                  1, want_stats=False)
    h = flow_conv_fwd(p["conv1"], x, padding=2)         # 5x5 conv+BN+PReLU, bf16
    h = flow_conv_woact_fwd(p["conv2"], h, padding=1)   # 3x3 conv+BN, bf16
    # Squeeze-and-excitation branch (tiny: M = batch), plain f32 JAX.
    g = h.astype(jnp.float32).mean(axis=(1, 2), keepdims=True)
    g = _prelu(_se_fc(g, p["fc1"]["w"]), p["relu1"])
    g = jax.nn.sigmoid(_se_fc(g, p["fc2"]["w"]))
    out = _prelu(h.astype(jnp.float32) * g + y.astype(jnp.float32), p["relu2"])
    return out.astype(jnp.bfloat16)


# ----------------------------------------------------------------------------
# Resize / pixel-shuffle glue (plain JAX, NHWC)
# ----------------------------------------------------------------------------
def _bilinear_gather_nhwc(x, out_h, out_w):
    """General bilinear (align_corners=False) fallback for non-2x scales."""
    B, H, W, C = x.shape
    xf = x.astype(jnp.float32)

    def src_idx(out_size, in_size):
        s = (jnp.arange(out_size, dtype=jnp.float32) + 0.5) * (in_size / out_size) - 0.5
        s = jnp.maximum(s, 0.0)
        i0 = jnp.minimum(jnp.floor(s).astype(jnp.int32), in_size - 1)
        i1 = jnp.minimum(i0 + 1, in_size - 1)
        w1 = jnp.clip(s - i0.astype(jnp.float32), 0.0, 1.0)
        return i0, i1, 1.0 - w1, w1

    y0, y1, wy0, wy1 = src_idx(out_h, H)
    x0, x1, wx0, wx1 = src_idx(out_w, W)
    xh = (jnp.take(xf, y0, axis=1) * wy0[None, :, None, None]
          + jnp.take(xf, y1, axis=1) * wy1[None, :, None, None])
    return (jnp.take(xh, x0, axis=2) * wx0[None, None, :, None]
            + jnp.take(xh, x1, axis=2) * wx1[None, None, :, None])


def downsample_nhwc(x, scale):
    if scale == 1:
        return x
    B, H, W, C = x.shape
    if scale == 2 and H % 2 == 0 and W % 2 == 0:
        # Exact: bilinear 0.5x (align_corners=False) == 2x2 average pooling.
        return x.astype(jnp.float32).reshape(B, H // 2, 2, W // 2, 2, C).mean(axis=(2, 4))
    return _bilinear_gather_nhwc(x, H // scale, W // scale)


def _upsample2x_nhwc(x):
    """Exact 2x bilinear (align_corners=False) as a fixed 4-tap separable filter."""
    def up_axis(v, axis):
        n = v.shape[axis]
        first = lax.slice_in_dim(v, 0, 1, axis=axis)
        last = lax.slice_in_dim(v, n - 1, n, axis=axis)
        prev = jnp.concatenate([first, lax.slice_in_dim(v, 0, n - 1, axis=axis)], axis=axis)
        nxt = jnp.concatenate([lax.slice_in_dim(v, 1, n, axis=axis), last], axis=axis)
        even = 0.25 * prev + 0.75 * v
        odd = 0.75 * v + 0.25 * nxt
        st = jnp.stack([even, odd], axis=axis + 1)
        shp = list(v.shape)
        shp[axis] = 2 * n
        return st.reshape(shp)
    return up_axis(up_axis(x.astype(jnp.float32), 1), 2)


def upsample_nhwc(x, scale):
    if scale == 1:
        return x
    B, H, W, C = x.shape
    if scale == 2:
        return _upsample2x_nhwc(x)
    return _bilinear_gather_nhwc(x, H * scale, W * scale)


def pixel_shuffle_nhwc(x, r=2):
    B, H, W, Ch = x.shape
    Co = Ch // (r * r)
    x = x.reshape(B, H, W, Co, r, r)
    x = x.transpose(0, 1, 4, 2, 5, 3)                   # B, H, ry, W, rx, Co
    return x.reshape(B, H * r, W * r, Co)


# ----------------------------------------------------------------------------
# Deterministic parameter init (mirrors the torch module shapes / defaults)
# ----------------------------------------------------------------------------
class KeyGen:
    def __init__(self, seed):
        self.key = jax.random.PRNGKey(seed)

    def __call__(self):
        self.key, k = jax.random.split(self.key)
        return k


def init_conv2d(kg, cin, cout, k, bias=True):
    fan_in = cin * k * k
    bound = 1.0 / np.sqrt(fan_in)
    return {"w": jax.random.uniform(kg(), (cout, cin, k, k), jnp.float32, -bound, bound),
            "b": (jax.random.uniform(kg(), (cout,), jnp.float32, -bound, bound)
                  if bias else None)}


def init_bn(n):
    return {"gamma": jnp.ones((n,), jnp.float32), "beta": jnp.zeros((n,), jnp.float32)}


def init_flow_conv(kg, cin, cout, k):                   # Conv2d(no bias) + BN + PReLU
    return {"conv": init_conv2d(kg, cin, cout, k, False),
            "bn": init_bn(cout),
            "alpha": jnp.full((cout,), 0.25, jnp.float32)}


def init_flow_conv_woact(kg, cin, cout, k):             # Conv2d(no bias) + BN
    return {"conv": init_conv2d(kg, cin, cout, k, False), "bn": init_bn(cout)}


def init_flow_resblock(kg, cin, cout, stride=1):
    return {"stride": stride,
            "conv0": None if (cin == cout and stride == 1)
            else init_conv2d(kg, cin, cout, 3, False),
            "conv1": init_flow_conv(kg, cin, cout, 5),
            "conv2": init_flow_conv_woact(kg, cout, cout, 3),
            "relu1": jnp.full((1,), 0.25, jnp.float32),
            "relu2": jnp.full((cout,), 0.25, jnp.float32),
            "fc1": init_conv2d(kg, cout, 16, 1, False),
            "fc2": init_conv2d(kg, 16, cout, 1, False)}


def init_flow_block(kg, in_planes, scale, c):
    return {"scale": scale,
            "conv0": init_flow_conv(kg, in_planes, c, 5),
            "res": [init_flow_resblock(kg, c, c, 1) for _ in range(6)],
            "conv1": init_conv2d(kg, c, 8, 3, True)}


# ----------------------------------------------------------------------------
# FlowBlock forward
# ----------------------------------------------------------------------------
def flow_block_fwd(p, x):
    scale = p["scale"]
    if scale != 1:
        x = downsample_nhwc(x, scale)
    x = flow_conv_stride2_fwd(p["conv0"], x)
    for rp in p["res"]:
        x = flow_resblock_fwd(rp, x)
    w1 = p["conv1"]
    x = conv2d_stride1_pallas(x, _oihw_to_taps(w1["w"]), 3, 3, 1,
                              bias=w1["b"], want_stats=False,
                              out_dtype=jnp.float32)     # bias fused in epilogue
    flow = pixel_shuffle_nhwc(x, 2)
    if scale != 1:
        flow = upsample_nhwc(flow, scale)
    return flow


def flow_block_apply(params, x_nchw):
    """NCHW in (torch convention), NCHW out."""
    x = jnp.transpose(x_nchw, (0, 2, 3, 1))              # -> NHWC
    flow = flow_block_fwd(params, x)
    return jnp.transpose(flow, (0, 3, 1, 2)).astype(jnp.float32)


# ----------------------------------------------------------------------------
if __name__ == "__main__":
    B, IN_PLANES, H, W = 2, 6, 32, 32
    SCALE, CHANNELS = 2, 64

    key = jax.random.PRNGKey(0)
    x = jax.random.uniform(key, (B, IN_PLANES, H, W), jnp.float32)

    params = init_flow_block(KeyGen(42), IN_PLANES, SCALE, CHANNELS)

    fwd = jax.jit(lambda inp: flow_block_apply(params, inp))
    flow = jax.block_until_ready(fwd(x))

    assert flow.shape == (B, 2, H, W), flow.shape
    assert bool(jnp.all(jnp.isfinite(flow)))
    print("KERNEL_OK")
</pallas_src>

<mosaic_0001>
module attributes {stable_mosaic.version = 11 : i64} {
  func.func @kernel(%arg0: i32, %arg1: memref<1x64x150xbf16, #tpu.memory_space<vmem>>, %arg2: memref<1x150x64xbf16, #tpu.memory_space<vmem>>, %arg3: memref<64x1xf32, #tpu.memory_space<vmem>>, %arg4: memref<1x64x64xbf16, #tpu.memory_space<vmem>>, %arg5: memref<1x1x64xf32, #tpu.memory_space<vmem>>, %arg6: memref<1x1x64xf32, #tpu.memory_space<vmem>>) attributes {dimension_semantics = [#tpu.dimension_semantics<parallel>], iteration_bounds = array<i64: 2>, scalar_prefetch = 0 : i64, scratch_operands = 0 : i64, tpu.core_type = #tpu.core_type<tc>, window_params = [{transform_indices = @transform_0, window_bounds = array<i64: 1, 64, 150>}, {pipeline_mode = #tpu.pipeline_mode<synchronous>, transform_indices = @transform_1, window_bounds = array<i64: 1, 150, 64>}, {pipeline_mode = #tpu.pipeline_mode<synchronous>, transform_indices = @transform_2, window_bounds = array<i64: 64, 1>}, {transform_indices = @transform_3, window_bounds = array<i64: 1, 64, 64>}, {transform_indices = @transform_4, window_bounds = array<i64: 1, 1, 64>}, {transform_indices = @transform_5, window_bounds = array<i64: 1, 1, 64>}]} {
    %cst = arith.constant 0.000000e+00 : f32
    %0 = vector.broadcast %cst : f32 to vector<64x64xf32>
    %c0 = arith.constant 0 : index
    %c0_0 = arith.constant 0 : index
    %c0_1 = arith.constant 0 : index
    %1 = vector.load %arg1[%c0, %c0_0, %c0_1] : memref<1x64x150xbf16, #tpu.memory_space<vmem>>, vector<1x64x150xbf16>
    %2 = vector.shape_cast %1 : vector<1x64x150xbf16> to vector<64x150xbf16>
    %c0_2 = arith.constant 0 : index
    %c0_3 = arith.constant 0 : index
    %c0_4 = arith.constant 0 : index
    %3 = vector.load %arg2[%c0_2, %c0_3, %c0_4] : memref<1x150x64xbf16, #tpu.memory_space<vmem>>, vector<1x150x64xbf16>
    %4 = vector.shape_cast %3 : vector<1x150x64xbf16> to vector<150x64xbf16>
    %cst_5 = arith.constant dense<0.000000e+00> : vector<64x64xf32>
    %5 = tpu.matmul %2, %4, %cst_5 {dimension_numbers = #tpu.dot_dimension_numbers<[1], [0], [0], [1], [0, 0, 1, 1], [], []>} : vector<64x150xbf16>, vector<150x64xbf16>, vector<64x64xf32> -> vector<64x64xf32>
    %6 = arith.addf %0, %5 : vector<64x64xf32>
    %7 = arith.truncf %6 : vector<64x64xf32> to vector<64x64xbf16>
    %c0_6 = arith.constant 0 : index
    %c0_7 = arith.constant 0 : index
    %c0_8 = arith.constant 0 : index
    %8 = vector.load %arg4[%c0_6, %c0_7, %c0_8] : memref<1x64x64xbf16, #tpu.memory_space<vmem>>, vector<1x64x64xbf16>
    %9 = vector.shape_cast %8 : vector<1x64x64xbf16> to vector<64x64xbf16>
    %10 = vector.shape_cast %7 : vector<64x64xbf16> to vector<1x64x64xbf16>
    tpu.vector_store %arg4[%c0_6, %c0_7, %c0_8], %10 {strides = array<i32>} : memref<1x64x64xbf16, #tpu.memory_space<vmem>>, vector<1x64x64xbf16>,
    %c0_9 = arith.constant 0 : index
    %c0_10 = arith.constant 0 : index
    %11 = vector.load %arg3[%c0_9, %c0_10] : memref<64x1xf32, #tpu.memory_space<vmem>>, vector<64x1xf32>
    %12 = vector.broadcast %11 : vector<64x1xf32> to vector<64x64xf32>
    %13 = arith.mulf %6, %12 : vector<64x64xf32>
    %cst_11 = arith.constant dense<0.000000e+00> : vector<64xf32>
    %14 = vector.multi_reduction <add>, %13, %cst_11 [0] : vector<64x64xf32> to vector<64xf32>
    %15 = vector.shape_cast %14 : vector<64xf32> to vector<1x64xf32>
    %c0_12 = arith.constant 0 : index
    %c0_13 = arith.constant 0 : index
    %c0_14 = arith.constant 0 : index
    %16 = vector.load %arg5[%c0_12, %c0_13, %c0_14] : memref<1x1x64xf32, #tpu.memory_space<vmem>>, vector<1x1x64xf32>
    %17 = vector.shape_cast %16 : vector<1x1x64xf32> to vector<1x64xf32>
    %18 = vector.shape_cast %15 : vector<1x64xf32> to vector<1x1x64xf32>
    tpu.vector_store %arg5[%c0_12, %c0_13, %c0_14], %18 {strides = array<i32>} : memref<1x1x64xf32, #tpu.memory_space<vmem>>, vector<1x1x64xf32>,
    %19 = arith.mulf %13, %6 : vector<64x64xf32>
    %cst_15 = arith.constant dense<0.000000e+00> : vector<64xf32>
    %20 = vector.multi_reduction <add>, %19, %cst_15 [0] : vector<64x64xf32> to vector<64xf32>
    %21 = vector.shape_cast %20 : vector<64xf32> to vector<1x64xf32>
    %c0_16 = arith.constant 0 : index
    %c0_17 = arith.constant 0 : index
    %c0_18 = arith.constant 0 : index
    %22 = vector.load %arg6[%c0_16, %c0_17, %c0_18] : memref<1x1x64xf32, #tpu.memory_space<vmem>>, vector<1x1x64xf32>
    %23 = vector.shape_cast %22 : vector<1x1x64xf32> to vector<1x64xf32>
    %24 = vector.shape_cast %21 : vector<1x64xf32> to vector<1x1x64xf32>
    tpu.vector_store %arg6[%c0_16, %c0_17, %c0_18], %24 {strides = array<i32>} : memref<1x1x64xf32, #tpu.memory_space<vmem>>, vector<1x1x64xf32>,
    return
  }
  func.func @transform_0(%arg0: i32) -> (i32, i32, i32) {
    %c0_i32 = arith.constant 0 : i32
    %c0_i32_0 = arith.constant 0 : i32
    %c0_i32_1 = arith.constant 0 : i32
    return %arg0, %c0_i32, %c0_i32_0 : i32, i32, i32
  }
  func.func @transform_1(%arg0: i32) -> (i32, i32, i32) {
    %c0_i32 = arith.constant 0 : i32
    %c0_i32_0 = arith.constant 0 : i32
    %c0_i32_1 = arith.constant 0 : i32
    %c0_i32_2 = arith.constant 0 : i32
    return %c0_i32, %c0_i32_0, %c0_i32_1 : i32, i32, i32
  }
  func.func @transform_2(%arg0: i32) -> (i32, i32) {
    %c0_i32 = arith.constant 0 : i32
    %c0_i32_0 = arith.constant 0 : i32
    %c0_i32_1 = arith.constant 0 : i32
    return %c0_i32, %c0_i32_0 : i32, i32
  }
  func.func @transform_3(%arg0: i32) -> (i32, i32, i32) {
    %c0_i32 = arith.constant 0 : i32
    %c0_i32_0 = arith.constant 0 : i32
    %c0_i32_1 = arith.constant 0 : i32
    return %arg0, %c0_i32, %c0_i32_0 : i32, i32, i32
  }
  func.func @transform_4(%arg0: i32) -> (i32, i32, i32) {
    %c0_i32 = arith.constant 0 : i32
    %c0_i32_0 = arith.constant 0 : i32
    %c0_i32_1 = arith.constant 0 : i32
    return %arg0, %c0_i32, %c0_i32_0 : i32, i32, i32
  }
  func.func @transform_5(%arg0: i32) -> (i32, i32, i32) {
    %c0_i32 = arith.constant 0 : i32
    %c0_i32_0 = arith.constant 0 : i32
    %c0_i32_1 = arith.constant 0 : i32
    return %arg0, %c0_i32, %c0_i32_0 : i32, i32, i32
  }
}

module attributes {stable_mosaic.version = 11 : i64} {
  func.func @kernel(%arg0: i32, %arg1: memref<1x160x64xbf16, #tpu.memory_space<vmem>>, %arg2: memref<25x64x64xbf16, #tpu.memory_space<vmem>>, %arg3: memref<96x1xf32, #tpu.memory_space<vmem>>, %arg4: memref<1x96x64xbf16, #tpu.memory_space<vmem>>, %arg5: memref<1x1x64xf32, #tpu.memory_space<vmem>>, %arg6: memref<1x1x64xf32, #tpu.memory_space<vmem>>) attributes {dimension_semantics = [#tpu.dimension_semantics<parallel>], iteration_bounds = array<i64: 2>, scalar_prefetch = 0 : i64, scratch_operands = 0 : i64, tpu.core_type = #tpu.core_type<tc>, window_params = [{transform_indices = @transform_0, window_bounds = array<i64: 1, 160, 64>}, {pipeline_mode = #tpu.pipeline_mode<synchronous>, transform_indices = @transform_1, window_bounds = array<i64: 25, 64, 64>}, {pipeline_mode = #tpu.pipeline_mode<synchronous>, transform_indices = @transform_2, window_bounds = array<i64: 96, 1>}, {transform_indices = @transform_3, window_bounds = array<i64: 1, 96, 64>}, {transform_indices = @transform_4, window_bounds = array<i64: 1, 1, 64>}, {transform_indices = @transform_5, window_bounds = array<i64: 1, 1, 64>}]} {
    %cst = arith.constant 0.000000e+00 : f32
    %0 = vector.broadcast %cst : f32 to vector<96x64xf32>
    %c0 = arith.constant 0 : index
    %c0_0 = arith.constant 0 : index
    %c0_1 = arith.constant 0 : index
    %1 = vector.load %arg1[%c0, %c0_0, %c0_1] : memref<1x160x64xbf16, #tpu.memory_space<vmem>>, vector<1x96x64xbf16>
    %2 = vector.shape_cast %1 : vector<1x96x64xbf16> to vector<96x64xbf16>
    %c0_2 = arith.constant 0 : index
    %c0_3 = arith.constant 0 : index
    %c0_4 = arith.constant 0 : index
    %3 = vector.load %arg2[%c0_2, %c0_3, %c0_4] : memref<25x64x64xbf16, #tpu.memory_space<vmem>>, vector<1x64x64xbf16>
    %4 = vector.shape_cast %3 : vector<1x64x64xbf16> to vector<64x64xbf16>
    %cst_5 = arith.constant dense<0.000000e+00> : vector<96x64xf32>
    %5 = tpu.matmul %2, %4, %cst_5 {dimension_numbers = #tpu.dot_dimension_numbers<[1], [0], [0], [1], [0, 0, 1, 1], [], []>} : vector<96x64xbf16>, vector<64x64xbf16>, vector<96x64xf32> -> vector<96x64xf32>
    %6 = arith.addf %0, %5 : vector<96x64xf32>
    %c0_6 = arith.constant 0 : index
    %c1 = arith.constant 1 : index
    %c0_7 = arith.constant 0 : index
    %7 = vector.load %arg1[%c0_6, %c1, %c0_7] : memref<1x160x64xbf16, #tpu.memory_space<vmem>>, vector<1x96x64xbf16>
    %8 = vector.shape_cast %7 : vector<1x96x64xbf16> to vector<96x64xbf16>
    %c1_8 = arith.constant 1 : index
    %c0_9 = arith.constant 0 : index
    %c0_10 = arith.constant 0 : index
    %9 = vector.load %arg2[%c1_8, %c0_9, %c0_10] : memref<25x64x64xbf16, #tpu.memory_space<vmem>>, vector<1x64x64xbf16>
    %10 = vector.shape_cast %9 : vector<1x64x64xbf16> to vector<64x64xbf16>
    %cst_11 = arith.constant dense<0.000000e+00> : vector<96x64xf32>
    %11 = tpu.matmul %8, %10, %cst_11 {dimension_numbers = #tpu.dot_dimension_numbers<[1], [0], [0], [1], [0, 0, 1, 1], [], []>} : vector<96x64xbf16>, vector<64x64xbf16>, vector<96x64xf32> -> vector<96x64xf32>
    %12 = arith.addf %6, %11 : vector<96x64xf32>
    %c0_12 = arith.constant 0 : index
    %c2 = arith.constant 2 : index
    %c0_13 = arith.constant 0 : index
    %13 = vector.load %arg1[%c0_12, %c2, %c0_13] : memref<1x160x64xbf16, #tpu.memory_space<vmem>>, vector<1x96x64xbf16>
    %14 = vector.shape_cast %13 : vector<1x96x64xbf16> to vector<96x64xbf16>
    %c2_14 = arith.constant 2 : index
    %c0_15 = arith.constant 0 : index
    %c0_16 = arith.constant 0 : index
    %15 = vector.load %arg2[%c2_14, %c0_15, %c0_16] : memref<25x64x64xbf16, #tpu.memory_space<vmem>>, vector<1x64x64xbf16>
    %16 = vector.shape_cast %15 : vector<1x64x64xbf16> to vector<64x64xbf16>
    %cst_17 = arith.constant dense<0.000000e+00> : vector<96x64xf32>
    %17 = tpu.matmul %14, %16, %cst_17 {dimension_numbers = #tpu.dot_dimension_numbers<[1], [0], [0], [1], [0, 0, 1, 1], [], []>} : vector<96x64xbf16>, vector<64x64xbf16>, vector<96x64xf32> -> vector<96x64xf32>
    %18 = arith.addf %12, %17 : vector<96x64xf32>
    %c0_18 = arith.constant 0 : index
    %c3 = arith.constant 3 : index
    %c0_19 = arith.constant 0 : index
    %19 = vector.load %arg1[%c0_18, %c3, %c0_19] : memref<1x160x64xbf16, #tpu.memory_space<vmem>>, vector<1x96x64xbf16>
    %20 = vector.shape_cast %19 : vector<1x96x64xbf16> to vector<96x64xbf16>
    %c3_20 = arith.constant 3 : index
    %c0_21 = arith.constant 0 : index
    %c0_22 = arith.constant 0 : index
    %21 = vector.load %arg2[%c3_20, %c0_21, %c0_22] : memref<25x64x64xbf16, #tpu.memory_space<vmem>>, vector<1x64x64xbf16>
    %22 = vector.shape_cast %21 : vector<1x64x64xbf16> to vector<64x64xbf16>
    %cst_23 = arith.constant dense<0.000000e+00> : vector<96x64xf32>
    %23 = tpu.matmul %20, %22, %cst_23 {dimension_numbers = #tpu.dot_dimension_numbers<[1], [0], [0], [1], [0, 0, 1, 1], [], []>} : vector<96x64xbf16>, vector<64x64xbf16>, vector<96x64xf32> -> vector<96x64xf32>
    %24 = arith.addf %18, %23 : vector<96x64xf32>
    %c0_24 = arith.constant 0 : index
    %c4 = arith.constant 4 : index
    %c0_25 = arith.constant 0 : index
    %25 = vector.load %arg1[%c0_24, %c4, %c0_25] : memref<1x160x64xbf16, #tpu.memory_space<vmem>>, vector<1x96x64xbf16>
    %26 = vector.shape_cast %25 : vector<1x96x64xbf16> to vector<96x64xbf16>
    %c4_26 = arith.constant 4 : index
    %c0_27 = arith.constant 0 : index
    %c0_28 = arith.constant 0 : index
    %27 = vector.load %arg2[%c4_26, %c0_27, %c0_28] : memref<25x64x64xbf16, #tpu.memory_space<vmem>>, vector<1x64x64xbf16>
    %28 = vector.shape_cast %27 : vector<1x64x64xbf16> to vector<64x64xbf16>
    %cst_29 = arith.constant dense<0.000000e+00> : vector<96x64xf32>
    %29 = tpu.matmul %26, %28, %cst_29 {dimension_numbers = #tpu.dot_dimension_numbers<[1], [0], [0], [1], [0, 0, 1, 1], [], []>} : vector<96x64xbf16>, vector<64x64xbf16>, vector<96x64xf32> -> vector<96x64xf32>
    %30 = arith.addf %24, %29 : vector<96x64xf32>
    %c0_30 = arith.constant 0 : index
    %c12 = arith.constant 12 : index
    %c0_31 = arith.constant 0 : index
    %31 = vector.load %arg1[%c0_30, %c12, %c0_31] : memref<1x160x64xbf16, #tpu.memory_space<vmem>>, vector<1x96x64xbf16>
    %32 = vector.shape_cast %31 : vector<1x96x64xbf16> to vector<96x64xbf16>
    %c5 = arith.constant 5 : index
    %c0_32 = arith.constant 0 : index
    %c0_33 = arith.constant 0 : index
    %33 = vector.load %arg2[%c5, %c0_32, %c0_33] : memref<25x64x64xbf16, #tpu.memory_space<vmem>>, vector<1x64x64xbf16>
    %34 = vector.shape_cast %33 : vector<1x64x64xbf16> to vector<64x64xbf16>
    %cst_34 = arith.constant dense<0.000000e+00> : vector<96x64xf32>
    %35 = tpu.matmul %32, %34, %cst_34 {dimension_numbers = #tpu.dot_dimension_numbers<[1], [0], [0], [1], [0, 0, 1, 1], [], []>} : vector<96x64xbf16>, vector<64x64xbf16>, vector<96x64xf32> -> vector<96x64xf32>
    %36 = arith.addf %30, %35 : vector<96x64xf32>
    %c0_35 = arith.constant 0 : index
    %c13 = arith.constant 13 : index
    %c0_36 = arith.constant 0 : index
    %37 = vector.load %arg1[%c0_35, %c13, %c0_36] : memref<1x160x64xbf16, #tpu.memory_space<vmem>>, vector<1x96x64xbf16>
    %38 = vector.shape_cast %37 : vector<1x96x64xbf16> to vector<96x64xbf16>
    %c6 = arith.constant 6 : index
    %c0_37 = arith.constant 0 : index
    %c0_38 = arith.constant 0 : index
    %39 = vector.load %arg2[%c6, %c0_37, %c0_38] : memref<25x64x64xbf16, #tpu.memory_space<vmem>>, vector<1x64x64xbf16>
    %40 = vector.shape_cast %39 : vector<1x64x64xbf16> to vector<64x64xbf16>
    %cst_39 = arith.constant dense<0.000000e+00> : vector<96x64xf32>
    %41 = tpu.matmul %38, %40, %cst_39 {dimension_numbers = #tpu.dot_dimension_numbers<[1], [0], [0], [1], [0, 0, 1, 1], [], []>} : vector<96x64xbf16>, vector<64x64xbf16>, vector<96x64xf32> -> vector<96x64xf32>
    %42 = arith.addf %36, %41 : vector<96x64xf32>
    %c0_40 = arith.constant 0 : index
    %c14 = arith.constant 14 : index
    %c0_41 = arith.constant 0 : index
    %43 = vector.load %arg1[%c0_40, %c14, %c0_41] : memref<1x160x64xbf16, #tpu.memory_space<vmem>>, vector<1x96x64xbf16>
    %44 = vector.shape_cast %43 : vector<1x96x64xbf16> to vector<96x64xbf16>
    %c7 = arith.constant 7 : index
    %c0_42 = arith.constant 0 : index
    %c0_43 = arith.constant 0 : index
    %45 = vector.load %arg2[%c7, %c0_42, %c0_43] : memref<25x64x64xbf16, #tpu.memory_space<vmem>>, vector<1x64x64xbf16>
    %46 = vector.shape_cast %45 : vector<1x64x64xbf16> to vector<64x64xbf16>
    %cst_44 = arith.constant dense<0.000000e+00> : vector<96x64xf32>
    %47 = tpu.matmul %44, %46, %cst_44 {dimension_numbers = #tpu.dot_dimension_numbers<[1], [0], [0], [1], [0, 0, 1, 1], [], []>} : vector<96x64xbf16>, vector<64x64xbf16>, vector<96x64xf32> -> vector<96x64xf32>
    %48 = arith.addf %42, %47 : vector<96x64xf32>
    %c0_45 = arith.constant 0 : index
    %c15 = arith.constant 15 : index
    %c0_46 = arith.constant 0 : index
    %49 = vector.load %arg1[%c0_45, %c15, %c0_46] : memref<1x160x64xbf16, #tpu.memory_space<vmem>>, vector<1x96x64xbf16>
    %50 = vector.shape_cast %49 : vector<1x96x64xbf16> to vector<96x64xbf16>
    %c8 = arith.constant 8 : index
    %c0_47 = arith.constant 0 : index
    %c0_48 = arith.constant 0 : index
    %51 = vector.load %arg2[%c8, %c0_47, %c0_48] : memref<25x64x64xbf16, #tpu.memory_space<vmem>>, vector<1x64x64xbf16>
    %52 = vector.shape_cast %51 : vector<1x64x64xbf16> to vector<64x64xbf16>
    %cst_49 = arith.constant dense<0.000000e+00> : vector<96x64xf32>
    %53 = tpu.matmul %50, %52, %cst_49 {dimension_numbers = #tpu.dot_dimension_numbers<[1], [0], [0], [1], [0, 0, 1, 1], [], []>} : vector<96x64xbf16>, vector<64x64xbf16>, vector<96x64xf32> -> vector<96x64xf32>
    %54 = arith.addf %48, %53 : vector<96x64xf32>
    %c0_50 = arith.constant 0 : index
    %c16 = arith.constant 16 : index
    %c0_51 = arith.constant 0 : index
    %55 = vector.load %arg1[%c0_50, %c16, %c0_51] : memref<1x160x64xbf16, #tpu.memory_space<vmem>>, vector<1x96x64xbf16>
    %56 = vector.shape_cast %55 : vector<1x96x64xbf16> to vector<96x64xbf16>
    %c9 = arith.constant 9 : index
    %c0_52 = arith.constant 0 : index
    %c0_53 = arith.constant 0 : index
    %57 = vector.load %arg2[%c9, %c0_52, %c0_53] : memref<25x64x64xbf16, #tpu.memory_space<vmem>>, vector<1x64x64xbf16>
    %58 = vector.shape_cast %57 : vector<1x64x64xbf16> to vector<64x64xbf16>
    %cst_54 = arith.constant dense<0.000000e+00> : vector<96x64xf32>
    %59 = tpu.matmul %56, %58, %cst_54 {dimension_numbers = #tpu.dot_dimension_numbers<[1], [0], [0], [1], [0, 0, 1, 1], [], []>} : vector<96x64xbf16>, vector<64x64xbf16>, vector<96x64xf32> -> vector<96x64xf32>
    %60 = arith.addf %54, %59 : vector<96x64xf32>
    %c0_55 = arith.constant 0 : index
    %c24 = arith.constant 24 : index
    %c0_56 = arith.constant 0 : index
    %61 = vector.load %arg1[%c0_55, %c24, %c0_56] : memref<1x160x64xbf16, #tpu.memory_space<vmem>>, vector<1x96x64xbf16>
    %62 = vector.shape_cast %61 : vector<1x96x64xbf16> to vector<96x64xbf16>
    %c10 = arith.constant 10 : index
    %c0_57 = arith.constant 0 : index
    %c0_58 = arith.constant 0 : index
    %63 = vector.load %arg2[%c10, %c0_57, %c0_58] : memref<25x64x64xbf16, #tpu.memory_space<vmem>>, vector<1x64x64xbf16>
    %64 = vector.shape_cast %63 : vector<1x64x64xbf16> to vector<64x64xbf16>
    %cst_59 = arith.constant dense<0.000000e+00> : vector<96x64xf32>
    %65 = tpu.matmul %62, %64, %cst_59 {dimension_numbers = #tpu.dot_dimension_numbers<[1], [0], [0], [1], [0, 0, 1, 1], [], []>} : vector<96x64xbf16>, vector<64x64xbf16>, vector<96x64xf32> -> vector<96x64xf32>
    %66 = arith.addf %60, %65 : vector<96x64xf32>
    %c0_60 = arith.constant 0 : index
    %c25 = arith.constant 25 : index
    %c0_61 = arith.constant 0 : index
    %67 = vector.load %arg1[%c0_60, %c25, %c0_61] : memref<1x160x64xbf16, #tpu.memory_space<vmem>>, vector<1x96x64xbf16>
    %68 = vector.shape_cast %67 : vector<1x96x64xbf16> to vector<96x64xbf16>
    %c11 = arith.constant 11 : index
    %c0_62 = arith.constant 0 : index
    %c0_63 = arith.constant 0 : index
    %69 = vector.load %arg2[%c11, %c0_62, %c0_63] : memref<25x64x64xbf16, #tpu.memory_space<vmem>>, vector<1x64x64xbf16>
    %70 = vector.shape_cast %69 : vector<1x64x64xbf16> to vector<64x64xbf16>
    %cst_64 = arith.constant dense<0.000000e+00> : vector<96x64xf32>
    %71 = tpu.matmul %68, %70, %cst_64 {dimension_numbers = #tpu.dot_dimension_numbers<[1], [0], [0], [1], [0, 0, 1, 1], [], []>} : vector<96x64xbf16>, vector<64x64xbf16>, vector<96x64xf32> -> vector<96x64xf32>
    %72 = arith.addf %66, %71 : vector<96x64xf32>
    %c0_65 = arith.constant 0 : index
    %c26 = arith.constant 26 : index
    %c0_66 = arith.constant 0 : index
    %73 = vector.load %arg1[%c0_65, %c26, %c0_66] : memref<1x160x64xbf16, #tpu.memory_space<vmem>>, vector<1x96x64xbf16>
    %74 = vector.shape_cast %73 : vector<1x96x64xbf16> to vector<96x64xbf16>
    %c12_67 = arith.constant 12 : index
    %c0_68 = arith.constant 0 : index
    %c0_69 = arith.constant 0 : index
    %75 = vector.load %arg2[%c12_67, %c0_68, %c0_69] : memref<25x64x64xbf16, #tpu.memory_space<vmem>>, vector<1x64x64xbf16>
    %76 = vector.shape_cast %75 : vector<1x64x64xbf16> to vector<64x64xbf16>
    %cst_70 = arith.constant dense<0.000000e+00> : vector<96x64xf32>
    %77 = tpu.matmul %74, %76, %cst_70 {dimension_numbers = #tpu.dot_dimension_numbers<[1], [0], [0], [1], [0, 0, 1, 1], [], []>} : vector<96x64xbf16>, vector<64x64xbf16>, vector<96x64xf32> -> vector<96x64xf32>
    %78 = arith.addf %72, %77 : vector<96x64xf32>
    %c0_71 = arith.constant 0 : index
    %c27 = arith.constant 27 : index
    %c0_72 = arith.constant 0 : index
    %79 = vector.load %arg1[%c0_71, %c27, %c0_72] : memref<1x160x64xbf16, #tpu.memory_space<vmem>>, vector<1x96x64xbf16>
    %80 = vector.shape_cast %79 : vector<1x96x64xbf16> to vector<96x64xbf16>
    %c13_73 = arith.constant 13 : index
    %c0_74 = arith.constant 0 : index
    %c0_75 = arith.constant 0 : index
    %81 = vector.load %arg2[%c13_73, %c0_74, %c0_75] : memref<25x64x64xbf16, #tpu.memory_space<vmem>>, vector<1x64x64xbf16>
    %82 = vector.shape_cast %81 : vector<1x64x64xbf16> to vector<64x64xbf16>
    %cst_76 = arith.constant dense<0.000000e+00> : vector<96x64xf32>
    %83 = tpu.matmul %80, %82, %cst_76 {dimension_numbers = #tpu.dot_dimension_numbers<[1], [0], [0], [1], [0, 0, 1, 1], [], []>} : vector<96x64xbf16>, vector<64x64xbf16>, vector<96x64xf32> -> vector<96x64xf32>
    %84 = arith.addf %78, %83 : vector<96x64xf32>
    %c0_77 = arith.constant 0 : index
    %c28 = arith.constant 28 : index
    %c0_78 = arith.constant 0 : index
    %85 = vector.load %arg1[%c0_77, %c28, %c0_78] : memref<1x160x64xbf16, #tpu.memory_space<vmem>>, vector<1x96x64xbf16>
    %86 = vector.shape_cast %85 : vector<1x96x64xbf16> to vector<96x64xbf16>
    %c14_79 = arith.constant 14 : index
    %c0_80 = arith.constant 0 : index
    %c0_81 = arith.constant 0 : index
    %87 = vector.load %arg2[%c14_79, %c0_80, %c0_81] : memref<25x64x64xbf16, #tpu.memory_space<vmem>>, vector<1x64x64xbf16>
    %88 = vector.shape_cast %87 : vector<1x64x64xbf16> to vector<64x64xbf16>
    %cst_82 = arith.constant dense<0.000000e+00> : vector<96x64xf32>
    %89 = tpu.matmul %86, %88, %cst_82 {dimension_numbers = #tpu.dot_dimension_numbers<[1], [0], [0], [1], [0, 0, 1, 1], [], []>} : vector<96x64xbf16>, vector<64x64xbf16>, vector<96x64xf32> -> vector<96x64xf32>
    %90 = arith.addf %84, %89 : vector<96x64xf32>
    %c0_83 = arith.constant 0 : index
    %c36 = arith.constant 36 : index
    %c0_84 = arith.constant 0 : index
    %91 = vector.load %arg1[%c0_83, %c36, %c0_84] : memref<1x160x64xbf16, #tpu.memory_space<vmem>>, vector<1x96x64xbf16>
    %92 = vector.shape_cast %91 : vector<1x96x64xbf16> to vector<96x64xbf16>
    %c15_85 = arith.constant 15 : index
    %c0_86 = arith.constant 0 : index
    %c0_87 = arith.constant 0 : index
    %93 = vector.load %arg2[%c15_85, %c0_86, %c0_87] : memref<25x64x64xbf16, #tpu.memory_space<vmem>>, vector<1x64x64xbf16>
    %94 = vector.shape_cast %93 : vector<1x64x64xbf16> to vector<64x64xbf16>
    %cst_88 = arith.constant dense<0.000000e+00> : vector<96x64xf32>
    %95 = tpu.matmul %92, %94, %cst_88 {dimension_numbers = #tpu.dot_dimension_numbers<[1], [0], [0], [1], [0, 0, 1, 1], [], []>} : vector<96x64xbf16>, vector<64x64xbf16>, vector<96x64xf32> -> vector<96x64xf32>
    %96 = arith.addf %90, %95 : vector<96x64xf32>
    %c0_89 = arith.constant 0 : index
    %c37 = arith.constant 37 : index
    %c0_90 = arith.constant 0 : index
    %97 = vector.load %arg1[%c0_89, %c37, %c0_90] : memref<1x160x64xbf16, #tpu.memory_space<vmem>>, vector<1x96x64xbf16>
    %98 = vector.shape_cast %97 : vector<1x96x64xbf16> to vector<96x64xbf16>
    %c16_91 = arith.constant 16 : index
    %c0_92 = arith.constant 0 : index
    %c0_93 = arith.constant 0 : index
    %99 = vector.load %arg2[%c16_91, %c0_92, %c0_93] : memref<25x64x64xbf16, #tpu.memory_space<vmem>>, vector<1x64x64xbf16>
    %100 = vector.shape_cast %99 : vector<1x64x64xbf16> to vector<64x64xbf16>
    %cst_94 = arith.constant dense<0.000000e+00> : vector<96x64xf32>
    %101 = tpu.matmul %98, %100, %cst_94 {dimension_numbers = #tpu.dot_dimension_numbers<[1], [0], [0], [1], [0, 0, 1, 1], [], []>} : vector<96x64xbf16>, vector<64x64xbf16>, vector<96x64xf32> -> vector<96x64xf32>
    %102 = arith.addf %96, %101 : vector<96x64xf32>
    %c0_95 = arith.constant 0 : index
    %c38 = arith.constant 38 : index
    %c0_96 = arith.constant 0 : index
    %103 = vector.load %arg1[%c0_95, %c38, %c0_96] : memref<1x160x64xbf16, #tpu.memory_space<vmem>>, vector<1x96x64xbf16>
    %104 = vector.shape_cast %103 : vector<1x96x64xbf16> to vector<96x64xbf16>
    %c17 = arith.constant 17 : index
    %c0_97 = arith.constant 0 : index
    %c0_98 = arith.constant 0 : index
    %105 = vector.load %arg2[%c17, %c0_97, %c0_98] : memref<25x64x64xbf16, #tpu.memory_space<vmem>>, vector<1x64x64xbf16>
    %106 = vector.shape_cast %105 : vector<1x64x64xbf16> to vector<64x64xbf16>
    %cst_99 = arith.constant dense<0.000000e+00> : vector<96x64xf32>
    %107 = tpu.matmul %104, %106, %cst_99 {dimension_numbers = #tpu.dot_dimension_numbers<[1], [0], [0], [1], [0, 0, 1, 1], [], []>} : vector<96x64xbf16>, vector<64x64xbf16>, vector<96x64xf32> -> vector<96x64xf32>
    %108 = arith.addf %102, %107 : vector<96x64xf32>
    %c0_100 = arith.constant 0 : index
    %c39 = arith.constant 39 : index
    %c0_101 = arith.constant 0 : index
    %109 = vector.load %arg1[%c0_100, %c39, %c0_101] : memref<1x160x64xbf16, #tpu.memory_space<vmem>>, vector<1x96x64xbf16>
    %110 = vector.shape_cast %109 : vector<1x96x64xbf16> to vector<96x64xbf16>
    %c18 = arith.constant 18 : index
    %c0_102 = arith.constant 0 : index
    %c0_103 = arith.constant 0 : index
    %111 = vector.load %arg2[%c18, %c0_102, %c0_103] : memref<25x64x64xbf16, #tpu.memory_space<vmem>>, vector<1x64x64xbf16>
    %112 = vector.shape_cast %111 : vector<1x64x64xbf16> to vector<64x64xbf16>
    %cst_104 = arith.constant dense<0.000000e+00> : vector<96x64xf32>
    %113 = tpu.matmul %110, %112, %cst_104 {dimension_numbers = #tpu.dot_dimension_numbers<[1], [0], [0], [1], [0, 0, 1, 1], [], []>} : vector<96x64xbf16>, vector<64x64xbf16>, vector<96x64xf32> -> vector<96x64xf32>
    %114 = arith.addf %108, %113 : vector<96x64xf32>
    %c0_105 = arith.constant 0 : index
    %c40 = arith.constant 40 : index
    %c0_106 = arith.constant 0 : index
    %115 = vector.load %arg1[%c0_105, %c40, %c0_106] : memref<1x160x64xbf16, #tpu.memory_space<vmem>>, vector<1x96x64xbf16>
    %116 = vector.shape_cast %115 : vector<1x96x64xbf16> to vector<96x64xbf16>
    %c19 = arith.constant 19 : index
    %c0_107 = arith.constant 0 : index
    %c0_108 = arith.constant 0 : index
    %117 = vector.load %arg2[%c19, %c0_107, %c0_108] : memref<25x64x64xbf16, #tpu.memory_space<vmem>>, vector<1x64x64xbf16>
    %118 = vector.shape_cast %117 : vector<1x64x64xbf16> to vector<64x64xbf16>
    %cst_109 = arith.constant dense<0.000000e+00> : vector<96x64xf32>
    %119 = tpu.matmul %116, %118, %cst_109 {dimension_numbers = #tpu.dot_dimension_numbers<[1], [0], [0], [1], [0, 0, 1, 1], [], []>} : vector<96x64xbf16>, vector<64x64xbf16>, vector<96x64xf32> -> vector<96x64xf32>
    %120 = arith.addf %114, %119 : vector<96x64xf32>
    %c0_110 = arith.constant 0 : index
    %c48 = arith.constant 48 : index
    %c0_111 = arith.constant 0 : index
    %121 = vector.load %arg1[%c0_110, %c48, %c0_111] : memref<1x160x64xbf16, #tpu.memory_space<vmem>>, vector<1x96x64xbf16>
    %122 = vector.shape_cast %121 : vector<1x96x64xbf16> to vector<96x64xbf16>
    %c20 = arith.constant 20 : index
    %c0_112 = arith.constant 0 : index
    %c0_113 = arith.constant 0 : index
    %123 = vector.load %arg2[%c20, %c0_112, %c0_113] : memref<25x64x64xbf16, #tpu.memory_space<vmem>>, vector<1x64x64xbf16>
    %124 = vector.shape_cast %123 : vector<1x64x64xbf16> to vector<64x64xbf16>
    %cst_114 = arith.constant dense<0.000000e+00> : vector<96x64xf32>
    %125 = tpu.matmul %122, %124, %cst_114 {dimension_numbers = #tpu.dot_dimension_numbers<[1], [0], [0], [1], [0, 0, 1, 1], [], []>} : vector<96x64xbf16>, vector<64x64xbf16>, vector<96x64xf32> -> vector<96x64xf32>
    %126 = arith.addf %120, %125 : vector<96x64xf32>
    %c0_115 = arith.constant 0 : index
    %c49 = arith.constant 49 : index
    %c0_116 = arith.constant 0 : index
    %127 = vector.load %arg1[%c0_115, %c49, %c0_116] : memref<1x160x64xbf16, #tpu.memory_space<vmem>>, vector<1x96x64xbf16>
    %128 = vector.shape_cast %127 : vector<1x96x64xbf16> to vector<96x64xbf16>
    %c21 = arith.constant 21 : index
    %c0_117 = arith.constant 0 : index
    %c0_118 = arith.constant 0 : index
    %129 = vector.load %arg2[%c21, %c0_117, %c0_118] : memref<25x64x64xbf16, #tpu.memory_space<vmem>>, vector<1x64x64xbf16>
    %130 = vector.shape_cast %129 : vector<1x64x64xbf16> to vector<64x64xbf16>
    %cst_119 = arith.constant dense<0.000000e+00> : vector<96x64xf32>
    %131 = tpu.matmul %128, %130, %cst_119 {dimension_numbers = #tpu.dot_dimension_numbers<[1], [0], [0], [1], [0, 0, 1, 1], [], []>} : vector<96x64xbf16>, vector<64x64xbf16>, vector<96x64xf32> -> vector<96x64xf32>
    %132 = arith.addf %126, %131 : vector<96x64xf32>
    %c0_120 = arith.constant 0 : index
    %c50 = arith.constant 50 : index
    %c0_121 = arith.constant 0 : index
    %133 = vector.load %arg1[%c0_120, %c50, %c0_121] : memref<1x160x64xbf16, #tpu.memory_space<vmem>>, vector<1x96x64xbf16>
    %134 = vector.shape_cast %133 : vector<1x96x64xbf16> to vector<96x64xbf16>
    %c22 = arith.constant 22 : index
    %c0_122 = arith.constant 0 : index
    %c0_123 = arith.constant 0 : index
    %135 = vector.load %arg2[%c22, %c0_122, %c0_123] : memref<25x64x64xbf16, #tpu.memory_space<vmem>>, vector<1x64x64xbf16>
    %136 = vector.shape_cast %135 : vector<1x64x64xbf16> to vector<64x64xbf16>
    %cst_124 = arith.constant dense<0.000000e+00> : vector<96x64xf32>
    %137 = tpu.matmul %134, %136, %cst_124 {dimension_numbers = #tpu.dot_dimension_numbers<[1], [0], [0], [1], [0, 0, 1, 1], [], []>} : vector<96x64xbf16>, vector<64x64xbf16>, vector<96x64xf32> -> vector<96x64xf32>
    %138 = arith.addf %132, %137 : vector<96x64xf32>
    %c0_125 = arith.constant 0 : index
    %c51 = arith.constant 51 : index
    %c0_126 = arith.constant 0 : index
    %139 = vector.load %arg1[%c0_125, %c51, %c0_126] : memref<1x160x64xbf16, #tpu.memory_space<vmem>>, vector<1x96x64xbf16>
    %140 = vector.shape_cast %139 : vector<1x96x64xbf16> to vector<96x64xbf16>
    %c23 = arith.constant 23 : index
    %c0_127 = arith.constant 0 : index
    %c0_128 = arith.constant 0 : index
    %141 = vector.load %arg2[%c23, %c0_127, %c0_128] : memref<25x64x64xbf16, #tpu.memory_space<vmem>>, vector<1x64x64xbf16>
    %142 = vector.shape_cast %141 : vector<1x64x64xbf16> to vector<64x64xbf16>
    %cst_129 = arith.constant dense<0.000000e+00> : vector<96x64xf32>
    %143 = tpu.matmul %140, %142, %cst_129 {dimension_numbers = #tpu.dot_dimension_numbers<[1], [0], [0], [1], [0, 0, 1, 1], [], []>} : vector<96x64xbf16>, vector<64x64xbf16>, vector<96x64xf32> -> vector<96x64xf32>
    %144 = arith.addf %138, %143 : vector<96x64xf32>
    %c0_130 = arith.constant 0 : index
    %c52 = arith.constant 52 : index
    %c0_131 = arith.constant 0 : index
    %145 = vector.load %arg1[%c0_130, %c52, %c0_131] : memref<1x160x64xbf16, #tpu.memory_space<vmem>>, vector<1x96x64xbf16>
    %146 = vector.shape_cast %145 : vector<1x96x64xbf16> to vector<96x64xbf16>
    %c24_132 = arith.constant 24 : index
    %c0_133 = arith.constant 0 : index
    %c0_134 = arith.constant 0 : index
    %147 = vector.load %arg2[%c24_132, %c0_133, %c0_134] : memref<25x64x64xbf16, #tpu.memory_space<vmem>>, vector<1x64x64xbf16>
    %148 = vector.shape_cast %147 : vector<1x64x64xbf16> to vector<64x64xbf16>
    %cst_135 = arith.constant dense<0.000000e+00> : vector<96x64xf32>
    %149 = tpu.matmul %146, %148, %cst_135 {dimension_numbers = #tpu.dot_dimension_numbers<[1], [0], [0], [1], [0, 0, 1, 1], [], []>} : vector<96x64xbf16>, vector<64x64xbf16>, vector<96x64xf32> -> vector<96x64xf32>
    %150 = arith.addf %144, %149 : vector<96x64xf32>
    %151 = arith.truncf %150 : vector<96x64xf32> to vector<96x64xbf16>
    %c0_136 = arith.constant 0 : index
    %c0_137 = arith.constant 0 : index
    %c0_138 = arith.constant 0 : index
    %152 = vector.load %arg4[%c0_136, %c0_137, %c0_138] : memref<1x96x64xbf16, #tpu.memory_space<vmem>>, vector<1x96x64xbf16>
    %153 = vector.shape_cast %152 : vector<1x96x64xbf16> to vector<96x64xbf16>
    %154 = vector.shape_cast %151 : vector<96x64xbf16> to vector<1x96x64xbf16>
    tpu.vector_store %arg4[%c0_136, %c0_137, %c0_138], %154 {strides = array<i32>} : memref<1x96x64xbf16, #tpu.memory_space<vmem>>, vector<1x96x64xbf16>,
    %c0_139 = arith.constant 0 : index
    %c0_140 = arith.constant 0 : index
    %155 = vector.load %arg3[%c0_139, %c0_140] : memref<96x1xf32, #tpu.memory_space<vmem>>, vector<96x1xf32>
    %156 = vector.broadcast %155 : vector<96x1xf32> to vector<96x64xf32>
    %157 = arith.mulf %150, %156 : vector<96x64xf32>
    %cst_141 = arith.constant dense<0.000000e+00> : vector<64xf32>
    %158 = vector.multi_reduction <add>, %157, %cst_141 [0] : vector<96x64xf32> to vector<64xf32>
    %159 = vector.shape_cast %158 : vector<64xf32> to vector<1x64xf32>
    %c0_142 = arith.constant 0 : index
    %c0_143 = arith.constant 0 : index
    %c0_144 = arith.constant 0 : index
    %160 = vector.load %arg5[%c0_142, %c0_143, %c0_144] : memref<1x1x64xf32, #tpu.memory_space<vmem>>, vector<1x1x64xf32>
    %161 = vector.shape_cast %160 : vector<1x1x64xf32> to vector<1x64xf32>
    %162 = vector.shape_cast %159 : vector<1x64xf32> to vector<1x1x64xf32>
    tpu.vector_store %arg5[%c0_142, %c0_143, %c0_144], %162 {strides = array<i32>} : memref<1x1x64xf32, #tpu.memory_space<vmem>>, vector<1x1x64xf32>,
    %163 = arith.mulf %157, %150 : vector<96x64xf32>
    %cst_145 = arith.constant dense<0.000000e+00> : vector<64xf32>
    %164 = vector.multi_reduction <add>, %163, %cst_145 [0] : vector<96x64xf32> to vector<64xf32>
    %165 = vector.shape_cast %164 : vector<64xf32> to vector<1x64xf32>
    %c0_146 = arith.constant 0 : index
    %c0_147 = arith.constant 0 : index
    %c0_148 = arith.constant 0 : index
    %166 = vector.load %arg6[%c0_146, %c0_147, %c0_148] : memref<1x1x64xf32, #tpu.memory_space<vmem>>, vector<1x1x64xf32>
    %167 = vector.shape_cast %166 : vector<1x1x64xf32> to vector<1x64xf32>
    %168 = vector.shape_cast %165 : vector<1x64xf32> to vector<1x1x64xf32>
    tpu.vector_store %arg6[%c0_146, %c0_147, %c0_148], %168 {strides = array<i32>} : memref<1x1x64xf32, #tpu.memory_space<vmem>>, vector<1x1x64xf32>,
    return
  }
  func.func @transform_0(%arg0: i32) -> (i32, i32, i32) {
    %c0_i32 = arith.constant 0 : i32
    %c0_i32_0 = arith.constant 0 : i32
    %c0_i32_1 = arith.constant 0 : i32
    return %arg0, %c0_i32, %c0_i32_0 : i32, i32, i32
  }
  func.func @transform_1(%arg0: i32) -> (i32, i32, i32) {
    %c0_i32 = arith.constant 0 : i32
    %c0_i32_0 = arith.constant 0 : i32
    %c0_i32_1 = arith.constant 0 : i32
    %c0_i32_2 = arith.constant 0 : i32
    return %c0_i32, %c0_i32_0, %c0_i32_1 : i32, i32, i32
  }
  func.func @transform_2(%arg0: i32) -> (i32, i32) {
    %c0_i32 = arith.constant 0 : i32
    %c0_i32_0 = arith.constant 0 : i32
    %c0_i32_1 = arith.constant 0 : i32
    return %c0_i32, %c0_i32_0 : i32, i32
  }
  func.func @transform_3(%arg0: i32) -> (i32, i32, i32) {
    %c0_i32 = arith.constant 0 : i32
    %c0_i32_0 = arith.constant 0 : i32
    %c0_i32_1 = arith.constant 0 : i32
    return %arg0, %c0_i32, %c0_i32_0 : i32, i32, i32
  }
  func.func @transform_4(%arg0: i32) -> (i32, i32, i32) {
    %c0_i32 = arith.constant 0 : i32
    %c0_i32_0 = arith.constant 0 : i32
    %c0_i32_1 = arith.constant 0 : i32
    return %arg0, %c0_i32, %c0_i32_0 : i32, i32, i32
  }
  func.func @transform_5(%arg0: i32) -> (i32, i32, i32) {
    %c0_i32 = arith.constant 0 : i32
    %c0_i32_0 = arith.constant 0 : i32
    %c0_i32_1 = arith.constant 0 : i32
    return %arg0, %c0_i32, %c0_i32_0 : i32, i32, i32
  }
}

module attributes {stable_mosaic.version = 11 : i64} {
  func.func @kernel(%arg0: i32, %arg1: memref<1x112x64xbf16, #tpu.memory_space<vmem>>, %arg2: memref<9x64x64xbf16, #tpu.memory_space<vmem>>, %arg3: memref<80x1xf32, #tpu.memory_space<vmem>>, %arg4: memref<1x80x64xbf16, #tpu.memory_space<vmem>>, %arg5: memref<1x1x64xf32, #tpu.memory_space<vmem>>, %arg6: memref<1x1x64xf32, #tpu.memory_space<vmem>>) attributes {dimension_semantics = [#tpu.dimension_semantics<parallel>], iteration_bounds = array<i64: 2>, scalar_prefetch = 0 : i64, scratch_operands = 0 : i64, tpu.core_type = #tpu.core_type<tc>, window_params = [{transform_indices = @transform_0, window_bounds = array<i64: 1, 112, 64>}, {pipeline_mode = #tpu.pipeline_mode<synchronous>, transform_indices = @transform_1, window_bounds = array<i64: 9, 64, 64>}, {pipeline_mode = #tpu.pipeline_mode<synchronous>, transform_indices = @transform_2, window_bounds = array<i64: 80, 1>}, {transform_indices = @transform_3, window_bounds = array<i64: 1, 80, 64>}, {transform_indices = @transform_4, window_bounds = array<i64: 1, 1, 64>}, {transform_indices = @transform_5, window_bounds = array<i64: 1, 1, 64>}]} {
    %cst = arith.constant 0.000000e+00 : f32
    %0 = vector.broadcast %cst : f32 to vector<80x64xf32>
    %c0 = arith.constant 0 : index
    %c0_0 = arith.constant 0 : index
    %c0_1 = arith.constant 0 : index
    %1 = vector.load %arg1[%c0, %c0_0, %c0_1] : memref<1x112x64xbf16, #tpu.memory_space<vmem>>, vector<1x80x64xbf16>
    %2 = vector.shape_cast %1 : vector<1x80x64xbf16> to vector<80x64xbf16>
    %c0_2 = arith.constant 0 : index
    %c0_3 = arith.constant 0 : index
    %c0_4 = arith.constant 0 : index
    %3 = vector.load %arg2[%c0_2, %c0_3, %c0_4] : memref<9x64x64xbf16, #tpu.memory_space<vmem>>, vector<1x64x64xbf16>
    %4 = vector.shape_cast %3 : vector<1x64x64xbf16> to vector<64x64xbf16>
    %cst_5 = arith.constant dense<0.000000e+00> : vector<80x64xf32>
    %5 = tpu.matmul %2, %4, %cst_5 {dimension_numbers = #tpu.dot_dimension_numbers<[1], [0], [0], [1], [0, 0, 1, 1], [], []>} : vector<80x64xbf16>, vector<64x64xbf16>, vector<80x64xf32> -> vector<80x64xf32>
    %6 = arith.addf %0, %5 : vector<80x64xf32>
    %c0_6 = arith.constant 0 : index
    %c1 = arith.constant 1 : index
    %c0_7 = arith.constant 0 : index
    %7 = vector.load %arg1[%c0_6, %c1, %c0_7] : memref<1x112x64xbf16, #tpu.memory_space<vmem>>, vector<1x80x64xbf16>
    %8 = vector.shape_cast %7 : vector<1x80x64xbf16> to vector<80x64xbf16>
    %c1_8 = arith.constant 1 : index
    %c0_9 = arith.constant 0 : index
    %c0_10 = arith.constant 0 : index
    %9 = vector.load %arg2[%c1_8, %c0_9, %c0_10] : memref<9x64x64xbf16, #tpu.memory_space<vmem>>, vector<1x64x64xbf16>
    %10 = vector.shape_cast %9 : vector<1x64x64xbf16> to vector<64x64xbf16>
    %cst_11 = arith.constant dense<0.000000e+00> : vector<80x64xf32>
    %11 = tpu.matmul %8, %10, %cst_11 {dimension_numbers = #tpu.dot_dimension_numbers<[1], [0], [0], [1], [0, 0, 1, 1], [], []>} : vector<80x64xbf16>, vector<64x64xbf16>, vector<80x64xf32> -> vector<80x64xf32>
    %12 = arith.addf %6, %11 : vector<80x64xf32>
    %c0_12 = arith.constant 0 : index
    %c2 = arith.constant 2 : index
    %c0_13 = arith.constant 0 : index
    %13 = vector.load %arg1[%c0_12, %c2, %c0_13] : memref<1x112x64xbf16, #tpu.memory_space<vmem>>, vector<1x80x64xbf16>
    %14 = vector.shape_cast %13 : vector<1x80x64xbf16> to vector<80x64xbf16>
    %c2_14 = arith.constant 2 : index
    %c0_15 = arith.constant 0 : index
    %c0_16 = arith.constant 0 : index
    %15 = vector.load %arg2[%c2_14, %c0_15, %c0_16] : memref<9x64x64xbf16, #tpu.memory_space<vmem>>, vector<1x64x64xbf16>
    %16 = vector.shape_cast %15 : vector<1x64x64xbf16> to vector<64x64xbf16>
    %cst_17 = arith.constant dense<0.000000e+00> : vector<80x64xf32>
    %17 = tpu.matmul %14, %16, %cst_17 {dimension_numbers = #tpu.dot_dimension_numbers<[1], [0], [0], [1], [0, 0, 1, 1], [], []>} : vector<80x64xbf16>, vector<64x64xbf16>, vector<80x64xf32> -> vector<80x64xf32>
    %18 = arith.addf %12, %17 : vector<80x64xf32>
    %c0_18 = arith.constant 0 : index
    %c10 = arith.constant 10 : index
    %c0_19 = arith.constant 0 : index
    %19 = vector.load %arg1[%c0_18, %c10, %c0_19] : memref<1x112x64xbf16, #tpu.memory_space<vmem>>, vector<1x80x64xbf16>
    %20 = vector.shape_cast %19 : vector<1x80x64xbf16> to vector<80x64xbf16>
    %c3 = arith.constant 3 : index
    %c0_20 = arith.constant 0 : index
    %c0_21 = arith.constant 0 : index
    %21 = vector.load %arg2[%c3, %c0_20, %c0_21] : memref<9x64x64xbf16, #tpu.memory_space<vmem>>, vector<1x64x64xbf16>
    %22 = vector.shape_cast %21 : vector<1x64x64xbf16> to vector<64x64xbf16>
    %cst_22 = arith.constant dense<0.000000e+00> : vector<80x64xf32>
    %23 = tpu.matmul %20, %22, %cst_22 {dimension_numbers = #tpu.dot_dimension_numbers<[1], [0], [0], [1], [0, 0, 1, 1], [], []>} : vector<80x64xbf16>, vector<64x64xbf16>, vector<80x64xf32> -> vector<80x64xf32>
    %24 = arith.addf %18, %23 : vector<80x64xf32>
    %c0_23 = arith.constant 0 : index
    %c11 = arith.constant 11 : index
    %c0_24 = arith.constant 0 : index
    %25 = vector.load %arg1[%c0_23, %c11, %c0_24] : memref<1x112x64xbf16, #tpu.memory_space<vmem>>, vector<1x80x64xbf16>
    %26 = vector.shape_cast %25 : vector<1x80x64xbf16> to vector<80x64xbf16>
    %c4 = arith.constant 4 : index
    %c0_25 = arith.constant 0 : index
    %c0_26 = arith.constant 0 : index
    %27 = vector.load %arg2[%c4, %c0_25, %c0_26] : memref<9x64x64xbf16, #tpu.memory_space<vmem>>, vector<1x64x64xbf16>
    %28 = vector.shape_cast %27 : vector<1x64x64xbf16> to vector<64x64xbf16>
    %cst_27 = arith.constant dense<0.000000e+00> : vector<80x64xf32>
    %29 = tpu.matmul %26, %28, %cst_27 {dimension_numbers = #tpu.dot_dimension_numbers<[1], [0], [0], [1], [0, 0, 1, 1], [], []>} : vector<80x64xbf16>, vector<64x64xbf16>, vector<80x64xf32> -> vector<80x64xf32>
    %30 = arith.addf %24, %29 : vector<80x64xf32>
    %c0_28 = arith.constant 0 : index
    %c12 = arith.constant 12 : index
    %c0_29 = arith.constant 0 : index
    %31 = vector.load %arg1[%c0_28, %c12, %c0_29] : memref<1x112x64xbf16, #tpu.memory_space<vmem>>, vector<1x80x64xbf16>
    %32 = vector.shape_cast %31 : vector<1x80x64xbf16> to vector<80x64xbf16>
    %c5 = arith.constant 5 : index
    %c0_30 = arith.constant 0 : index
    %c0_31 = arith.constant 0 : index
    %33 = vector.load %arg2[%c5, %c0_30, %c0_31] : memref<9x64x64xbf16, #tpu.memory_space<vmem>>, vector<1x64x64xbf16>
    %34 = vector.shape_cast %33 : vector<1x64x64xbf16> to vector<64x64xbf16>
    %cst_32 = arith.constant dense<0.000000e+00> : vector<80x64xf32>
    %35 = tpu.matmul %32, %34, %cst_32 {dimension_numbers = #tpu.dot_dimension_numbers<[1], [0], [0], [1], [0, 0, 1, 1], [], []>} : vector<80x64xbf16>, vector<64x64xbf16>, vector<80x64xf32> -> vector<80x64xf32>
    %36 = arith.addf %30, %35 : vector<80x64xf32>
    %c0_33 = arith.constant 0 : index
    %c20 = arith.constant 20 : index
    %c0_34 = arith.constant 0 : index
    %37 = vector.load %arg1[%c0_33, %c20, %c0_34] : memref<1x112x64xbf16, #tpu.memory_space<vmem>>, vector<1x80x64xbf16>
    %38 = vector.shape_cast %37 : vector<1x80x64xbf16> to vector<80x64xbf16>
    %c6 = arith.constant 6 : index
    %c0_35 = arith.constant 0 : index
    %c0_36 = arith.constant 0 : index
    %39 = vector.load %arg2[%c6, %c0_35, %c0_36] : memref<9x64x64xbf16, #tpu.memory_space<vmem>>, vector<1x64x64xbf16>
    %40 = vector.shape_cast %39 : vector<1x64x64xbf16> to vector<64x64xbf16>
    %cst_37 = arith.constant dense<0.000000e+00> : vector<80x64xf32>
    %41 = tpu.matmul %38, %40, %cst_37 {dimension_numbers = #tpu.dot_dimension_numbers<[1], [0], [0], [1], [0, 0, 1, 1], [], []>} : vector<80x64xbf16>, vector<64x64xbf16>, vector<80x64xf32> -> vector<80x64xf32>
    %42 = arith.addf %36, %41 : vector<80x64xf32>
    %c0_38 = arith.constant 0 : index
    %c21 = arith.constant 21 : index
    %c0_39 = arith.constant 0 : index
    %43 = vector.load %arg1[%c0_38, %c21, %c0_39] : memref<1x112x64xbf16, #tpu.memory_space<vmem>>, vector<1x80x64xbf16>
    %44 = vector.shape_cast %43 : vector<1x80x64xbf16> to vector<80x64xbf16>
    %c7 = arith.constant 7 : index
    %c0_40 = arith.constant 0 : index
    %c0_41 = arith.constant 0 : index
    %45 = vector.load %arg2[%c7, %c0_40, %c0_41] : memref<9x64x64xbf16, #tpu.memory_space<vmem>>, vector<1x64x64xbf16>
    %46 = vector.shape_cast %45 : vector<1x64x64xbf16> to vector<64x64xbf16>
    %cst_42 = arith.constant dense<0.000000e+00> : vector<80x64xf32>
    %47 = tpu.matmul %44, %46, %cst_42 {dimension_numbers = #tpu.dot_dimension_numbers<[1], [0], [0], [1], [0, 0, 1, 1], [], []>} : vector<80x64xbf16>, vector<64x64xbf16>, vector<80x64xf32> -> vector<80x64xf32>
    %48 = arith.addf %42, %47 : vector<80x64xf32>
    %c0_43 = arith.constant 0 : index
    %c22 = arith.constant 22 : index
    %c0_44 = arith.constant 0 : index
    %49 = vector.load %arg1[%c0_43, %c22, %c0_44] : memref<1x112x64xbf16, #tpu.memory_space<vmem>>, vector<1x80x64xbf16>
    %50 = vector.shape_cast %49 : vector<1x80x64xbf16> to vector<80x64xbf16>
    %c8 = arith.constant 8 : index
    %c0_45 = arith.constant 0 : index
    %c0_46 = arith.constant 0 : index
    %51 = vector.load %arg2[%c8, %c0_45, %c0_46] : memref<9x64x64xbf16, #tpu.memory_space<vmem>>, vector<1x64x64xbf16>
    %52 = vector.shape_cast %51 : vector<1x64x64xbf16> to vector<64x64xbf16>
    %cst_47 = arith.constant dense<0.000000e+00> : vector<80x64xf32>
    %53 = tpu.matmul %50, %52, %cst_47 {dimension_numbers = #tpu.dot_dimension_numbers<[1], [0], [0], [1], [0, 0, 1, 1], [], []>} : vector<80x64xbf16>, vector<64x64xbf16>, vector<80x64xf32> -> vector<80x64xf32>
    %54 = arith.addf %48, %53 : vector<80x64xf32>
    %55 = arith.truncf %54 : vector<80x64xf32> to vector<80x64xbf16>
    %c0_48 = arith.constant 0 : index
    %c0_49 = arith.constant 0 : index
    %c0_50 = arith.constant 0 : index
    %56 = vector.load %arg4[%c0_48, %c0_49, %c0_50] : memref<1x80x64xbf16, #tpu.memory_space<vmem>>, vector<1x80x64xbf16>
    %57 = vector.shape_cast %56 : vector<1x80x64xbf16> to vector<80x64xbf16>
    %58 = vector.shape_cast %55 : vector<80x64xbf16> to vector<1x80x64xbf16>
    tpu.vector_store %arg4[%c0_48, %c0_49, %c0_50], %58 {strides = array<i32>} : memref<1x80x64xbf16, #tpu.memory_space<vmem>>, vector<1x80x64xbf16>,
    %c0_51 = arith.constant 0 : index
    %c0_52 = arith.constant 0 : index
    %59 = vector.load %arg3[%c0_51, %c0_52] : memref<80x1xf32, #tpu.memory_space<vmem>>, vector<80x1xf32>
    %60 = vector.broadcast %59 : vector<80x1xf32> to vector<80x64xf32>
    %61 = arith.mulf %54, %60 : vector<80x64xf32>
    %cst_53 = arith.constant dense<0.000000e+00> : vector<64xf32>
    %62 = vector.multi_reduction <add>, %61, %cst_53 [0] : vector<80x64xf32> to vector<64xf32>
    %63 = vector.shape_cast %62 : vector<64xf32> to vector<1x64xf32>
    %c0_54 = arith.constant 0 : index
    %c0_55 = arith.constant 0 : index
    %c0_56 = arith.constant 0 : index
    %64 = vector.load %arg5[%c0_54, %c0_55, %c0_56] : memref<1x1x64xf32, #tpu.memory_space<vmem>>, vector<1x1x64xf32>
    %65 = vector.shape_cast %64 : vector<1x1x64xf32> to vector<1x64xf32>
    %66 = vector.shape_cast %63 : vector<1x64xf32> to vector<1x1x64xf32>
    tpu.vector_store %arg5[%c0_54, %c0_55, %c0_56], %66 {strides = array<i32>} : memref<1x1x64xf32, #tpu.memory_space<vmem>>, vector<1x1x64xf32>,
    %67 = arith.mulf %61, %54 : vector<80x64xf32>
    %cst_57 = arith.constant dense<0.000000e+00> : vector<64xf32>
    %68 = vector.multi_reduction <add>, %67, %cst_57 [0] : vector<80x64xf32> to vector<64xf32>
    %69 = vector.shape_cast %68 : vector<64xf32> to vector<1x64xf32>
    %c0_58 = arith.constant 0 : index
    %c0_59 = arith.constant 0 : index
    %c0_60 = arith.constant 0 : index
    %70 = vector.load %arg6[%c0_58, %c0_59, %c0_60] : memref<1x1x64xf32, #tpu.memory_space<vmem>>, vector<1x1x64xf32>
    %71 = vector.shape_cast %70 : vector<1x1x64xf32> to vector<1x64xf32>
    %72 = vector.shape_cast %69 : vector<1x64xf32> to vector<1x1x64xf32>
    tpu.vector_store %arg6[%c0_58, %c0_59, %c0_60], %72 {strides = array<i32>} : memref<1x1x64xf32, #tpu.memory_space<vmem>>, vector<1x1x64xf32>,
    return
  }
  func.func @transform_0(%arg0: i32) -> (i32, i32, i32) {
    %c0_i32 = arith.constant 0 : i32
    %c0_i32_0 = arith.constant 0 : i32
    %c0_i32_1 = arith.constant 0 : i32
    return %arg0, %c0_i32, %c0_i32_0 : i32, i32, i32
  }
  func.func @transform_1(%arg0: i32) -> (i32, i32, i32) {
    %c0_i32 = arith.constant 0 : i32
    %c0_i32_0 = arith.constant 0 : i32
    %c0_i32_1 = arith.constant 0 : i32
    %c0_i32_2 = arith.constant 0 : i32
    return %c0_i32, %c0_i32_0, %c0_i32_1 : i32, i32, i32
  }
  func.func @transform_2(%arg0: i32) -> (i32, i32) {
    %c0_i32 = arith.constant 0 : i32
    %c0_i32_0 = arith.constant 0 : i32
    %c0_i32_1 = arith.constant 0 : i32
    return %c0_i32, %c0_i32_0 : i32, i32
  }
  func.func @transform_3(%arg0: i32) -> (i32, i32, i32) {
    %c0_i32 = arith.constant 0 : i32
    %c0_i32_0 = arith.constant 0 : i32
    %c0_i32_1 = arith.constant 0 : i32
    return %arg0, %c0_i32, %c0_i32_0 : i32, i32, i32
  }
  func.func @transform_4(%arg0: i32) -> (i32, i32, i32) {
    %c0_i32 = arith.constant 0 : i32
    %c0_i32_0 = arith.constant 0 : i32
    %c0_i32_1 = arith.constant 0 : i32
    return %arg0, %c0_i32, %c0_i32_0 : i32, i32, i32
  }
  func.func @transform_5(%arg0: i32) -> (i32, i32, i32) {
    %c0_i32 = arith.constant 0 : i32
    %c0_i32_0 = arith.constant 0 : i32
    %c0_i32_1 = arith.constant 0 : i32
    return %arg0, %c0_i32, %c0_i32_0 : i32, i32, i32
  }
}

module attributes {stable_mosaic.version = 11 : i64} {
  func.func @kernel(%arg0: i32, %arg1: memref<1x112x64xbf16, #tpu.memory_space<vmem>>, %arg2: memref<9x64x8xbf16, #tpu.memory_space<vmem>>, %arg3: memref<1x8xf32, #tpu.memory_space<vmem>>, %arg4: memref<1x80x8xf32, #tpu.memory_space<vmem>>) attributes {dimension_semantics = [#tpu.dimension_semantics<parallel>], iteration_bounds = array<i64: 2>, scalar_prefetch = 0 : i64, scratch_operands = 0 : i64, tpu.core_type = #tpu.core_type<tc>, window_params = [{transform_indices = @transform_0, window_bounds = array<i64: 1, 112, 64>}, {pipeline_mode = #tpu.pipeline_mode<synchronous>, transform_indices = @transform_1, window_bounds = array<i64: 9, 64, 8>}, {pipeline_mode = #tpu.pipeline_mode<synchronous>, transform_indices = @transform_2, window_bounds = array<i64: 1, 8>}, {transform_indices = @transform_3, window_bounds = array<i64: 1, 80, 8>}]} {
    %cst = arith.constant 0.000000e+00 : f32
    %0 = vector.broadcast %cst : f32 to vector<80x8xf32>
    %c0 = arith.constant 0 : index
    %c0_0 = arith.constant 0 : index
    %c0_1 = arith.constant 0 : index
    %1 = vector.load %arg1[%c0, %c0_0, %c0_1] : memref<1x112x64xbf16, #tpu.memory_space<vmem>>, vector<1x80x64xbf16>
    %2 = vector.shape_cast %1 : vector<1x80x64xbf16> to vector<80x64xbf16>
    %c0_2 = arith.constant 0 : index
    %c0_3 = arith.constant 0 : index
    %c0_4 = arith.constant 0 : index
    %3 = vector.load %arg2[%c0_2, %c0_3, %c0_4] : memref<9x64x8xbf16, #tpu.memory_space<vmem>>, vector<1x64x8xbf16>
    %4 = vector.shape_cast %3 : vector<1x64x8xbf16> to vector<64x8xbf16>
    %cst_5 = arith.constant dense<0.000000e+00> : vector<80x8xf32>
    %5 = tpu.matmul %2, %4, %cst_5 {dimension_numbers = #tpu.dot_dimension_numbers<[1], [0], [0], [1], [0, 0, 1, 1], [], []>} : vector<80x64xbf16>, vector<64x8xbf16>, vector<80x8xf32> -> vector<80x8xf32>
    %6 = arith.addf %0, %5 : vector<80x8xf32>
    %c0_6 = arith.constant 0 : index
    %c1 = arith.constant 1 : index
    %c0_7 = arith.constant 0 : index
    %7 = vector.load %arg1[%c0_6, %c1, %c0_7] : memref<1x112x64xbf16, #tpu.memory_space<vmem>>, vector<1x80x64xbf16>
    %8 = vector.shape_cast %7 : vector<1x80x64xbf16> to vector<80x64xbf16>
    %c1_8 = arith.constant 1 : index
    %c0_9 = arith.constant 0 : index
    %c0_10 = arith.constant 0 : index
    %9 = vector.load %arg2[%c1_8, %c0_9, %c0_10] : memref<9x64x8xbf16, #tpu.memory_space<vmem>>, vector<1x64x8xbf16>
    %10 = vector.shape_cast %9 : vector<1x64x8xbf16> to vector<64x8xbf16>
    %cst_11 = arith.constant dense<0.000000e+00> : vector<80x8xf32>
    %11 = tpu.matmul %8, %10, %cst_11 {dimension_numbers = #tpu.dot_dimension_numbers<[1], [0], [0], [1], [0, 0, 1, 1], [], []>} : vector<80x64xbf16>, vector<64x8xbf16>, vector<80x8xf32> -> vector<80x8xf32>
    %12 = arith.addf %6, %11 : vector<80x8xf32>
    %c0_12 = arith.constant 0 : index
    %c2 = arith.constant 2 : index
    %c0_13 = arith.constant 0 : index
    %13 = vector.load %arg1[%c0_12, %c2, %c0_13] : memref<1x112x64xbf16, #tpu.memory_space<vmem>>, vector<1x80x64xbf16>
    %14 = vector.shape_cast %13 : vector<1x80x64xbf16> to vector<80x64xbf16>
    %c2_14 = arith.constant 2 : index
    %c0_15 = arith.constant 0 : index
    %c0_16 = arith.constant 0 : index
    %15 = vector.load %arg2[%c2_14, %c0_15, %c0_16] : memref<9x64x8xbf16, #tpu.memory_space<vmem>>, vector<1x64x8xbf16>
    %16 = vector.shape_cast %15 : vector<1x64x8xbf16> to vector<64x8xbf16>
    %cst_17 = arith.constant dense<0.000000e+00> : vector<80x8xf32>
    %17 = tpu.matmul %14, %16, %cst_17 {dimension_numbers = #tpu.dot_dimension_numbers<[1], [0], [0], [1], [0, 0, 1, 1], [], []>} : vector<80x64xbf16>, vector<64x8xbf16>, vector<80x8xf32> -> vector<80x8xf32>
    %18 = arith.addf %12, %17 : vector<80x8xf32>
    %c0_18 = arith.constant 0 : index
    %c10 = arith.constant 10 : index
    %c0_19 = arith.constant 0 : index
    %19 = vector.load %arg1[%c0_18, %c10, %c0_19] : memref<1x112x64xbf16, #tpu.memory_space<vmem>>, vector<1x80x64xbf16>
    %20 = vector.shape_cast %19 : vector<1x80x64xbf16> to vector<80x64xbf16>
    %c3 = arith.constant 3 : index
    %c0_20 = arith.constant 0 : index
    %c0_21 = arith.constant 0 : index
    %21 = vector.load %arg2[%c3, %c0_20, %c0_21] : memref<9x64x8xbf16, #tpu.memory_space<vmem>>, vector<1x64x8xbf16>
    %22 = vector.shape_cast %21 : vector<1x64x8xbf16> to vector<64x8xbf16>
    %cst_22 = arith.constant dense<0.000000e+00> : vector<80x8xf32>
    %23 = tpu.matmul %20, %22, %cst_22 {dimension_numbers = #tpu.dot_dimension_numbers<[1], [0], [0], [1], [0, 0, 1, 1], [], []>} : vector<80x64xbf16>, vector<64x8xbf16>, vector<80x8xf32> -> vector<80x8xf32>
    %24 = arith.addf %18, %23 : vector<80x8xf32>
    %c0_23 = arith.constant 0 : index
    %c11 = arith.constant 11 : index
    %c0_24 = arith.constant 0 : index
    %25 = vector.load %arg1[%c0_23, %c11, %c0_24] : memref<1x112x64xbf16, #tpu.memory_space<vmem>>, vector<1x80x64xbf16>
    %26 = vector.shape_cast %25 : vector<1x80x64xbf16> to vector<80x64xbf16>
    %c4 = arith.constant 4 : index
    %c0_25 = arith.constant 0 : index
    %c0_26 = arith.constant 0 : index
    %27 = vector.load %arg2[%c4, %c0_25, %c0_26] : memref<9x64x8xbf16, #tpu.memory_space<vmem>>, vector<1x64x8xbf16>
    %28 = vector.shape_cast %27 : vector<1x64x8xbf16> to vector<64x8xbf16>
    %cst_27 = arith.constant dense<0.000000e+00> : vector<80x8xf32>
    %29 = tpu.matmul %26, %28, %cst_27 {dimension_numbers = #tpu.dot_dimension_numbers<[1], [0], [0], [1], [0, 0, 1, 1], [], []>} : vector<80x64xbf16>, vector<64x8xbf16>, vector<80x8xf32> -> vector<80x8xf32>
    %30 = arith.addf %24, %29 : vector<80x8xf32>
    %c0_28 = arith.constant 0 : index
    %c12 = arith.constant 12 : index
    %c0_29 = arith.constant 0 : index
    %31 = vector.load %arg1[%c0_28, %c12, %c0_29] : memref<1x112x64xbf16, #tpu.memory_space<vmem>>, vector<1x80x64xbf16>
    %32 = vector.shape_cast %31 : vector<1x80x64xbf16> to vector<80x64xbf16>
    %c5 = arith.constant 5 : index
    %c0_30 = arith.constant 0 : index
    %c0_31 = arith.constant 0 : index
    %33 = vector.load %arg2[%c5, %c0_30, %c0_31] : memref<9x64x8xbf16, #tpu.memory_space<vmem>>, vector<1x64x8xbf16>
    %34 = vector.shape_cast %33 : vector<1x64x8xbf16> to vector<64x8xbf16>
    %cst_32 = arith.constant dense<0.000000e+00> : vector<80x8xf32>
    %35 = tpu.matmul %32, %34, %cst_32 {dimension_numbers = #tpu.dot_dimension_numbers<[1], [0], [0], [1], [0, 0, 1, 1], [], []>} : vector<80x64xbf16>, vector<64x8xbf16>, vector<80x8xf32> -> vector<80x8xf32>
    %36 = arith.addf %30, %35 : vector<80x8xf32>
    %c0_33 = arith.constant 0 : index
    %c20 = arith.constant 20 : index
    %c0_34 = arith.constant 0 : index
    %37 = vector.load %arg1[%c0_33, %c20, %c0_34] : memref<1x112x64xbf16, #tpu.memory_space<vmem>>, vector<1x80x64xbf16>
    %38 = vector.shape_cast %37 : vector<1x80x64xbf16> to vector<80x64xbf16>
    %c6 = arith.constant 6 : index
    %c0_35 = arith.constant 0 : index
    %c0_36 = arith.constant 0 : index
    %39 = vector.load %arg2[%c6, %c0_35, %c0_36] : memref<9x64x8xbf16, #tpu.memory_space<vmem>>, vector<1x64x8xbf16>
    %40 = vector.shape_cast %39 : vector<1x64x8xbf16> to vector<64x8xbf16>
    %cst_37 = arith.constant dense<0.000000e+00> : vector<80x8xf32>
    %41 = tpu.matmul %38, %40, %cst_37 {dimension_numbers = #tpu.dot_dimension_numbers<[1], [0], [0], [1], [0, 0, 1, 1], [], []>} : vector<80x64xbf16>, vector<64x8xbf16>, vector<80x8xf32> -> vector<80x8xf32>
    %42 = arith.addf %36, %41 : vector<80x8xf32>
    %c0_38 = arith.constant 0 : index
    %c21 = arith.constant 21 : index
    %c0_39 = arith.constant 0 : index
    %43 = vector.load %arg1[%c0_38, %c21, %c0_39] : memref<1x112x64xbf16, #tpu.memory_space<vmem>>, vector<1x80x64xbf16>
    %44 = vector.shape_cast %43 : vector<1x80x64xbf16> to vector<80x64xbf16>
    %c7 = arith.constant 7 : index
    %c0_40 = arith.constant 0 : index
    %c0_41 = arith.constant 0 : index
    %45 = vector.load %arg2[%c7, %c0_40, %c0_41] : memref<9x64x8xbf16, #tpu.memory_space<vmem>>, vector<1x64x8xbf16>
    %46 = vector.shape_cast %45 : vector<1x64x8xbf16> to vector<64x8xbf16>
    %cst_42 = arith.constant dense<0.000000e+00> : vector<80x8xf32>
    %47 = tpu.matmul %44, %46, %cst_42 {dimension_numbers = #tpu.dot_dimension_numbers<[1], [0], [0], [1], [0, 0, 1, 1], [], []>} : vector<80x64xbf16>, vector<64x8xbf16>, vector<80x8xf32> -> vector<80x8xf32>
    %48 = arith.addf %42, %47 : vector<80x8xf32>
    %c0_43 = arith.constant 0 : index
    %c22 = arith.constant 22 : index
    %c0_44 = arith.constant 0 : index
    %49 = vector.load %arg1[%c0_43, %c22, %c0_44] : memref<1x112x64xbf16, #tpu.memory_space<vmem>>, vector<1x80x64xbf16>
    %50 = vector.shape_cast %49 : vector<1x80x64xbf16> to vector<80x64xbf16>
    %c8 = arith.constant 8 : index
    %c0_45 = arith.constant 0 : index
    %c0_46 = arith.constant 0 : index
    %51 = vector.load %arg2[%c8, %c0_45, %c0_46] : memref<9x64x8xbf16, #tpu.memory_space<vmem>>, vector<1x64x8xbf16>
    %52 = vector.shape_cast %51 : vector<1x64x8xbf16> to vector<64x8xbf16>
    %cst_47 = arith.constant dense<0.000000e+00> : vector<80x8xf32>
    %53 = tpu.matmul %50, %52, %cst_47 {dimension_numbers = #tpu.dot_dimension_numbers<[1], [0], [0], [1], [0, 0, 1, 1], [], []>} : vector<80x64xbf16>, vector<64x8xbf16>, vector<80x8xf32> -> vector<80x8xf32>
    %54 = arith.addf %48, %53 : vector<80x8xf32>
    %c0_48 = arith.constant 0 : index
    %c0_49 = arith.constant 0 : index
    %55 = vector.load %arg3[%c0_48, %c0_49] : memref<1x8xf32, #tpu.memory_space<vmem>>, vector<1x8xf32>
    %56 = vector.broadcast %55 : vector<1x8xf32> to vector<80x8xf32>
    %57 = arith.addf %54, %56 : vector<80x8xf32>
    %c0_50 = arith.constant 0 : index
    %c0_51 = arith.constant 0 : index
    %c0_52 = arith.constant 0 : index
    %58 = vector.load %arg4[%c0_50, %c0_51, %c0_52] : memref<1x80x8xf32, #tpu.memory_space<vmem>>, vector<1x80x8xf32>
    %59 = vector.shape_cast %58 : vector<1x80x8xf32> to vector<80x8xf32>
    %60 = vector.shape_cast %57 : vector<80x8xf32> to vector<1x80x8xf32>
    tpu.vector_store %arg4[%c0_50, %c0_51, %c0_52], %60 {strides = array<i32>} : memref<1x80x8xf32, #tpu.memory_space<vmem>>, vector<1x80x8xf32>,
    return
  }
  func.func @transform_0(%arg0: i32) -> (i32, i32, i32) {
    %c0_i32 = arith.constant 0 : i32
    %c0_i32_0 = arith.constant 0 : i32
    %c0_i32_1 = arith.constant 0 : i32
    return %arg0, %c0_i32, %c0_i32_0 : i32, i32, i32
  }
  func.func @transform_1(%arg0: i32) -> (i32, i32, i32) {
    %c0_i32 = arith.constant 0 : i32
    %c0_i32_0 = arith.constant 0 : i32
    %c0_i32_1 = arith.constant 0 : i32
    %c0_i32_2 = arith.constant 0 : i32
    return %c0_i32, %c0_i32_0, %c0_i32_1 : i32, i32, i32
  }
  func.func @transform_2(%arg0: i32) -> (i32, i32) {
    %c0_i32 = arith.constant 0 : i32
    %c0_i32_0 = arith.constant 0 : i32
    %c0_i32_1 = arith.constant 0 : i32
    return %c0_i32, %c0_i32_0 : i32, i32
  }
  func.func @transform_3(%arg0: i32) -> (i32, i32, i32) {
    %c0_i32 = arith.constant 0 : i32
    %c0_i32_0 = arith.constant 0 : i32
    %c0_i32_1 = arith.constant 0 : i32
    return %arg0, %c0_i32, %c0_i32_0 : i32, i32, i32
  }
}

</mosaic_0001>

<bundles_post_ra>
// kernel: _lambda_.14
= control target key start
LH: loop header
LB: loop body
LE: loop exit
PB: predicated region body
PF: predicated region fallthrough
CT: control target
= control target key end

     0   :  { %s844_s18 = smov 0   ;;  %s997_s0 = inlined_call_operand.vmem [shape: bf16[2,64,150], index: 0, kind: input, shape index: {}]   ;;  %s998_s1 = inlined_call_operand.vmem [shape: bf16[1,150,64], index: 1, kind: input, shape index: {}]   ;;  %s999_s2 = inlined_call_operand.vmem [shape: f32[64,1], index: 2, kind: input, shape index: {}]   ;;  %s1000_s3 = inlined_call_operand.vmem [shape: bf16[2,64,64], index: 3, kind: output, shape index: {0}]   ;;  %s1001_s4 = inlined_call_operand.vmem [shape: f32[2,1,64], index: 4, kind: output, shape index: {1}]   ;;  %s1002_s5 = inlined_call_operand.vmem [shape: f32[2,1,64], index: 5, kind: output, shape index: {2}]  }
   0x1 LB: > { %s701_s19 = sadd.s32 4294967295, %s811_s18   ;;  %p705_p0 = scmp.ge.s32.totalorder %s811_s18, 1  ;;  %s811_s18 = sphi %s844_s18, %s16_s18  }
   0x2   : > { %p192_p1 = scmp.lt.s32.totalorder %s811_s18, 3 }
   0x4   : > { %p193_p2 = pnand %p705_p0, %p192_p1 }
   0x5   : > { %v783_v0 = vld [vmem:[%s998_s1] sm:$0xff] (!%p193_p2)   ;;  %v813_v1 = vmov (!%p193_p2), 0   ;;  %v784_v2 = vld [vmem:[%s998_s1 + $0x8] sm:$0xff] (!%p193_p2)   ;;  %p226_p3 = scmp.lt.s32.totalorder (!%p193_p2), %s701_s19, 1  ;;  %v785_v3 = vld [vmem:[%s998_s1 + $0x10] sm:$0xff] (!%p193_p2)   ;;  %vm363_vm0 = vcmask (!%p193_p2), 179200  }
   0x6   : > { %196 = sbr.rel (%p193_p2) target bundleno = 296 (0x128), region = 32  ;;  %380 = vmatprep.subr.bf16.mxu0 (!%p193_p2), %v813_v1  ;;  %752 = vmatprep.subr.bf16.mxu1 (!%p193_p2), %v813_v1  ;;  %v786_v4 = vld [vmem:[%s998_s1 + $0x18] sm:$0xff] (!%p193_p2)   ;;  %v787_v7 = vld [vmem:[%s998_s1 + $0x20] sm:$0xff] (!%p193_p2)   ;;  %v488_v9 = vld [vmem:[%s999_s2 + $0x10] sm:$0xff] (!%p193_p2)  ;;  %vm376_vm1 = vcmask (!%p193_p2), 1042432   ;;  %vm477_vm2 = vcmask (!%p193_p2), 519168  }
   0x7   : > { %381 = vmatpush1.bf16.msra.mxu0 (!%p193_p2), %v783_v0  ;;  %762 = vmatpush1.bf16.msra.mxu1 (!%p193_p2), %v783_v0  ;;  %v486_v8 = vld [vmem:[%s999_s2] sm:$0xff] (!%p193_p2)  ;;  %v487_v10 = vld [vmem:[%s999_s2 + $0x8] sm:$0xff] (!%p193_p2)  ;;  %v489_v12 = vld [vmem:[%s999_s2 + $0x18] sm:$0xff] (!%p193_p2)  ;;  %vm542_vm3 = vcmask (!%p193_p2), 523264   ;;  %vm564_vm4 = vcmask (!%p193_p2), 516096  }
   0x8   : > { %382 = vmatprep.subr.bf16.mxu0 (!%p193_p2), %v813_v1  ;;  %753 = vmatprep.subr.bf16.mxu1 (!%p193_p2), %v813_v1  ;;  %v788_v11 = vld [vmem:[%s998_s1 + $0x28] sm:$0xff] (!%p193_p2)   ;;  %v490_v13 = vld [vmem:[%s999_s2 + $0x20] sm:$0xff] (!%p193_p2)  ;;  %v789_v14 = vld [vmem:[%s998_s1 + $0x30] sm:$0xff] (!%p193_p2)  }
   0x9   : > { %781 = vset.pattern.permute.xlu0 (!%p193_p2), %v813_v1  ;;  %782 = vset.pattern.permute.xlu1 (!%p193_p2), %v813_v1  ;;  %v491_v15 = vld [vmem:[%s999_s2 + $0x28] sm:$0xff] (!%p193_p2)  ;;  %v492_v16 = vld [vmem:[%s999_s2 + $0x30] sm:$0xff] (!%p193_p2)  ;;  %v790_v17 = vld [vmem:[%s998_s1 + $0x38] sm:$0xff] (!%p193_p2)  }
   0xa   : > { %496 = vperm.xlu0 (!%p193_p2), %781, %v486_v8   ;;  %506 = vperm.xlu1 (!%p193_p2), %782, %v488_v9   ;;  %v493_v18 = vld [vmem:[%s999_s2 + $0x38] sm:$0xff] (!%p193_p2)  ;;  %v791_v19 = vld [vmem:[%s998_s1 + $0x40] sm:$0xff] (!%p193_p2)   ;;  %v792_v20 = vld [vmem:[%s998_s1 + $0x48] ss:$0 sps:$4 sm:$0x77] (!%p193_p2)  }
   0xb   : > { %383 = vmatpush1.bf16.msra.mxu0 (!%p193_p2), %v784_v2  ;;  %763 = vmatpush1.bf16.msra.mxu1 (!%p193_p2), %v784_v2  ;;  %v378_v21 = vsel (!%p193_p2), %vm376_vm1, %v792_v20, 0 }
   0xc   : > { %384 = vmatprep.subr.bf16.mxu0 (!%p193_p2), %v813_v1  ;;  %754 = vmatprep.subr.bf16.mxu1 (!%p193_p2), %v813_v1 }
   0xd   : > { %s1004_s19 = smov (!%p226_p3, %s701_s19), 1 }
   0xe   : > { %s742_s26 = sshll.u32 %s1004_s19, 6  ;;  %501 = vperm.xlu0 %781, %v487_v10   ;;  %511 = vperm.xlu1 %782, %v489_v12   ;;  %s743_s13 = sshll.u32 %s1004_s19, 5 }
   0xf   : > { %s875_s29 = scalar_lea.vmem %s997_s0, %s742_s26  ;;  %385 = vmatpush1.bf16.msra.mxu0 %v785_v3  ;;  %764 = vmatpush1.bf16.msra.mxu1 %v785_v3  ;;  %s952_s16 = scalar_lea.vmem %s1000_s3, %s743_s13 }
  0x10   : > { %v795_v5 = vld [vmem:[%s875_s29 + $0x4] ss:$8 sps:$4 sm:$0xff]   ;;  %386 = vmatprep.subr.bf16.mxu0 %v813_v1  ;;  %755 = vmatprep.subr.bf16.mxu1 %v813_v1  ;;  %v793_v22 = vld [vmem:[%s875_s29] ss:$8 sps:$4 sm:$0xff]   ;;  %v799_v24 = vld [vmem:[%s875_s29 + $0x14] ss:$8 sps:$4 sm:$0xff]   ;;  %s238_s20 = scalar_lea.vmem %s1001_s4, %s1004_s19  ;;  %s241_s23 = scalar_lea.vmem %s1002_s5, %s1004_s19 }
  0x11   : > { %728 = vmatprep.mubr.msk.bf16.mxu0 %vm363_vm0, %v795_v5  ;;  %v798_v6 = vld [vmem:[%s875_s29 + $0x24] ss:$8 sps:$4 sm:$0xff]   ;;  %v796_v23 = vld [vmem:[%s875_s29 + $0x20] ss:$8 sps:$4 sm:$0xff]   ;;  %v801_v25 = vld [vmem:[%s875_s29 + $0x34] ss:$8 sps:$4 sm:$0xff]  }
  0x12   : > { %730 = vmatprep.mubr.msk.bf16.mxu1 %vm363_vm0, %v798_v6  ;;  %516 = vperm.xlu0 %781, %v490_v13   ;;  %v803_v26 = vld [vmem:[%s875_s29 + $0x10] ss:$8 sps:$4 sm:$0xff]  }
  0x13   : > { %387 = vmatpush1.bf16.msra.mxu0 %v786_v4  ;;  %765 = vmatpush1.bf16.msra.mxu1 %v786_v4  ;;  %v804_v27 = vld [vmem:[%s875_s29 + $0x30] ss:$8 sps:$4 sm:$0xff]  }
  0x14   : > { %388 = vmatprep.subr.bf16.mxu0 %v813_v1  ;;  %756 = vmatprep.subr.bf16.mxu1 %v813_v1 }
  0x15   : > { %521 = vperm.xlu1 %782, %v491_v15  }
  0x16   : > { %526 = vperm.xlu0 %781, %v492_v16  }
  0x17   : > { %389 = vmatpush1.bf16.msra.mxu0 %v787_v7  ;;  %766 = vmatpush1.bf16.msra.mxu1 %v787_v7 }
  0x18   : > { %390 = vmatprep.subr.bf16.mxu0 %v813_v1  ;;  %757 = vmatprep.subr.bf16.mxu1 %v813_v1 }
  0x19   : > { %531 = vperm.xlu1 %782, %v493_v18  }
  0x1b   : > { %391 = vmatpush1.bf16.msra.mxu0 %v788_v11  ;;  %767 = vmatpush1.bf16.msra.mxu1 %v788_v11 }
  0x1c   : > { %392 = vmatprep.subr.bf16.mxu0 %v813_v1  ;;  %758 = vmatprep.subr.bf16.mxu1 %v813_v1 }
  0x1f   : > { %393 = vmatpush1.bf16.msra.mxu0 %v789_v14  ;;  %768 = vmatpush1.bf16.msra.mxu1 %v789_v14 }
  0x20   : > { %394 = vmatprep.subr.bf16.mxu0 %v813_v1  ;;  %759 = vmatprep.subr.bf16.mxu1 %v813_v1 }
  0x23   : > { %395 = vmatpush1.bf16.msra.mxu0 %v790_v17  ;;  %769 = vmatpush1.bf16.msra.mxu1 %v790_v17 }
  0x24   : > { %396 = vmatprep.subr.bf16.mxu0 %v813_v1  ;;  %760 = vmatprep.subr.bf16.mxu1 %v813_v1 }
  0x27   : > { %397 = vmatpush1.bf16.msra.mxu0 %v791_v19  ;;  %770 = vmatpush1.bf16.msra.mxu1 %v791_v19 }
  0x28   : > { %398 = vmatprep.subr.bf16.mxu0 %v813_v1  ;;  %761 = vmatprep.subr.bf16.mxu1 %v813_v1 }
  0x2b   : > { %399 = vmatpush1.bf16.msra.mxu0 %v378_v21  ;;  %771 = vmatpush1.bf16.msra.mxu1 %v378_v21 }
  0x2e   : > { %413 = vmatmul.mubr.bf16.vlgmr.msra.gmra.mrb[0].mxu0 %v793_v22  ;;  %429 = vmatmul.mubr.bf16.vlgmr.msra.gmra.mrb[0].mxu1 %v796_v23 }
  0x2f   : > { %729 = vmatprep.mubr.msk.bf16.mxu0 %vm363_vm0, %v799_v24  ;;  %731 = vmatprep.mubr.msk.bf16.mxu1 %vm363_vm0, %v801_v25 }
  0x36   : > { %421 = vmatmul.mubr.bf16.gmra.mrb[4].mxu0 %v803_v26  ;;  %437 = vmatmul.mubr.bf16.gmra.mrb[4].mxu1 %v804_v27 }
  0x89   : > { %v497_v28 = vpop.permute.xlu0 %496  ;;  %v507_v29 = vpop.permute.xlu1 %506 }
  0x8d   : > { %v502_v30 = vpop.permute.xlu0 %501  ;;  %v512_v31 = vpop.permute.xlu1 %511 }
  0x91   : > { %v517_v51 = vpop.permute.xlu0 %516 }
  0x94   : > { %v522_v53 = vpop.permute.xlu1 %521 }
  0x95   : > { %v527_v11 = vpop.permute.xlu0 %526 }
  0x98   : > { %v532_v18 = vpop.permute.xlu1 %531 }
 0x101   : > { %v414_v32 = vpop.f32.mrb[0].mxu0  ;;  %v430_v33 = vpop.f32.mrb[0].mxu1 }
 0x102   : > { %v744_v34 = vpack.c.bf16 %v414_v32, %v414_v32  ;;  %v534_v35 = vmul.f32 %v497_v28, %v414_v32  ;;  %v416_v36 = vpop.f32.mrb[1].mxu0  ;;  %v748_v37 = vpack.c.bf16 %v430_v33, %v430_v33  ;;  %v432_v38 = vpop.f32.mrb[1].mxu1  ;;  %v538_v58 = vmul.f32 %v517_v51, %v430_v33 }
 0x103   : > { %v417_v39 = vpop.f32.mrb[2].mxu0  ;;  %v433_v40 = vpop.f32.mrb[2].mxu1 }
 0x104   : > { %478 = vst.msk [vmem:[%s952_s16] sm:$0xf] %vm477_vm2, %v744_v34  ;;  %v566_v41 = vmul.f32 %v534_v35, %v414_v32  ;;  %v745_v42 = vpack.c.bf16 %v417_v39, %v417_v39  ;;  %v535_v43 = vmul.f32 %v502_v30, %v417_v39  ;;  %482 = vst.msk [vmem:[%s952_s16 + $0x10] sm:$0xf] %vm477_vm2, %v748_v37  ;;  %v419_v44 = vpop.f32.mrb[3].mxu0  ;;  %v435_v45 = vpop.f32.mrb[3].mxu1 }
 0x105   : > { %v749_v46 = vpack.c.bf16 %v433_v40, %v433_v40  ;;  %v543_v47 = vsel %vm542_vm3, %v534_v35, 0.0  ;;  %v539_v2 = vmul.f32 %v522_v53, %v433_v40  ;;  %v570_v12 = vmul.f32 %v538_v58, %v430_v33 }
 0x106   : > { %479 = vst.msk [vmem:[%s952_s16 + $0x4] sm:$0xf] %vm477_vm2, %v745_v42  ;;  %v544_v48 = vsel %vm542_vm3, %v535_v43, 0.0  ;;  %v567_v49 = vmul.f32 %v535_v43, %v417_v39  ;;  %v574_v52 = vsel %vm542_vm3, %v566_v41, 0.0  ;;  %v550_v20 = vsel %vm542_vm3, %v538_v58, 0.0 }
 0x107   : > { %v545_v50 = vadd.f32 %v544_v48, %v543_v47  ;;  %483 = vst.msk [vmem:[%s952_s16 + $0x14] sm:$0xf] %vm477_vm2, %v749_v46  ;;  %v571_v21 = vmul.f32 %v539_v2, %v433_v40  ;;  %v581_v26 = vsel %vm542_vm3, %v570_v12, 0.0  ;;  %v552_v27 = vsel %vm542_vm3, %v539_v2, 0.0 }
 0x108   : > { %v575_v54 = vsel %vm542_vm3, %v567_v49, 0.0 }
 0x109   : > { %v576_v55 = vadd.f32 %v575_v54, %v574_v52  ;;  %v422_v56 = vpop.f32.mrb[4].mxu0  ;;  %v438_v57 = vpop.f32.mrb[4].mxu1 }
 0x10a   : > { %v746_v59 = vpack.c.bf16 %v422_v56, %v422_v56  ;;  %v536_v60 = vmul.f32 %v507_v29, %v422_v56  ;;  %v750_v61 = vpack.c.bf16 %v438_v57, %v438_v57  ;;  %v424_v62 = vpop.f32.mrb[5].mxu0  ;;  %v440_v63 = vpop.f32.mrb[5].mxu1  ;;  %v540_v15 = vmul.f32 %v527_v11, %v438_v57 }
 0x10b   : > { %v425_v0 = vpop.f32.mrb[6].mxu0  ;;  %v441_v1 = vpop.f32.mrb[6].mxu1 }
 0x10c   : > { %480 = vst.msk [vmem:[%s952_s16 + $0x8] sm:$0xf] %vm477_vm2, %v746_v59  ;;  %v546_v3 = vsel %vm542_vm3, %v536_v60, 0.0  ;;  %v568_v4 = vmul.f32 %v536_v60, %v422_v56  ;;  %484 = vst.msk [vmem:[%s952_s16 + $0x18] sm:$0xf] %vm477_vm2, %v750_v61  ;;  %v427_v5 = vpop.f32.mrb[7].mxu0  ;;  %v747_v8 = vpack.c.bf16 %v425_v0, %v425_v0  ;;  %v537_v9 = vmul.f32 %v512_v31, %v425_v0 }
 0x10d   : > { %v443_v6 = vpop.f32.mrb[7].mxu1  ;;  %v547_v7 = vadd.f32 %v546_v3, %v545_v50  ;;  %v751_v10 = vpack.c.bf16 %v441_v1, %v441_v1  ;;  %v541_v23 = vmul.f32 %v532_v18, %v441_v1  ;;  %v572_v28 = vmul.f32 %v540_v15, %v438_v57 }
 0x10e   : > { %v577_v13 = vsel %vm542_vm3, %v568_v4, 0.0  ;;  %481 = vst.msk [vmem:[%s952_s16 + $0xc] sm:$0xf] %vm477_vm2, %v747_v8  ;;  %v548_v16 = vsel %vm542_vm3, %v537_v9, 0.0  ;;  %v569_v17 = vmul.f32 %v537_v9, %v425_v0  ;;  %v583_v31 = vsel %vm542_vm3, %v571_v21, 0.0 }
 0x10f   : > { %v578_v14 = vadd.f32 %v577_v13, %v576_v55  ;;  %485 = vst.msk [vmem:[%s952_s16 + $0x1c] sm:$0xf] %vm477_vm2, %v751_v10  ;;  %v549_v19 = vadd.f32 %v548_v16, %v547_v7  ;;  %v554_v32 = vsel %vm542_vm3, %v540_v15, 0.0  ;;  %v573_v33 = vmul.f32 %v541_v23, %v441_v1 }
 0x110   : > { %v579_v22 = vsel %vm542_vm3, %v569_v17, 0.0  ;;  %v585_v36 = vsel %vm542_vm3, %v572_v28, 0.0  ;;  %v556_v37 = vsel %vm542_vm3, %v541_v23, 0.0 }
 0x111   : > { %v551_v24 = vadd.f32 %v550_v20, %v549_v19  ;;  %v580_v25 = vadd.f32 %v579_v22, %v578_v14  ;;  %v587_v40 = vsel %vm542_vm3, %v573_v33, 0.0 }
 0x113   : > { %v582_v29 = vadd.f32 %v581_v26, %v580_v25  ;;  %v553_v30 = vadd.f32 %v552_v27, %v551_v24 }
 0x115   : > { %v555_v34 = vadd.f32 %v554_v32, %v553_v30  ;;  %v584_v35 = vadd.f32 %v583_v31, %v582_v29 }
 0x117   : > { %v557_v38 = vadd.f32 %v556_v37, %v555_v34  ;;  %v586_v39 = vadd.f32 %v585_v36, %v584_v35 }
 0x119   : > { %v558_v41 = vrot.slane %v557_v38, 4  ;;  %v588_v42 = vadd.f32 %v587_v40, %v586_v39 }
 0x11b   : > { %v559_v43 = vadd.f32 %v558_v41, %v557_v38  ;;  %v589_v44 = vrot.slane %v588_v42, 4 }
 0x11d   : > { %v560_v45 = vrot.slane %v559_v43, 2  ;;  %v590_v46 = vadd.f32 %v589_v44, %v588_v42 }
 0x11f   : > { %v561_v47 = vadd.f32 %v560_v45, %v559_v43  ;;  %v591_v48 = vrot.slane %v590_v46, 2 }
 0x121   : > { %v562_v49 = vrot.slane %v561_v47, 1  ;;  %v592_v50 = vadd.f32 %v591_v48, %v590_v46 }
 0x123   : > { %v563_v51 = vadd.f32 %v562_v49, %v561_v47  ;;  %v593_v52 = vrot.slane %v592_v50, 1 }
 0x125   : > { %565 = vst.msk [vmem:[%s238_s20] sm:$0x1] %vm564_vm4, %v563_v51  ;;  %v594_v53 = vadd.f32 %v593_v52, %v592_v50 }
 0x127   : > { %595 = vst.msk [vmem:[%s241_s23] sm:$0x1] %vm564_vm4, %v594_v53 }
 0x128 PF: > { %s16_s18 = sadd.s32 1, %s811_s18  }
 0x129   : > { %p13_p4 = scmp.ge.s32.totalorder %s16_s18, 4  }
 0x12b   :  { %15 = sbr.rel (!%p13_p4) target bundleno = 1 (0x1), region = 86 }

// kernel: _lambda_.16
= control target key start
LH: loop header
LB: loop body
LE: loop exit
PB: predicated region body
PF: predicated region fallthrough
CT: control target
= control target key end

     0   :  { %s2837_s18 = smov 0   ;;  %s3478_s0 = inlined_call_operand.vmem [shape: bf16[2,112,64], index: 0, kind: input, shape index: {}]   ;;  %s3479_s1 = inlined_call_operand.vmem [shape: bf16[9,64,64], index: 1, kind: input, shape index: {}]   ;;  %s3480_s2 = inlined_call_operand.vmem [shape: f32[80,1], index: 2, kind: input, shape index: {}]   ;;  %s3481_s3 = inlined_call_operand.vmem [shape: bf16[2,80,64], index: 3, kind: output, shape index: {0}]   ;;  %s3482_s4 = inlined_call_operand.vmem [shape: f32[2,1,64], index: 4, kind: output, shape index: {1}]   ;;  %s3483_s5 = inlined_call_operand.vmem [shape: f32[2,1,64], index: 5, kind: output, shape index: {2}]  }
   0x1 LB: > { %s2034_s19 = sadd.s32 4294967295, %s2802_s18   ;;  %p2038_p0 = scmp.ge.s32.totalorder %s2802_s18, 1  ;;  %s2802_s18 = sphi %s2837_s18, %s16_s18  }
   0x2   : > { %p192_p1 = scmp.lt.s32.totalorder %s2802_s18, 3 }
   0x4   : > { %p193_p2 = pnand %p2038_p0, %p192_p1 }
   0x5   : > { %v2737_v0 = vld [vmem:[%s3479_s1 + $0x20] sm:$0xff] (!%p193_p2)   ;;  %v2804_v1 = vmov (!%p193_p2), 0.0   ;;  %v2739_v3 = vld [vmem:[%s3479_s1 + $0x28] sm:$0xff] (!%p193_p2)   ;;  %vm2805_vm0 = vmmov (!%p193_p2), 0   ;;  %p226_p3 = scmp.lt.s32.totalorder (!%p193_p2), %s2034_s19, 1  ;;  %v2741_v5 = vld [vmem:[%s3479_s1 + $0x30] sm:$0xff] (!%p193_p2)  }
   0x6   : > { %196 = sbr.rel (%p193_p2) target bundleno = 439 (0x1b7), region = 32  ;;  %2312 = vmatprep.subr.bf16.mxu1 (!%p193_p2), %v2804_v1  ;;  %2424 = vmatprep.subr.bf16.mxu0 (!%p193_p2), %v2804_v1  ;;  %v2853_v2 = vld [vmem:[%s3479_s1 + $0x80] sm:$0xff] (!%p193_p2)   ;;  %v2865_v4 = vld [vmem:[%s3479_s1 + $0x88] sm:$0xff] (!%p193_p2)   ;;  %v2881_v6 = vld [vmem:[%s3479_s1 + $0x90] sm:$0xff] (!%p193_p2)   ;;  %vm299_vm1 = vsmask.f32 (!%p193_p2), 7424 }
   0x7   : > { %2313 = vmatpush3.bf16.msra.mxu1 (!%p193_p2), %v2737_v0  ;;  %2320 = vmatprep.mubr.msk.bf16.mxu1 (!%p193_p2), %vm2805_vm0, %v2804_v1  ;;  %v2743_v7 = vld [vmem:[%s3479_s1 + $0x38] sm:$0xff] (!%p193_p2)   ;;  %vm905_vm2 = vsmask.f32 (!%p193_p2), 6400  ;;  %vm368_vm3 = vcmask (!%p193_p2), 523264   ;;  %v2749_v25 = vld [vmem:[%s3479_s1] sm:$0xff] (!%p193_p2)   ;;  %v2755_v43 = vld [vmem:[%s3479_s1 + $0x8] sm:$0xff] (!%p193_p2)  }
   0x8   : > { %2425 = vmatpush3.bf16.msra.mxu0 (!%p193_p2), %v2853_v2  ;;  %2314 = vmatprep.subr.bf16.mxu1 (!%p193_p2), %v2804_v1  ;;  %v2895_v8 = vld [vmem:[%s3479_s1 + $0x98] sm:$0xff] (!%p193_p2)   ;;  %v2750_v38 = vld [vmem:[%s3479_s1 + $0xa0] sm:$0xff] (!%p193_p2)   ;;  %v2751_v45 = vld [vmem:[%s3479_s1 + $0xa8] sm:$0xff] (!%p193_p2)   ;;  %vm1094_vm4 = vcmask (!%p193_p2), 1045504   ;;  %vm577_vm5 = vcmask (!%p193_p2), 1046528   ;;  %vm1611_vm6 = vcmask (!%p193_p2), 1044480  }
   0x9   : > { %2426 = vmatprep.subr.bf16.mxu0 (!%p193_p2), %v2804_v1  ;;  %2432 = vmatprep.mubr.msk.bf16.mxu0 (!%p193_p2), %vm2805_vm0, %v2804_v1  ;;  %v2759_v55 = vld [vmem:[%s3479_s1 + $0x10] sm:$0xff] (!%p193_p2)   ;;  %v2762_v62 = vld [vmem:[%s3479_s1 + $0x18] sm:$0xff] (!%p193_p2)   ;;  %vm1422_vm7 = vsmask.f32 (!%p193_p2), 5376  ;;  %vm1785_vm8 = vcmask (!%p193_p2), 519168   ;;  %vm1891_vm9 = vcmask (!%p193_p2), 516096  }
   0xa   : > { %v2754_v57 = vld [vmem:[%s3479_s1 + $0xb0] sm:$0xff] (!%p193_p2)   ;;  %v2756_v63 = vld [vmem:[%s3479_s1 + $0xb8] sm:$0xff] (!%p193_p2)  }
   0xb   : > { %2315 = vmatpush3.bf16.msra.mxu1 (!%p193_p2), %v2739_v3 }
   0xc   : > { %2427 = vmatpush3.bf16.msra.mxu0 (!%p193_p2), %v2865_v4  ;;  %2316 = vmatprep.subr.bf16.mxu1 (!%p193_p2), %v2804_v1 }
   0xd   : > { %s3485_s19 = smov (!%p226_p3, %s2034_s19), 1  ;;  %2428 = vmatprep.subr.bf16.mxu0 %v2804_v1 }
   0xe   : > { %s2722_s30 = smul.u32 56, %s3485_s19  ;;  %s241_s8 = scalar_lea.vmem %s3483_s5, %s3485_s19 }
   0xf   : > { %2317 = vmatpush3.bf16.msra.mxu1 %v2741_v5 }
  0x10   : > { %s2890_s12 = scalar_lea.vmem %s3478_s0, %s2722_s30  ;;  %2429 = vmatpush3.bf16.msra.mxu0 %v2881_v6  ;;  %2318 = vmatprep.subr.bf16.mxu1 %v2804_v1  ;;  %s238_s30 = scalar_lea.vmem %s3482_s4, %s3485_s19 }
  0x11   : > { %v243_v9 = vld [vmem:[%s2890_s12] sm:$0xf]  ;;  %v2899_v10 = vld [vmem:[%s2890_s12 + $0x4] sm:$0xf]  ;;  %v2905_v12 = vld [vmem:[%s2890_s12 + $0x8] sm:$0xff]   ;;  %2430 = vmatprep.subr.bf16.mxu0 %v2804_v1 }
  0x12   : > { %v2902_v11 = vcombine.low %v243_v9, %v2899_v10  ;;  %v711_v13 = vld [vmem:[%s2890_s12 + $0x4] sm:$0xe]  ;;  %v2911_v14 = vld [vmem:[%s2890_s12 + $0x8] sm:$0xf]  ;;  %v308_v17 = vshll.u32 %v2905_v12, 16  ;;  %v2921_v19 = vld [vmem:[%s2890_s12 + $0xc] sm:$0xff]  }
  0x13   : > { %v2918_v18 = vcombine.low %v711_v13, %v2911_v14  ;;  %v312_v20 = vshrl.u32 %v2905_v12, 16  ;;  %2319 = vmatpush3.bf16.msra.mxu1 %v2743_v7  ;;  %v915_v26 = vshrl.u32 %v2921_v19, 16  ;;  %v918_v27 = vshll.u32 %v2921_v19, 16  ;;  %v2935_v33 = vld [vmem:[%s2890_s12 + $0x10] sm:$0xff]   ;;  %v2960_v49 = vld [vmem:[%s2890_s12 + $0x18] sm:$0xff]   ;;  %v2986_v61 = vld [vmem:[%s2890_s12 + $0x20] sm:$0xff]  }
  0x14   : > { %v301_v15 = vshrl.u32 %v2902_v11, 16  ;;  %v303_v16 = vshll.u32 %v2902_v11, 16  ;;  %v310_v22 = vrot.slane %v308_v17, 1  ;;  %2431 = vmatpush3.bf16.msra.mxu0 %v2895_v8  ;;  %2340 = vmatprep.subr.bf16.mxu1 %v2804_v1  ;;  %v2938_v34 = vld [vmem:[%s2890_s12 + $0x14] sm:$0xff]   ;;  %v316_v39 = vshll.u32 %v2935_v33, 16  ;;  %v2761_v13 = vld [vmem:[%s3479_s1 + $0xc0] sm:$0xff]  }
  0x15   : > { %v907_v23 = vshrl.u32 %v2918_v18, 16  ;;  %v910_v24 = vshll.u32 %v2918_v18, 16  ;;  %2452 = vmatprep.subr.bf16.mxu0 %v2804_v1  ;;  %v917_v31 = vrot.slane %v915_v26, 1  ;;  %v920_v32 = vrot.slane %v918_v27, 2  ;;  %v1081_v51 = vld [vmem:[%s2890_s12 + $0x4] sm:$0xc] }
  0x16   : > { %v305_v21 = vrot.slane %v303_v16, 1  ;;  %v924_v40 = vshrl.u32 %v2938_v34, 16  ;;  %v927_v41 = vshll.u32 %v2938_v34, 16  ;;  %v314_v42 = vor.u32 %v312_v20, %v310_v22  ;;  %v2763_v17 = vld [vmem:[%s2890_s12 + $0x28] ss:$0 sps:$4 sm:$0x11]  }
  0x17   : > { %v909_v29 = vrot.slane %v907_v23, 1  ;;  %v912_v30 = vrot.slane %v910_v24, 2  ;;  %v921_v37 = vor.u32 %v920_v32, %v917_v31  ;;  %v318_v46 = vrot.slane %v316_v39, 1  ;;  %v2765_v24 = vld [vmem:[%s3479_s1 + $0xc8] sm:$0xff]  }
  0x18   : > { %v306_v28 = vor.u32 %v305_v21, %v301_v15  ;;  %v926_v47 = vrot.slane %v924_v40, 1  ;;  %v929_v48 = vrot.slane %v927_v41, 2  ;;  %v320_v53 = vshrl.u32 %v2935_v33, 16  ;;  %v3049_v40 = vld [vmem:[%s2890_s12 + $0x28] sm:$0xff]  }
  0x19   : > { %v913_v36 = vor.u32 %v912_v30, %v909_v29  ;;  %v319_v52 = vsel %vm299_vm1, %v314_v42, %v318_v46  ;;  %v324_v54 = vshll.u32 %v2960_v49, 16  ;;  %v2140_v58 = vcombine.low %v1081_v51, %v2911_v14  ;;  %v3030_v29 = vld [vmem:[%s2890_s12 + $0x1c] sm:$0xff]   ;;  %v2768_v30 = vld [vmem:[%s3479_s1 + $0xd0] sm:$0xff]  }
  0x1a   : > { %v311_v35 = vsel %vm299_vm1, %v306_v28, %v310_v22  ;;  %v2964_v50 = vor.u32 %v929_v48, %v926_v47  ;;  %v322_v59 = vor.u32 %v320_v53, %v318_v46  ;;  %v1096_v3 = vrot.slane %v2921_v19, 2  ;;  %v2771_v42 = vld [vmem:[%s3479_s1 + $0xd8] sm:$0xff]   ;;  %v2784_v46 = vld [vmem:[%s2890_s12 + $0x30] ss:$0 sps:$4 sm:$0x33]   ;;  %v3074_v53 = vld [vmem:[%s2890_s12 + $0x24] sm:$0xff]  }
  0x1b   : > { %2321 = vmatmul.mubr.msk.bf16.vlgmr.msra.gmra.mrb[0].mxu1 %vm368_vm3, %v311_v35  ;;  %v922_v44 = vsel %vm905_vm2, %v913_v36, %v921_v37  ;;  %v326_v60 = vrot.slane %v324_v54, 1  ;;  %v1095_v0 = vrot.slane %v2140_v58, 2  ;;  %v328_v7 = vshrl.u32 %v2960_v49, 16  ;;  %v3041_v35 = vld [vmem:[%s2890_s12 + $0x20] sm:$0xff]  }
  0x1c   : > { %2341 = vmatpush3.bf16.msra.mxu1 %v2749_v25  ;;  %2324 = vmatprep.mubr.msk.bf16.mxu1 %vm2805_vm0, %v2804_v1  ;;  %v931_v56 = vsel %vm905_vm2, %v921_v37, %v2964_v50  ;;  %v332_v9 = vshll.u32 %v2986_v61, 16  ;;  %v1098_v20 = vrot.slane %v2938_v34, 2  ;;  %v579_v21 = vrot.slane %v2905_v12, 1 }
  0x1d   : > { %2342 = vmatprep.subr.bf16.mxu1 %v2804_v1  ;;  %2433 = vmatmul.mubr.msk.bf16.vlgmr.msra.gmra.mrb[0].mxu0 %vm368_vm3, %v922_v44  ;;  %v327_v5 = vsel %vm299_vm1, %v322_v59, %v326_v60  ;;  %v1097_v14 = vsel %vm1094_vm4, %v1095_v0, %v1096_v3  ;;  %v330_v15 = vor.u32 %v328_v7, %v326_v60  ;;  %v581_v22 = vrot.slane %v2935_v33, 1  ;;  %v2767_v59 = vld [vmem:[%s3479_s1 + $0x40] sm:$0xff]   ;;  %v3106_v7 = vld [vmem:[%s2890_s12 + $0x2c] ss:$0 sps:$4 sm:$0x33]  }
  0x1e   : > { %2453 = vmatpush3.bf16.msra.mxu0 %v2750_v38  ;;  %2436 = vmatprep.mubr.msk.bf16.mxu0 %vm2805_vm0, %v2804_v1  ;;  %v334_v16 = vrot.slane %v332_v9, 1  ;;  %v336_v23 = vshrl.u32 %v2986_v61, 16  ;;  %v340_v26 = vshll.u32 %v2763_v17, 16  ;;  %v583_v28 = vrot.slane %v2960_v49, 1  ;;  %v564_v38 = vld [vmem:[%s2890_s12] sm:$0xe] }
  0x1f   : > { %2454 = vmatprep.subr.bf16.mxu0 %v2804_v1  ;;  %v3026_v27 = vsel %vm577_vm5, %v579_v21, %v581_v22  ;;  %v1099_v32 = vsel %vm1094_vm4, %v1096_v3, %v1098_v20  ;;  %v2081_v39 = vcombine.low %v564_v38, %v2899_v10  ;;  %v1100_v41 = vrot.slane %v3030_v29, 2  ;;  %v3115_v9 = vld [vmem:[%s2890_s12 + $0x10] sm:$0xff]  }
  0x20   : > { %2343 = vmatpush3.bf16.msra.mxu1 %v2755_v43  ;;  %v335_v25 = vsel %vm299_vm1, %v330_v15, %v334_v16  ;;  %v3036_v31 = vsel %vm577_vm5, %v581_v22, %v583_v28  ;;  %v338_v36 = vor.u32 %v336_v23, %v334_v16  ;;  %v342_v37 = vrot.slane %v340_v26, 1  ;;  %v3125_v15 = vld [vmem:[%s2890_s12 + $0x18] sm:$0xff]   ;;  %v2795_v22 = vld [vmem:[%s2890_s12 + $0x2c] ss:$0 sps:$4 sm:$0x11]   ;;  %v2774_v26 = vld [vmem:[%s3479_s1 + $0x50] sm:$0xff]  }
  0x21   : > { %2344 = vmatprep.subr.bf16.mxu1 %v2804_v1  ;;  %v1281_v43 = vrot.slane %v3041_v35, 2  ;;  %v578_v44 = vrot.slane %v2081_v39, 1  ;;  %v1283_v10 = vrot.slane %v3049_v40, 2  ;;  %v1285_v51 = vrot.slane %v2784_v46, 2 }
  0x22   : > { %2455 = vmatpush3.bf16.msra.mxu0 %v2751_v45  ;;  %v343_v45 = vsel %vm299_vm1, %v338_v36, %v342_v37  ;;  %v1102_v58 = vrot.slane %v3074_v53, 2  ;;  %v762_v3 = vrot.slane %v2938_v34, 1  ;;  %v1104_v23 = vrot.slane %v3106_v7, 2 }
  0x23   : > { %2325 = vmatmul.mubr.msk.bf16.gmra.mrb[4].mxu1 %vm368_vm3, %v319_v52  ;;  %2456 = vmatprep.subr.bf16.mxu0 %v2804_v1  ;;  %v3064_v47 = vsel %vm577_vm5, %v578_v44, %v579_v21  ;;  %v3069_v48 = vsel %vm1094_vm4, %v1281_v43, %v1283_v10  ;;  %v1101_v52 = vsel %vm1094_vm4, %v1098_v20, %v1100_v41  ;;  %v1613_v20 = vrot.slane %v3115_v9, 3 }
  0x24   : > { %2328 = vmatprep.mubr.msk.bf16.mxu1 %vm2805_vm0, %v2804_v1  ;;  %2345 = vmatpush3.bf16.msra.mxu1 %v2759_v55  ;;  %v3080_v54 = vsel %vm1094_vm4, %v1283_v10, %v1285_v51  ;;  %v585_v55 = vrot.slane %v2986_v61, 1  ;;  %v766_v21 = vrot.slane %v3074_v53, 1  ;;  %v933_v39 = vshrl.u32 %v3030_v29, 16 }
  0x25   : > { %2437 = vmatmul.mubr.msk.bf16.gmra.mrb[4].mxu0 %vm368_vm3, %v931_v56  ;;  %2346 = vmatprep.subr.bf16.mxu1 %v2804_v1  ;;  %v936_v10 = vshll.u32 %v3030_v29, 16  ;;  %v1105_v46 = vsel %vm1094_vm4, %v1102_v58, %v1104_v23 }
  0x26   : > { %2457 = vmatpush3.bf16.msra.mxu0 %v2754_v57  ;;  %2460 = vmatprep.mubr.msk.bf16.mxu0 %vm2805_vm0, %v2804_v1  ;;  %v3085_v56 = vsel %vm577_vm5, %v583_v28, %v585_v55  ;;  %v587_v57 = vrot.slane %v2763_v17, 1  ;;  %v935_v51 = vrot.slane %v933_v39, 1  ;;  %v1279_v39 = vrot.slane %v3125_v15, 2 }
  0x27   : > { %2458 = vmatprep.subr.bf16.mxu0 %v2804_v1 }
  0x28   : > { %2347 = vmatpush3.bf16.msra.mxu1 %v2762_v62  ;;  %v3094_v60 = vsel %vm577_vm5, %v585_v55, %v587_v57  ;;  %v759_v62 = vrot.slane %v2918_v18, 1  ;;  %v2770_v18 = vld [vmem:[%s3479_s1 + $0x48] sm:$0xff]   ;;  %v945_v55 = vshll.u32 %v3074_v53, 16  ;;  %v938_v57 = vrot.slane %v936_v10, 2 }
  0x29   : > { %2368 = vmatprep.subr.bf16.mxu1 %v2804_v1  ;;  %v2779_v10 = vld [vmem:[%s3479_s1 + $0xe8] sm:$0xff]  }
  0x2a   : > { %2459 = vmatpush3.bf16.msra.mxu0 %v2756_v63  ;;  %v760_v63 = vrot.slane %v2921_v19, 1  ;;  %v1229_v19 = vld [vmem:[%s2890_s12 + $0xc] sm:$0xf] }
  0x2b   : > { %2329 = vmatmul.mubr.msk.bf16.gmra.mrb[8].mxu1 %vm368_vm3, %v327_v5  ;;  %2480 = vmatprep.subr.bf16.mxu0 %v2804_v1  ;;  %v1103_v5 = vsel %vm1094_vm4, %v1100_v41, %v1102_v58  ;;  %v3156_v41 = vld [vmem:[%s2890_s12 + $0x30] ss:$0 sps:$4 sm:$0x77]   ;;  %v951_v58 = vshrl.u32 %v3106_v7, 16 }
  0x2c   : > { %2332 = vmatprep.mubr.msk.bf16.mxu1 %vm2805_vm0, %v2804_v1  ;;  %v3099_v0 = vsel %vm577_vm5, %v759_v62, %v760_v63  ;;  %v3118_v34 = vsel %vm577_vm5, %v760_v63, %v762_v3  ;;  %v947_v63 = vrot.slane %v945_v55, 2  ;;  %v1805_v55 = vld [vmem:[%s3480_s2 + $0x48] sm:$0xff] }
  0x2d   : > { %2461 = vmatmul.mubr.msk.bf16.vlgmr.msra.gmra.mrb[0].mxu0 %vm368_vm3, %v1097_v14  ;;  %v1228_v14 = vld [vmem:[%s2890_s12 + $0x8] sm:$0xc] }
  0x2e   : > { %2464 = vmatprep.mubr.msk.bf16.mxu0 %vm2805_vm0, %v2804_v1  ;;  %2481 = vmatpush3.bf16.msra.mxu0 %v2761_v13  ;;  %v1598_v13 = vld [vmem:[%s2890_s12 + $0x8] sm:$0x8]  ;;  %v3145_v36 = vcombine.low %v1228_v14, %v1229_v19  ;;  %s2723_s12 = smul.u32 40, %s3485_s19 }
  0x2f   : > { %2482 = vmatprep.subr.bf16.mxu0 %v2804_v1  ;;  %v2199_v16 = vcombine.low %v1598_v13, %v1229_v19  ;;  %v953_v19 = vrot.slane %v951_v58, 1  ;;  %v1798_v13 = vld [vmem:[%s3480_s2 + $0x10] sm:$0xff]  ;;  %v1432_v58 = vshrl.u32 %v3115_v9, 16 }
  0x30   : > { %v1276_v14 = vrot.slane %v3145_v36, 2  ;;  %s3425_s27 = scalar_lea.vmem %s3481_s3, %s2723_s12 }
  0x32   : > { %2483 = vmatpush3.bf16.msra.mxu0 %v2765_v24  ;;  %v1612_v24 = vrot.slane %v2199_v16, 3 }
  0x33   : > { %2333 = vmatmul.mubr.msk.bf16.gmra.mrb[12].mxu1 %vm368_vm3, %v335_v25  ;;  %2484 = vmatprep.subr.bf16.mxu0 %v2804_v1  ;;  %v1615_v25 = vrot.slane %v3125_v15, 3 }
  0x34   : > { %2336 = vmatprep.mubr.msk.bf16.mxu1 %vm2805_vm0, %v2804_v1  ;;  %v3149_v37 = vsel %vm1611_vm6, %v1612_v24, %v1613_v20 }
  0x35   : > { %2465 = vmatmul.mubr.msk.bf16.gmra.mrb[4].mxu0 %vm368_vm3, %v1099_v32  ;;  %v1617_v32 = vrot.slane %v3041_v35, 3  ;;  %v3152_v38 = vsel %vm1611_vm6, %v1613_v20, %v1615_v25 }
  0x36   : > { %2468 = vmatprep.mubr.msk.bf16.mxu0 %vm2805_vm0, %v2804_v1  ;;  %2485 = vmatpush3.bf16.msra.mxu0 %v2768_v30  ;;  %v768_v30 = vrot.slane %v2795_v22, 1  ;;  %v1797_v22 = vld [vmem:[%s3480_s2 + $0x8] sm:$0xff] }
  0x37   : > { %2486 = vmatprep.subr.bf16.mxu0 %v2804_v1  ;;  %v3162_v44 = vsel %vm1611_vm6, %v1615_v25, %v1617_v32  ;;  %v1799_v25 = vld [vmem:[%s3480_s2 + $0x18] sm:$0xff] }
  0x3a   : > { %2487 = vmatpush3.bf16.msra.mxu0 %v2771_v42  ;;  %v3159_v42 = vsel %vm577_vm5, %v766_v21, %v768_v30 }
  0x3b   : > { %2337 = vmatmul.mubr.msk.bf16.gmra.mrb[16].mxu1 %vm368_vm3, %v343_v45  ;;  %2508 = vmatprep.subr.bf16.mxu0 %v2804_v1  ;;  %v1619_v45 = vrot.slane %v3049_v40, 3 }
  0x3c   : > { %2348 = vmatprep.mubr.msk.bf16.mxu1 %vm2805_vm0, %v2804_v1 }
  0x3d   : > { %2469 = vmatmul.mubr.msk.bf16.gmra.mrb[8].mxu0 %vm368_vm3, %v1101_v52  ;;  %v942_v52 = vshrl.u32 %v3074_v53, 16  ;;  %v1796_v53 = vld [vmem:[%s3480_s2] sm:$0xff] }
  0x3e   : > { %2472 = vmatprep.mubr.msk.bf16.mxu0 %vm2805_vm0, %v2804_v1 }
  0x3f   : > { %v944_v62 = vrot.slane %v942_v52, 1  ;;  %v2783_v52 = vld [vmem:[%s3479_s1 + $0xf0] sm:$0xff]  }
  0x41   : > { %v948_v16 = vor.u32 %v947_v63, %v944_v62  ;;  %v2787_v62 = vld [vmem:[%s3479_s1 + $0x70] sm:$0xff]  }
  0x43   : > { %2349 = vmatmul.mubr.msk.bf16.vlgmr.msra.gmra.mrb[0].mxu1 %vm368_vm3, %v2902_v11  ;;  %v764_v11 = vrot.slane %v3030_v29, 1  ;;  %v2777_v29 = vld [vmem:[%s3479_s1 + $0x58] sm:$0xff]  }
  0x44   : > { %2369 = vmatpush3.bf16.msra.mxu1 %v2767_v59  ;;  %2352 = vmatprep.mubr.msk.bf16.mxu1 %vm2805_vm0, %v2804_v1  ;;  %v3177_v59 = vsel %vm1611_vm6, %v1617_v32, %v1619_v45  ;;  %v1800_v32 = vld [vmem:[%s3480_s2 + $0x20] sm:$0xff] }
  0x45   : > { %2370 = vmatprep.subr.bf16.mxu1 %v2804_v1  ;;  %2473 = vmatmul.mubr.msk.bf16.gmra.mrb[12].mxu0 %vm368_vm3, %v1103_v5  ;;  %v3129_v17 = vsel %vm577_vm5, %v762_v3, %v764_v11  ;;  %v3142_v28 = vsel %vm577_vm5, %v764_v11, %v766_v21  ;;  %v954_v3 = vshll.u32 %v3106_v7, 16  ;;  %v939_v5 = vor.u32 %v938_v57, %v935_v51 }
  0x46   : > { %2476 = vmatprep.mubr.msk.bf16.mxu0 %vm2805_vm0, %v2804_v1  ;;  %v2806_v11 = vmov 0   ;;  %v1277_v7 = vrot.slane %v3115_v9, 2  ;;  %v1282_v57 = vsel %vm1094_vm4, %v1279_v39, %v1281_v43  ;;  %v1424_v43 = vshrl.u32 %v3145_v36, 16 }
  0x47   : > { %2735 = vset.pattern.permute.xlu0 %v2806_v11  ;;  %v956_v20 = vrot.slane %v954_v3, 2  ;;  %v3199_v21 = vsel %vm905_vm2, %v2964_v50, %v939_v5  ;;  %2736 = vset.pattern.permute.xlu1 %v2806_v11  ;;  %v3206_v23 = vsel %vm905_vm2, %v939_v5, %v948_v16  ;;  %v1434_v3 = vrot.slane %v1432_v58, 2 }
  0x48   : > { %2371 = vmatpush3.bf16.msra.mxu1 %v2770_v18  ;;  %1808 = vperm.xlu0 %2735, %v1796_v53   ;;  %v1278_v50 = vsel %vm1094_vm4, %v1276_v14, %v1277_v7  ;;  %v1280_v51 = vsel %vm1094_vm4, %v1277_v7, %v1279_v39  ;;  %v1435_v53 = vshll.u32 %v3115_v9, 16  ;;  %v2789_v9 = vld [vmem:[%s3479_s1 + $0x78] sm:$0xff]   ;;  %v1444_v11 = vshll.u32 %v3125_v15, 16  ;;  %v2788_v7 = vld [vmem:[%s3479_s1 + $0x100] sm:$0xff]  }
  0x49   : > { %2372 = vmatprep.subr.bf16.mxu1 %v2804_v1  ;;  %v957_v24 = vor.u32 %v956_v20, %v953_v19  ;;  %1818 = vperm.xlu1 %2736, %v1798_v13   ;;  %v1441_v19 = vshrl.u32 %v3125_v15, 16  ;;  %v2790_v20 = vld [vmem:[%s3479_s1 + $0x108] sm:$0xff]  }
  0x4a   : > { %v1437_v5 = vrot.slane %v1435_v53, 3 }
  0x4b   : > { %2353 = vmatmul.mubr.msk.bf16.gmra.mrb[4].mxu1 %vm368_vm3, %v2905_v12  ;;  %v1621_v12 = vrot.slane %v3156_v41, 3  ;;  %v3218_v30 = vsel %vm905_vm2, %v948_v16, %v957_v24  ;;  %v1443_v14 = vrot.slane %v1441_v19, 2  ;;  %v1453_v16 = vshll.u32 %v3041_v35, 16 }
  0x4c   : > { %2356 = vmatprep.mubr.msk.bf16.mxu1 %vm2805_vm0, %v2804_v1  ;;  %2373 = vmatpush3.bf16.msra.mxu1 %v2774_v26  ;;  %v2776_v26 = vld [vmem:[%s3479_s1 + $0xe0] sm:$0xff]  }
  0x4d   : > { %2374 = vmatprep.subr.bf16.mxu1 %v2804_v1  ;;  %2477 = vmatmul.mubr.msk.bf16.gmra.mrb[16].mxu0 %vm368_vm3, %v1105_v46  ;;  %v3188_v18 = vsel %vm1611_vm6, %v1619_v45, %v1621_v12  ;;  %v1802_v45 = vld [vmem:[%s3480_s2 + $0x30] sm:$0xff]  ;;  %v1803_v46 = vld [vmem:[%s3480_s2 + $0x38] sm:$0xff]  ;;  %v2782_v12 = vld [vmem:[%s3479_s1 + $0x60] sm:$0xff]  }
  0x4e   : > { %2488 = vmatprep.mubr.msk.bf16.mxu0 %vm2805_vm0, %v2804_v1  ;;  %1813 = vperm.xlu0 %2735, %v1797_v22  }
  0x4f   : > { %1823 = vperm.xlu1 %2736, %v1799_v25   ;;  %v1455_v25 = vrot.slane %v1453_v16, 3 }
  0x50   : > { %2375 = vmatpush3.bf16.msra.mxu1 %v2777_v29  ;;  %v2786_v29 = vld [vmem:[%s3479_s1 + $0xf8] sm:$0xff]  }
  0x51   : > { %2396 = vmatprep.subr.bf16.mxu1 %v2804_v1 }
  0x52   : > { %1828 = vperm.xlu0 %2735, %v1800_v32   ;;  %v2793_v32 = vld [vmem:[%s3479_s1 + $0x118] sm:$0xff]  }
  0x53   : > { %2357 = vmatmul.mubr.msk.bf16.gmra.mrb[8].mxu1 %vm368_vm3, %v2935_v33  ;;  %v1801_v33 = vld [vmem:[%s3480_s2 + $0x28] sm:$0xff] }
  0x54   : > { %2360 = vmatprep.mubr.msk.bf16.mxu1 %vm2805_vm0, %v2804_v1  ;;  %1833 = vperm.xlu1 %2736, %v1801_v33  }
  0x55   : > { %2489 = vmatmul.mubr.msk.bf16.vlgmr.msra.gmra.mrb[0].mxu0 %vm368_vm3, %v1278_v50  ;;  %v2791_v50 = vld [vmem:[%s3479_s1 + $0x110] sm:$0xff]  }
  0x56   : > { %2492 = vmatprep.mubr.msk.bf16.mxu0 %vm2805_vm0, %v2804_v1  ;;  %2509 = vmatpush3.bf16.msra.mxu0 %v2776_v26  ;;  %v1462_v26 = vshll.u32 %v3049_v40, 16 }
  0x57   : > { %2510 = vmatprep.subr.bf16.mxu0 %v2804_v1  ;;  %1838 = vperm.xlu0 %2735, %v1802_v45   ;;  %v1468_v45 = vshrl.u32 %v3156_v41, 16 }
  0x58   : > { %1843 = vperm.xlu1 %2736, %v1803_v46   ;;  %v1471_v46 = vshll.u32 %v3156_v41, 16 }
  0x5a   : > { %2511 = vmatpush3.bf16.msra.mxu0 %v2779_v10  ;;  %v1464_v10 = vrot.slane %v1462_v26, 3 }
  0x5b   : > { %2361 = vmatmul.mubr.msk.bf16.gmra.mrb[12].mxu1 %vm368_vm3, %v2960_v49  ;;  %2512 = vmatprep.subr.bf16.mxu0 %v2804_v1  ;;  %v1804_v49 = vld [vmem:[%s3480_s2 + $0x40] sm:$0xff] }
  0x5c   : > { %2364 = vmatprep.mubr.msk.bf16.mxu1 %vm2805_vm0, %v2804_v1  ;;  %1848 = vperm.xlu0 %2735, %v1804_v49  }
  0x5d   : > { %2493 = vmatmul.mubr.msk.bf16.gmra.mrb[4].mxu0 %vm368_vm3, %v1280_v51  ;;  %1853 = vperm.xlu1 %2736, %v1805_v55   ;;  %v1470_v51 = vrot.slane %v1468_v45, 2 }
  0x5e   : > { %2496 = vmatprep.mubr.msk.bf16.mxu0 %vm2805_vm0, %v2804_v1  ;;  %2513 = vmatpush3.bf16.msra.mxu0 %v2783_v52  ;;  %v1473_v52 = vrot.slane %v1471_v46, 3 }
  0x5f   : > { %2514 = vmatprep.subr.bf16.mxu0 %v2804_v1 }
  0x60   : > { %v1474_v41 = vor.u32 %v1473_v52, %v1470_v51 }
  0x62   : > { %2515 = vmatpush3.bf16.msra.mxu0 %v2786_v29 }
  0x63   : > { %2365 = vmatmul.mubr.msk.bf16.gmra.mrb[16].mxu1 %vm368_vm3, %v2986_v61  ;;  %2536 = vmatprep.subr.bf16.mxu0 %v2804_v1  ;;  %v2785_v61 = vld [vmem:[%s3479_s1 + $0x68] sm:$0xff]  }
  0x64   : > { %2376 = vmatprep.mubr.msk.bf16.mxu1 %vm2805_vm0, %v2804_v1 }
  0x65   : > { %2497 = vmatmul.mubr.msk.bf16.gmra.mrb[8].mxu0 %vm368_vm3, %v1282_v57 }
  0x66   : > { %2500 = vmatprep.mubr.msk.bf16.mxu0 %vm2805_vm0, %v2804_v1 }
  0x6b   : > { %2377 = vmatmul.mubr.msk.bf16.vlgmr.msra.gmra.mrb[0].mxu1 %vm368_vm3, %v3064_v47  ;;  %v1427_v47 = vshll.u32 %v3145_v36, 16  ;;  %v1438_v36 = vor.u32 %v1437_v5, %v1434_v3 }
  0x6c   : > { %2397 = vmatpush3.bf16.msra.mxu1 %v2782_v12  ;;  %2380 = vmatprep.mubr.msk.bf16.mxu1 %vm2805_vm0, %v2804_v1 }
  0x6d   : > { %2398 = vmatprep.subr.bf16.mxu1 %v2804_v1  ;;  %2501 = vmatmul.mubr.msk.bf16.gmra.mrb[12].mxu0 %vm368_vm3, %v3069_v48  ;;  %v1426_v48 = vrot.slane %v1424_v43, 2  ;;  %v1429_v63 = vrot.slane %v1427_v47, 3 }
  0x6e   : > { %2504 = vmatprep.mubr.msk.bf16.mxu0 %vm2805_vm0, %v2804_v1 }
  0x70   : > { %2399 = vmatpush3.bf16.msra.mxu1 %v2785_v61 }
  0x71   : > { %2400 = vmatprep.subr.bf16.mxu1 %v2804_v1 }
  0x73   : > { %2381 = vmatmul.mubr.msk.bf16.gmra.mrb[4].mxu1 %vm368_vm3, %v3026_v27  ;;  %v1430_v27 = vor.u32 %v1429_v63, %v1426_v48 }
  0x74   : > { %2384 = vmatprep.mubr.msk.bf16.mxu1 %vm2805_vm0, %v2804_v1  ;;  %2401 = vmatpush3.bf16.msra.mxu1 %v2787_v62 }
  0x75   : > { %2402 = vmatprep.subr.bf16.mxu1 %v2804_v1  ;;  %2505 = vmatmul.mubr.msk.bf16.gmra.mrb[16].mxu0 %vm368_vm3, %v3080_v54  ;;  %v1439_v13 = vsel %vm1422_vm7, %v1430_v27, %v1438_v36  ;;  %v1446_v54 = vrot.slane %v1444_v11, 3 }
  0x76   : > { %2516 = vmatprep.mubr.msk.bf16.mxu0 %vm2805_vm0, %v2804_v1 }
  0x77   : > { %v1447_v15 = vor.u32 %v1446_v54, %v1443_v14 }
  0x78   : > { %2403 = vmatpush3.bf16.msra.mxu1 %v2789_v9 }
  0x79   : > { %2564 = vmatprep.subr.bf16.mxu1 %v2804_v1  ;;  %v1448_v22 = vsel %vm1422_vm7, %v1438_v36, %v1447_v15 }
  0x7b   : > { %2385 = vmatmul.mubr.msk.bf16.gmra.mrb[8].mxu1 %vm368_vm3, %v3036_v31  ;;  %v1450_v31 = vshrl.u32 %v3041_v35, 16 }
  0x7c   : > { %2388 = vmatprep.mubr.msk.bf16.mxu1 %vm2805_vm0, %v2804_v1 }
  0x7d   : > { %2517 = vmatmul.mubr.msk.bf16.vlgmr.msra.gmra.mrb[0].mxu0 %vm368_vm3, %v1439_v13  ;;  %v1452_v24 = vrot.slane %v1450_v31, 2 }
  0x7e   : > { %2520 = vmatprep.mubr.msk.bf16.mxu0 %vm2805_vm0, %v2804_v1  ;;  %2537 = vmatpush3.bf16.msra.mxu0 %v2788_v7 }
  0x7f   : > { %2538 = vmatprep.subr.bf16.mxu0 %v2804_v1  ;;  %v1456_v35 = vor.u32 %v1455_v25, %v1452_v24 }
  0x81   : > { %v1457_v33 = vsel %vm1422_vm7, %v1447_v15, %v1456_v35 }
  0x82   : > { %2539 = vmatpush3.bf16.msra.mxu0 %v2790_v20 }
  0x83   : > { %2389 = vmatmul.mubr.msk.bf16.gmra.mrb[12].mxu1 %vm368_vm3, %v3085_v56  ;;  %2540 = vmatprep.subr.bf16.mxu0 %v2804_v1  ;;  %v1459_v56 = vshrl.u32 %v3049_v40, 16 }
  0x84   : > { %2392 = vmatprep.mubr.msk.bf16.mxu1 %vm2805_vm0, %v2804_v1 }
  0x85   : > { %2521 = vmatmul.mubr.msk.bf16.gmra.mrb[4].mxu0 %vm368_vm3, %v1448_v22  ;;  %v1461_v39 = vrot.slane %v1459_v56, 2 }
  0x86   : > { %2524 = vmatprep.mubr.msk.bf16.mxu0 %vm2805_vm0, %v2804_v1  ;;  %2541 = vmatpush3.bf16.msra.mxu0 %v2791_v50 }
  0x87   : > { %2542 = vmatprep.subr.bf16.mxu0 %v2804_v1  ;;  %v1465_v40 = vor.u32 %v1464_v10, %v1461_v39 }
  0x8a   : > { %2543 = vmatpush3.bf16.msra.mxu0 %v2793_v32 }
  0x8b   : > { %2393 = vmatmul.mubr.msk.bf16.gmra.mrb[16].mxu1 %vm368_vm3, %v3094_v60  ;;  %v1466_v60 = vsel %vm1422_vm7, %v1456_v35, %v1465_v40 }
  0x8c   : > { %2404 = vmatprep.mubr.msk.bf16.mxu1 %vm2805_vm0, %v2804_v1 }
  0x8d   : > { %2525 = vmatmul.mubr.msk.bf16.gmra.mrb[8].mxu0 %vm368_vm3, %v1457_v33 }
  0x8e   : > { %2528 = vmatprep.mubr.msk.bf16.mxu0 %vm2805_vm0, %v2804_v1 }
  0x93   : > { %2405 = vmatmul.mubr.msk.bf16.vlgmr.msra.gmra.mrb[0].mxu1 %vm368_vm3, %v3099_v0 }
  0x94   : > { %2568 = vmatpush3.bf16.msra.mxu1 %v2853_v2  ;;  %2408 = vmatprep.mubr.msk.bf16.mxu1 %vm2805_vm0, %v2804_v1  ;;  %v1475_v2 = vsel %vm1422_vm7, %v1465_v40, %v1474_v41 }
  0x95   : > { %2565 = vmatprep.subr.bf16.mxu1 %v2804_v1  ;;  %2529 = vmatmul.mubr.msk.bf16.gmra.mrb[12].mxu0 %vm368_vm3, %v1466_v60 }
  0x96   : > { %2532 = vmatprep.mubr.msk.bf16.mxu0 %vm2805_vm0, %v2804_v1 }
  0x98   : > { %2569 = vmatpush3.bf16.msra.mxu1 %v2865_v4 }
  0x99   : > { %2566 = vmatprep.subr.bf16.mxu1 %v2804_v1 }
  0x9b   : > { %2409 = vmatmul.mubr.msk.bf16.gmra.mrb[4].mxu1 %vm368_vm3, %v3118_v34 }
  0x9c   : > { %2412 = vmatprep.mubr.msk.bf16.mxu1 %vm2805_vm0, %v2804_v1  ;;  %2570 = vmatpush3.bf16.msra.mxu1 %v2881_v6 }
  0x9d   : > { %2567 = vmatprep.subr.bf16.mxu1 %v2804_v1  ;;  %2533 = vmatmul.mubr.msk.bf16.gmra.mrb[16].mxu0 %vm368_vm3, %v1475_v2 }
  0x9e   : > { %2544 = vmatprep.mubr.msk.bf16.mxu0 %vm2805_vm0, %v2804_v1 }
  0xa0   : > { %2571 = vmatpush3.bf16.msra.mxu1 %v2895_v8 }
  0xa3   : > { %2413 = vmatmul.mubr.msk.bf16.gmra.mrb[8].mxu1 %vm368_vm3, %v3129_v17 }
  0xa4   : > { %2416 = vmatprep.mubr.msk.bf16.mxu1 %vm2805_vm0, %v2804_v1 }
  0xa5   : > { %2545 = vmatmul.mubr.msk.bf16.vlgmr.msra.gmra.mrb[0].mxu0 %vm368_vm3, %v3149_v37 }
  0xa6   : > { %2548 = vmatprep.mubr.msk.bf16.mxu0 %vm2805_vm0, %v2804_v1 }
  0xab   : > { %2417 = vmatmul.mubr.msk.bf16.gmra.mrb[12].mxu1 %vm368_vm3, %v3142_v28 }
  0xac   : > { %2420 = vmatprep.mubr.msk.bf16.mxu1 %vm2805_vm0, %v2804_v1 }
  0xad   : > { %2549 = vmatmul.mubr.msk.bf16.gmra.mrb[4].mxu0 %vm368_vm3, %v3152_v38 }
  0xae   : > { %2552 = vmatprep.mubr.msk.bf16.mxu0 %vm2805_vm0, %v2804_v1 }
  0xb3   : > { %2421 = vmatmul.mubr.msk.bf16.gmra.mrb[16].mxu1 %vm368_vm3, %v3159_v42 }
  0xb4   : > { %2440 = vmatprep.mubr.msk.bf16.mxu1 %vm2805_vm0, %v2804_v1 }
  0xb5   : > { %2553 = vmatmul.mubr.msk.bf16.gmra.mrb[8].mxu0 %vm368_vm3, %v3162_v44 }
  0xb6   : > { %2556 = vmatprep.mubr.msk.bf16.mxu0 %vm2805_vm0, %v2804_v1 }
  0xbb   : > { %2441 = vmatmul.mubr.msk.bf16.vlgmr.msra.gmra.mrb[8].mxu1 %vm368_vm3, %v3199_v21 }
  0xbc   : > { %2444 = vmatprep.mubr.msk.bf16.mxu1 %vm2805_vm0, %v2804_v1 }
  0xbd   : > { %2557 = vmatmul.mubr.msk.bf16.gmra.mrb[12].mxu0 %vm368_vm3, %v3177_v59 }
  0xbe   : > { %2560 = vmatprep.mubr.msk.bf16.mxu0 %vm2805_vm0, %v2804_v1 }
  0xc3   : > { %2445 = vmatmul.mubr.msk.bf16.gmra.mrb[12].mxu1 %vm368_vm3, %v3206_v23 }
  0xc4   : > { %2448 = vmatprep.mubr.msk.bf16.mxu1 %vm2805_vm0, %v2804_v1 }
  0xc5   : > { %2561 = vmatmul.mubr.msk.bf16.gmra.mrb[16].mxu0 %vm368_vm3, %v3188_v18 }
  0xc7   : > { %v1809_v38 = vpop.permute.xlu0 %1808 }
  0xc8   : > { %v1819_v55 = vpop.permute.xlu1 %1818 }
  0xcb   : > { %2449 = vmatmul.mubr.msk.bf16.gmra.mrb[16].mxu1 %vm368_vm3, %v3218_v30 }
  0xcd   : > { %v1814_v18 = vpop.permute.xlu0 %1813 }
  0xce   : > { %v1824_v27 = vpop.permute.xlu1 %1823 }
  0xd1   : > { %v1829_v45 = vpop.permute.xlu0 %1828 }
 0x166   : > { %v843_v4 = vpop.f32.mrb[0].mxu1 }
 0x167   : > { %v2406_v6 = vpop.f32.mrb[1].mxu1 }
 0x168   : > { %v846_v8 = vpop.f32.mrb[2].mxu1 }
 0x169   : > { %v2407_v0 = vpop.f32.mrb[3].mxu1 }
 0x16e   : > { %v851_v34 = vpop.f32.mrb[4].mxu1 }
 0x16f   : > { %v2410_v17 = vpop.f32.mrb[5].mxu1 }
 0x170   : > { %v854_v28 = vpop.f32.mrb[6].mxu1 }
 0x171   : > { %v2411_v37 = vpop.f32.mrb[7].mxu1 }
 0x178   : > { %v1696_v42 = vpop.f32.mrb[0].mxu0 }
 0x179   : > { %v2572_v44 = vadd.f32 %v1696_v42, %v843_v4  ;;  %v2546_v59 = vpop.f32.mrb[1].mxu0  ;;  %v1834_v4 = vpop.permute.xlu1 %1833 }
 0x17a   : > { %v1699_v1 = vpop.f32.mrb[2].mxu0 }
 0x17b   : > { %v2221_v21 = vpack.c.bf16 %v2572_v44, %v2572_v44  ;;  %v1856_v23 = vmul.f32 %v2572_v44, %v1809_v38  ;;  %v2573_v30 = vadd.f32 %v1699_v1, %v846_v8  ;;  %v2547_v49 = vpop.f32.mrb[3].mxu0 }
 0x17d   : > { %1786 = vst.msk [vmem:[%s3425_s27] sm:$0xf] %vm1785_vm8, %v2221_v21  ;;  %v1893_v29 = vmul.f32 %v2572_v44, %v1856_v23  ;;  %v2222_v57 = vpack.c.bf16 %v2573_v30, %v2573_v30  ;;  %v1857_v12 = vmul.f32 %v2573_v30, %v1814_v18  ;;  %v1866_v61 = vsel %vm368_vm3, %v1856_v23, 0.0 }
 0x17f   : > { %1787 = vst.msk [vmem:[%s3425_s27 + $0x4] sm:$0xf] %vm1785_vm8, %v2222_v57  ;;  %v1867_v43 = vsel %vm368_vm3, %v1857_v12, 0.0  ;;  %v1894_v47 = vmul.f32 %v2573_v30, %v1857_v12  ;;  %v1903_v62 = vsel %vm368_vm3, %v1893_v29, 0.0 }
 0x180   : > { %v1868_v58 = vadd.f32 %v1867_v43, %v1866_v61  ;;  %v1704_v53 = vpop.f32.mrb[4].mxu0 }
 0x181   : > { %v1904_v48 = vsel %vm368_vm3, %v1894_v47, 0.0  ;;  %v2574_v63 = vadd.f32 %v1704_v53, %v851_v34  ;;  %v2550_v3 = vpop.f32.mrb[5].mxu0  ;;  %v1844_v53 = vpop.permute.xlu1 %1843 }
 0x182   : > { %v1905_v5 = vadd.f32 %v1904_v48, %v1903_v62  ;;  %v1707_v9 = vpop.f32.mrb[6].mxu0 }
 0x183   : > { %v2223_v36 = vpack.c.bf16 %v2574_v63, %v2574_v63  ;;  %v1858_v19 = vmul.f32 %v2574_v63, %v1819_v55  ;;  %v2575_v11 = vadd.f32 %v1707_v9, %v854_v28  ;;  %v2551_v13 = vpop.f32.mrb[7].mxu0  ;;  %v1839_v55 = vpop.permute.xlu0 %1838 }
 0x185   : > { %1788 = vst.msk [vmem:[%s3425_s27 + $0x8] sm:$0xf] %vm1785_vm8, %v2223_v36  ;;  %v1895_v14 = vmul.f32 %v2574_v63, %v1858_v19  ;;  %v2224_v54 = vpack.c.bf16 %v2575_v11, %v2575_v11  ;;  %v1859_v7 = vmul.f32 %v2575_v11, %v1824_v27  ;;  %v1869_v15 = vsel %vm368_vm3, %v1858_v19, 0.0 }
 0x186   : > { %v1870_v31 = vadd.f32 %v1869_v15, %v1868_v58 }
 0x187   : > { %v1906_v16 = vsel %vm368_vm3, %v1895_v14, 0.0  ;;  %1789 = vst.msk [vmem:[%s3425_s27 + $0xc] sm:$0xf] %vm1785_vm8, %v2224_v54  ;;  %v1871_v20 = vsel %vm368_vm3, %v1859_v7, 0.0  ;;  %v1896_v22 = vmul.f32 %v2575_v11, %v1859_v7 }
 0x188   : > { %v1872_v24 = vadd.f32 %v1871_v20, %v1870_v31  ;;  %v1907_v25 = vadd.f32 %v1906_v16, %v1905_v5  ;;  %v1712_v50 = vpop.f32.mrb[8].mxu0  ;;  %v1849_v20 = vpop.permute.xlu0 %1848 }
 0x189   : > { %v1908_v35 = vsel %vm368_vm3, %v1896_v22, 0.0  ;;  %v2554_v56 = vpop.f32.mrb[9].mxu0 }
 0x18a   : > { %v1909_v26 = vadd.f32 %v1908_v35, %v1907_v25  ;;  %v1715_v32 = vpop.f32.mrb[10].mxu0 }
 0x18b   : > { %v2555_v33 = vpop.f32.mrb[11].mxu0 }
 0x18e   : > { %v1048_v39 = vpop.f32.mrb[8].mxu1 }
 0x18f   : > { %v2576_v10 = vadd.f32 %v1712_v50, %v1048_v39  ;;  %v2442_v40 = vpop.f32.mrb[9].mxu1 }
 0x190   : > { %v1051_v46 = vpop.f32.mrb[10].mxu1  ;;  %v1720_v52 = vpop.f32.mrb[12].mxu0 }
 0x191   : > { %v2225_v60 = vpack.c.bf16 %v2576_v10, %v2576_v10  ;;  %v1860_v51 = vmul.f32 %v2576_v10, %v1829_v45  ;;  %v2577_v41 = vadd.f32 %v1715_v32, %v1051_v46  ;;  %v2443_v2 = vpop.f32.mrb[11].mxu1  ;;  %v2558_v6 = vpop.f32.mrb[13].mxu0 }
 0x192   : > { %v1723_v28 = vpop.f32.mrb[14].mxu0 }
 0x193   : > { %1790 = vst.msk [vmem:[%s3425_s27 + $0x10] sm:$0xf] %vm1785_vm8, %v2225_v60  ;;  %v1873_v8 = vsel %vm368_vm3, %v1860_v51, 0.0  ;;  %v1897_v0 = vmul.f32 %v2576_v10, %v1860_v51  ;;  %v2226_v34 = vpack.c.bf16 %v2577_v41, %v2577_v41  ;;  %v1861_v17 = vmul.f32 %v2577_v41, %v1834_v4  ;;  %v2559_v38 = vpop.f32.mrb[15].mxu0 }
 0x194   : > { %v1874_v37 = vadd.f32 %v1873_v8, %v1872_v24 }
 0x195   : > { %v1910_v42 = vsel %vm368_vm3, %v1897_v0, 0.0  ;;  %1791 = vst.msk [vmem:[%s3425_s27 + $0x14] sm:$0xf] %vm1785_vm8, %v2226_v34  ;;  %v1875_v44 = vsel %vm368_vm3, %v1861_v17, 0.0  ;;  %v1898_v59 = vmul.f32 %v2577_v41, %v1861_v17 }
 0x196   : > { %v1911_v1 = vadd.f32 %v1910_v42, %v1909_v26  ;;  %v1876_v18 = vadd.f32 %v1875_v44, %v1874_v37  ;;  %v1056_v21 = vpop.f32.mrb[12].mxu1  ;;  %v1854_v26 = vpop.permute.xlu1 %1853 }
 0x197   : > { %v1912_v23 = vsel %vm368_vm3, %v1898_v59, 0.0  ;;  %v2578_v30 = vadd.f32 %v1720_v52, %v1056_v21  ;;  %v2446_v49 = vpop.f32.mrb[13].mxu1 }
 0x198   : > { %v1913_v29 = vadd.f32 %v1912_v23, %v1911_v1  ;;  %v1059_v57 = vpop.f32.mrb[14].mxu1  ;;  %v1728_v43 = vpop.f32.mrb[16].mxu0 }
 0x199   : > { %v2227_v12 = vpack.c.bf16 %v2578_v30, %v2578_v30  ;;  %v1862_v61 = vmul.f32 %v2578_v30, %v1839_v55  ;;  %v2579_v47 = vadd.f32 %v1723_v28, %v1059_v57  ;;  %v2447_v58 = vpop.f32.mrb[15].mxu1  ;;  %v2562_v62 = vpop.f32.mrb[17].mxu0 }
 0x19a   : > { %v1731_v9 = vpop.f32.mrb[18].mxu0 }
 0x19b   : > { %1792 = vst.msk [vmem:[%s3425_s27 + $0x18] sm:$0xf] %vm1785_vm8, %v2227_v12  ;;  %v1877_v48 = vsel %vm368_vm3, %v1862_v61, 0.0  ;;  %v1899_v63 = vmul.f32 %v2578_v30, %v1862_v61  ;;  %v2228_v3 = vpack.c.bf16 %v2579_v47, %v2579_v47  ;;  %v1863_v5 = vmul.f32 %v2579_v47, %v1844_v53  ;;  %v2563_v36 = vpop.f32.mrb[19].mxu0 }
 0x19c   : > { %v1878_v27 = vadd.f32 %v1877_v48, %v1876_v18 }
 0x19d   : > { %v1914_v19 = vsel %vm368_vm3, %v1899_v63, 0.0  ;;  %1793 = vst.msk [vmem:[%s3425_s27 + $0x1c] sm:$0xf] %vm1785_vm8, %v2228_v3  ;;  %v1879_v11 = vsel %vm368_vm3, %v1863_v5, 0.0  ;;  %v1900_v13 = vmul.f32 %v2579_v47, %v1863_v5 }
 0x19e   : > { %v1915_v14 = vadd.f32 %v1914_v19, %v1913_v29  ;;  %v1880_v54 = vadd.f32 %v1879_v11, %v1878_v27  ;;  %v1064_v7 = vpop.f32.mrb[16].mxu1 }
 0x19f   : > { %v1916_v15 = vsel %vm368_vm3, %v1900_v13, 0.0  ;;  %v2580_v31 = vadd.f32 %v1728_v43, %v1064_v7  ;;  %v2450_v16 = vpop.f32.mrb[17].mxu1 }
 0x1a0   : > { %v1917_v22 = vadd.f32 %v1916_v15, %v1915_v14  ;;  %v1067_v24 = vpop.f32.mrb[18].mxu1 }
 0x1a1   : > { %v2229_v25 = vpack.c.bf16 %v2580_v31, %v2580_v31  ;;  %v1864_v50 = vmul.f32 %v2580_v31, %v1849_v20  ;;  %v2581_v35 = vadd.f32 %v1731_v9, %v1067_v24  ;;  %v2451_v56 = vpop.f32.mrb[19].mxu1 }
 0x1a3   : > { %1794 = vst.msk [vmem:[%s3425_s27 + $0x20] sm:$0xf] %vm1785_vm8, %v2229_v25  ;;  %v1881_v32 = vsel %vm368_vm3, %v1864_v50, 0.0  ;;  %v1901_v33 = vmul.f32 %v2580_v31, %v1864_v50  ;;  %v2230_v39 = vpack.c.bf16 %v2581_v35, %v2581_v35  ;;  %v1865_v10 = vmul.f32 %v2581_v35, %v1854_v26 }
 0x1a4   : > { %v1882_v40 = vadd.f32 %v1881_v32, %v1880_v54 }
 0x1a5   : > { %v1918_v45 = vsel %vm368_vm3, %v1901_v33, 0.0  ;;  %1795 = vst.msk [vmem:[%s3425_s27 + $0x24] sm:$0xf] %vm1785_vm8, %v2230_v39  ;;  %v1883_v46 = vsel %vm368_vm3, %v1865_v10, 0.0  ;;  %v1902_v60 = vmul.f32 %v2581_v35, %v1865_v10 }
 0x1a6   : > { %v1919_v51 = vadd.f32 %v1918_v45, %v1917_v22  ;;  %v1884_v52 = vadd.f32 %v1883_v46, %v1882_v40 }
 0x1a7   : > { %v1920_v41 = vsel %vm368_vm3, %v1902_v60, 0.0 }
 0x1a8   : > { %v1885_v2 = vrot.slane %v1884_v52, 4  ;;  %v1921_v4 = vadd.f32 %v1920_v41, %v1919_v51 }
 0x1aa   : > { %v1886_v6 = vadd.f32 %v1885_v2, %v1884_v52  ;;  %v1922_v8 = vrot.slane %v1921_v4, 4 }
 0x1ac   : > { %v1887_v0 = vrot.slane %v1886_v6, 2  ;;  %v1923_v34 = vadd.f32 %v1922_v8, %v1921_v4 }
 0x1ae   : > { %v1888_v17 = vadd.f32 %v1887_v0, %v1886_v6  ;;  %v1924_v28 = vrot.slane %v1923_v34, 2 }
 0x1b0   : > { %v1889_v37 = vrot.slane %v1888_v17, 1  ;;  %v1925_v38 = vadd.f32 %v1924_v28, %v1923_v34 }
 0x1b2   : > { %v1890_v42 = vadd.f32 %v1889_v37, %v1888_v17  ;;  %v1926_v44 = vrot.slane %v1925_v38, 1 }
 0x1b4   : > { %1892 = vst.msk [vmem:[%s238_s30] sm:$0x1] %vm1891_vm9, %v1890_v42  ;;  %v1927_v59 = vadd.f32 %v1926_v44, %v1925_v38 }
 0x1b6   : > { %1928 = vst.msk [vmem:[%s241_s8] sm:$0x1] %vm1891_vm9, %v1927_v59 }
 0x1b7 PF: > { %s16_s18 = sadd.s32 1, %s2802_s18  }
 0x1b8   : > { %p13_p4 = scmp.ge.s32.totalorder %s16_s18, 4  }
 0x1ba   :  { %15 = sbr.rel (!%p13_p4) target bundleno = 1 (0x1), region = 94 }

// kernel: _lambda_.15
= control target key start
LH: loop header
LB: loop body
LE: loop exit
PB: predicated region body
PF: predicated region fallthrough
CT: control target
= control target key end

     0   :  { %s6952_s18 = smov 0   ;;  %s8351_s0 = inlined_call_operand.vmem [shape: bf16[2,160,64], index: 0, kind: input, shape index: {}]   ;;  %s8352_s1 = inlined_call_operand.vmem [shape: bf16[25,64,64], index: 1, kind: input, shape index: {}]   ;;  %s8353_s2 = inlined_call_operand.vmem [shape: f32[96,1], index: 2, kind: input, shape index: {}]   ;;  %s8354_s3 = inlined_call_operand.vmem [shape: bf16[2,96,64], index: 3, kind: output, shape index: {0}]   ;;  %s8355_s4 = inlined_call_operand.vmem [shape: f32[2,1,64], index: 4, kind: output, shape index: {1}]   ;;  %s8356_s5 = inlined_call_operand.vmem [shape: f32[2,1,64], index: 5, kind: output, shape index: {2}]  }
   0x1 LB: > { %s5124_s19 = sadd.s32 4294967295, %s6919_s18   ;;  %p5128_p0 = scmp.ge.s32.totalorder %s6919_s18, 1  ;;  %s6919_s18 = sphi %s6952_s18, %s16_s18  }
   0x2   : > { %p192_p1 = scmp.lt.s32.totalorder %s6919_s18, 3 }
   0x4   : > { %p193_p2 = pnand %p5128_p0, %p192_p1 }
   0x5   : > { %v6732_v0 = vld [vmem:[%s8352_s1 + $0x20] sm:$0xff] (!%p193_p2)   ;;  %p226_p3 = scmp.lt.s32.totalorder (!%p193_p2), %s5124_s19, 1  ;;  %v6734_v2 = vld [vmem:[%s8352_s1 + $0x28] sm:$0xff] (!%p193_p2)   ;;  %v6736_v4 = vld [vmem:[%s8352_s1 + $0x30] sm:$0xff] (!%p193_p2)   ;;  %vm383_vm0 = vcmask (!%p193_p2), 523264   ;;  %vm613_vm2 = vcmask (!%p193_p2), 1046528  }
   0x6   : > { %196 = sbr.rel (%p193_p2) target bundleno = 564 (0x234), region = 32  ;;  %v6733_v1 = vld [vmem:[%s8352_s1 + $0x180] sm:$0xff] (!%p193_p2)   ;;  %5923 = vmatprep.subr.bf16.mxu1 (!%p193_p2), %v6732_v0  ;;  %v6735_v3 = vld [vmem:[%s8352_s1 + $0x188] sm:$0xff] (!%p193_p2)   ;;  %v6737_v5 = vld [vmem:[%s8352_s1 + $0x190] sm:$0xff] (!%p193_p2)   ;;  %vm306_vm1 = vsmask.f32 (!%p193_p2), 7424 }
   0x7   : > { %6163 = vmatprep.subr.bf16.mxu0 (!%p193_p2), %v6733_v1  ;;  %5924 = vmatpush3.bf16.msra.mxu1 (!%p193_p2), %v6732_v0  ;;  %v6738_v6 = vld [vmem:[%s8352_s1 + $0x38] sm:$0xff] (!%p193_p2)   ;;  %v6746_v30 = vld [vmem:[%s8352_s1 + $0x1a0] sm:$0xff] (!%p193_p2)   ;;  %v6748_v35 = vld [vmem:[%s8352_s1 + $0x1a8] sm:$0xff] (!%p193_p2)   ;;  %vm775_vm3 = vsmask.f32 (!%p193_p2), 6400  ;;  %vm961_vm4 = vcmask (!%p193_p2), 1045504  }
   0x8   : > { %6164 = vmatpush3.bf16.msra.mxu0 (!%p193_p2), %v6733_v1  ;;  %5925 = vmatprep.subr.bf16.mxu1 (!%p193_p2), %v6734_v2  ;;  %v6739_v7 = vld [vmem:[%s8352_s1 + $0x198] sm:$0xff] (!%p193_p2)   ;;  %v6747_v34 = vld [vmem:[%s8352_s1] sm:$0xff] (!%p193_p2)   ;;  %v6753_v55 = vld [vmem:[%s8352_s1 + $0x1b0] sm:$0xff] (!%p193_p2)   ;;  %vm1326_vm5 = vsmask.f32 (!%p193_p2), 5376  ;;  %vm1537_vm6 = vcmask (!%p193_p2), 1044480  }
   0x9   : > { %6165 = vmatprep.subr.bf16.mxu0 (!%p193_p2), %v6735_v3  ;;  %v6754_v59 = vld [vmem:[%s8352_s1 + $0x8] sm:$0xff] (!%p193_p2)   ;;  %v6755_v61 = vld [vmem:[%s8352_s1 + $0x1b8] sm:$0xff] (!%p193_p2)   ;;  %vm1699_vm7 = vsmask.f32 (!%p193_p2), 4352  ;;  %vm4849_vm8 = vcmask (!%p193_p2), 519168   ;;  %vm4975_vm9 = vcmask (!%p193_p2), 516096  }
   0xb   : > { %5926 = vmatpush3.bf16.msra.mxu1 (!%p193_p2), %v6734_v2 }
   0xc   : > { %6166 = vmatpush3.bf16.msra.mxu0 (!%p193_p2), %v6735_v3  ;;  %5927 = vmatprep.subr.bf16.mxu1 (!%p193_p2), %v6736_v4  ;;  %v6758_v3 = vld [vmem:[%s8352_s1 + $0x10] sm:$0xff] (!%p193_p2)  }
   0xd   : > { %s8404_s19 = smov (!%p226_p3, %s5124_s19), 1  ;;  %6167 = vmatprep.subr.bf16.mxu0 %v6737_v5 }
   0xe   : > { %s6719_s30 = smul.u32 80, %s8404_s19  ;;  %s238_s16 = scalar_lea.vmem %s8355_s4, %s8404_s19 }
   0xf   : > { %5928 = vmatpush3.bf16.msra.mxu1 %v6736_v4  ;;  %s241_s21 = scalar_lea.vmem %s8356_s5, %s8404_s19 }
  0x10   : > { %s6987_s12 = scalar_lea.vmem %s8351_s0, %s6719_s30  ;;  %6168 = vmatpush3.bf16.msra.mxu0 %v6737_v5  ;;  %5929 = vmatprep.subr.bf16.mxu1 %v6738_v6 }
  0x11   : > { %v243_v8 = vld [vmem:[%s6987_s12] sm:$0xf]  ;;  %v6994_v9 = vld [vmem:[%s6987_s12 + $0x4] sm:$0xf]  ;;  %v7000_v11 = vld [vmem:[%s6987_s12 + $0x8] sm:$0xff]   ;;  %6169 = vmatprep.subr.bf16.mxu0 %v6739_v7 }
  0x12   : > { %v6997_v10 = vcombine.low %v243_v8, %v6994_v9  ;;  %v7003_v12 = vld [vmem:[%s6987_s12 + $0x14] sm:$0xff]   ;;  %v7006_v13 = vld [vmem:[%s6987_s12 + $0x10] sm:$0xf]  ;;  %v315_v16 = vshll.u32 %v7000_v11, 16  ;;  %v319_v17 = vshrl.u32 %v7000_v11, 16  ;;  %v7023_v24 = vld [vmem:[%s6987_s12 + $0x1c] sm:$0xff]  }
  0x13   : > { %v2450_v18 = vld [vmem:[%s6987_s12 + $0xc] sm:$0xe]  ;;  %v2464_v20 = vrot.slane %v7003_v12, 1  ;;  %v7018_v21 = vld [vmem:[%s6987_s12 + $0x10] sm:$0xff]   ;;  %5930 = vmatpush3.bf16.msra.mxu1 %v6738_v6  ;;  %v2466_v29 = vrot.slane %v7023_v24, 1  ;;  %v7046_v39 = vld [vmem:[%s6987_s12 + $0x18] sm:$0xff]  }
  0x14   : > { %v308_v14 = vshrl.u32 %v6997_v10, 16  ;;  %v310_v15 = vshll.u32 %v6997_v10, 16  ;;  %v7014_v19 = vcombine.low %v2450_v18, %v7006_v13  ;;  %v317_v23 = vrot.slane %v315_v16, 1  ;;  %6170 = vmatpush3.bf16.msra.mxu0 %v6739_v7  ;;  %5943 = vmatprep.subr.bf16.mxu1 %v6747_v34  ;;  %v7052_v41 = vld [vmem:[%s6987_s12 + $0x24] sm:$0xff]   ;;  %v7062_v49 = vld [vmem:[%s6987_s12 + $0x2c] sm:$0xff]  }
  0x15   : > { %v323_v26 = vshll.u32 %v7018_v21, 16  ;;  %v2467_v37 = vsel %vm613_vm2, %v2464_v20, %v2466_v29  ;;  %6183 = vmatprep.subr.bf16.mxu0 %v6746_v30  ;;  %v327_v40 = vshrl.u32 %v7018_v21, 16  ;;  %v8367_v42 = vshll.u32 %v7003_v12, 16  ;;  %v7057_v46 = vld [vmem:[%s6987_s12 + $0x20] sm:$0xff]   ;;  %v7093_v0 = vld [vmem:[%s6987_s12 + $0x28] sm:$0xff]  }
  0x16   : > { %v312_v22 = vrot.slane %v310_v15, 1  ;;  %v2463_v25 = vrot.slane %v7014_v19, 1  ;;  %v321_v28 = vor.u32 %v319_v17, %v317_v23  ;;  %v331_v44 = vshll.u32 %v7046_v39, 16  ;;  %v7111_v15 = vld [vmem:[%s6987_s12 + $0x30] ss:$0 sps:$4 sm:$0x11]  }
  0x17   : > { %v325_v32 = vrot.slane %v323_v26, 1  ;;  %v789_v33 = vrot.slane %v323_v26, 2  ;;  %v788_v45 = vrot.slane %v327_v40, 1  ;;  %v335_v47 = vshrl.u32 %v7046_v39, 16 }
  0x18   : > { %v313_v27 = vor.u32 %v312_v22, %v308_v14  ;;  %v2465_v31 = vsel %vm613_vm2, %v2463_v25, %v2464_v20  ;;  %v2468_v48 = vrot.slane %v7052_v41, 1  ;;  %v333_v50 = vrot.slane %v331_v44, 1 }
  0x19   : > { %6171 = vmatprep.mubr.msk.bf16.mxu0 %vm383_vm0, %v2465_v31  ;;  %v326_v38 = vsel %vm306_vm1, %v321_v28, %v325_v32  ;;  %v329_v43 = vor.u32 %v327_v40, %v325_v32  ;;  %v339_v51 = vshll.u32 %v7057_v46, 16  ;;  %v7067_v52 = vor.u32 %v789_v33, %v788_v45  ;;  %v6760_v31 = vld [vmem:[%s8352_s1 + $0x18] sm:$0xff]  }
  0x1a   : > { %v318_v36 = vsel %vm306_vm1, %v313_v27, %v317_v23  ;;  %6172 = vmatmul.mubr.msk.bf16.vlgmr.msra.gmra.mrb[0].mxu0 %vm383_vm0, %v2467_v37  ;;  %v2469_v53 = vsel %vm613_vm2, %v2466_v29, %v2468_v48  ;;  %v8357_v54 = vrot.slane %v7062_v49, 1  ;;  %v337_v57 = vor.u32 %v335_v47, %v333_v50 }
  0x1b   : > { %5931 = vmatprep.mubr.msk.bf16.mxu1 %vm383_vm0, %v318_v36  ;;  %6184 = vmatpush3.bf16.msra.mxu0 %v6746_v30  ;;  %v334_v56 = vsel %vm306_vm1, %v329_v43, %v333_v50  ;;  %v341_v58 = vrot.slane %v339_v51, 1  ;;  %v343_v62 = vshrl.u32 %v7057_v46, 16  ;;  %v8366_v1 = vshrl.u32 %v7003_v12, 16  ;;  %v6759_v30 = vld [vmem:[%s8352_s1 + $0x1c0] sm:$0xff]   ;;  %v6761_v43 = vld [vmem:[%s8352_s1 + $0x1c8] sm:$0xff]  }
  0x1c   : > { %5932 = vmatmul.mubr.msk.bf16.vlgmr.msra.gmra.mrb[0].mxu1 %vm383_vm0, %v326_v38  ;;  %6185 = vmatprep.subr.bf16.mxu0 %v6748_v35  ;;  %v2471_v60 = vsel %vm613_vm2, %v2468_v48, %v8357_v54  ;;  %v2625_v2 = vshrl.u32 %v7014_v19, 16  ;;  %v2628_v4 = vshll.u32 %v7014_v19, 16  ;;  %v2633_v5 = vrot.slane %v8367_v42, 2  ;;  %v6762_v50 = vld [vmem:[%s8352_s1 + $0x40] sm:$0xff]  }
  0x1d   : > { %5944 = vmatpush3.bf16.msra.mxu1 %v6747_v34  ;;  %6175 = vmatprep.mubr.msk.bf16.mxu0 %vm383_vm0, %v2469_v53  ;;  %v342_v63 = vsel %vm306_vm1, %v337_v57, %v341_v58  ;;  %v345_v6 = vor.u32 %v343_v62, %v341_v58  ;;  %v347_v7 = vshll.u32 %v7093_v0, 16  ;;  %v2632_v14 = vrot.slane %v8366_v1, 1  ;;  %v7547_v1 = vld [vmem:[%s6987_s12 + $0x1c] sm:$0xf]  ;;  %v7550_v42 = vld [vmem:[%s6987_s12 + $0x20] sm:$0xf] }
  0x1e   : > { %5935 = vmatprep.mubr.msk.bf16.mxu1 %vm383_vm0, %v334_v56  ;;  %5945 = vmatprep.subr.bf16.mxu1 %v6754_v59  ;;  %v2627_v8 = vrot.slane %v2625_v2, 1  ;;  %v2630_v18 = vrot.slane %v2628_v4, 2  ;;  %v351_v19 = vshrl.u32 %v7093_v0, 16  ;;  %v8365_v20 = vshll.u32 %v7023_v24, 16  ;;  %v6763_v2 = vld [vmem:[%s8352_s1 + $0x1d0] sm:$0xff]  }
  0x1f   : > { %6186 = vmatpush3.bf16.msra.mxu0 %v6748_v35  ;;  %v8364_v22 = vshrl.u32 %v7023_v24, 16  ;;  %v349_v23 = vrot.slane %v347_v7, 1  ;;  %v2634_v25 = vor.u32 %v2633_v5, %v2632_v14  ;;  %v355_v26 = vshll.u32 %v7111_v15, 16 }
  0x20   : > { %6187 = vmatprep.subr.bf16.mxu0 %v6753_v55  ;;  %v2631_v27 = vor.u32 %v2630_v18, %v2627_v8  ;;  %v2637_v29 = vrot.slane %v8365_v20, 2  ;;  %v8363_v37 = vshll.u32 %v7052_v41, 16  ;;  %v8361_v38 = vshrl.u32 %v7052_v41, 16  ;;  %v2796_v8 = vld [vmem:[%s6987_s12 + $0xc] sm:$0xc] }
  0x21   : > { %5946 = vmatpush3.bf16.msra.mxu1 %v6754_v59  ;;  %v2636_v28 = vrot.slane %v8364_v22, 1  ;;  %v350_v32 = vsel %vm306_vm1, %v345_v6, %v349_v23  ;;  %v353_v33 = vor.u32 %v351_v19, %v349_v23  ;;  %v357_v34 = vrot.slane %v355_v26, 1 }
  0x22   : > { %6176 = vmatmul.mubr.msk.bf16.gmra.mrb[4].mxu0 %vm383_vm0, %v2471_v60  ;;  %5947 = vmatprep.subr.bf16.mxu1 %v6758_v3  ;;  %v2635_v35 = vsel %vm775_vm3, %v2631_v27, %v2634_v25  ;;  %v8362_v45 = vshll.u32 %v7062_v49, 16  ;;  %v8360_v48 = vshrl.u32 %v7062_v49, 16  ;;  %v2641_v56 = vrot.slane %v8363_v37, 2  ;;  %v7160_v60 = vld [vmem:[%s6987_s12 + $0x34] sm:$0xff]   ;;  %v6766_v27 = vld [vmem:[%s8352_s1 + $0x48] sm:$0xff]  }
  0x23   : > { %6188 = vmatpush3.bf16.msra.mxu0 %v6753_v55  ;;  %v2638_v36 = vor.u32 %v2637_v29, %v2636_v28  ;;  %6191 = vmatprep.mubr.msk.bf16.mxu0 %vm383_vm0, %v2635_v35  ;;  %v358_v40 = vsel %vm306_vm1, %v353_v33, %v357_v34  ;;  %v2640_v55 = vrot.slane %v8361_v38, 1  ;;  %v8359_v4 = vshll.u32 %v7160_v60, 16  ;;  %v6769_v33 = vld [vmem:[%s8352_s1 + $0x50] sm:$0xff]   ;;  %v600_v34 = vld [vmem:[%s6987_s12] sm:$0xe] }
  0x24   : > { %5936 = vmatmul.mubr.msk.bf16.gmra.mrb[4].mxu1 %vm383_vm0, %v342_v63  ;;  %6189 = vmatprep.subr.bf16.mxu0 %v6755_v61  ;;  %v2644_v57 = vrot.slane %v8360_v48, 1  ;;  %v2645_v58 = vrot.slane %v8362_v45, 2  ;;  %v8358_v5 = vshrl.u32 %v7160_v60, 16  ;;  %v5424_v28 = vcombine.low %v2796_v8, %v7006_v13  ;;  %v6774_v8 = vld [vmem:[%s8352_s1 + $0x60] sm:$0xff]  }
  0x25   : > { %5948 = vmatpush3.bf16.msra.mxu1 %v6758_v3  ;;  %5939 = vmatprep.mubr.msk.bf16.mxu1 %vm383_vm0, %v350_v32  ;;  %v2639_v53 = vsel %vm775_vm3, %v2634_v25, %v2638_v36  ;;  %v2642_v59 = vor.u32 %v2641_v56, %v2640_v55  ;;  %v2649_v23 = vrot.slane %v8359_v4, 2  ;;  %v2810_v13 = vrot.slane %v7003_v12, 2  ;;  %v6795_v38 = vld [vmem:[%s8352_s1 + $0x220] sm:$0xff]  }
  0x26   : > { %5949 = vmatprep.subr.bf16.mxu1 %v6760_v31  ;;  %v2646_v63 = vor.u32 %v2645_v58, %v2644_v57  ;;  %v2648_v18 = vrot.slane %v8358_v5, 1  ;;  %v2809_v35 = vrot.slane %v5424_v28, 2  ;;  %v2812_v55 = vrot.slane %v7023_v24, 2  ;;  %v7216_v58 = vld [vmem:[%s6987_s12 + $0x14] sm:$0xf] }
  0x27   : > { %6190 = vmatpush3.bf16.msra.mxu0 %v6755_v61  ;;  %v7163_v61 = vld [vmem:[%s6987_s12 + $0x3c] ss:$0 sps:$4 sm:$0x33]   ;;  %v2643_v3 = vsel %vm775_vm3, %v2638_v36, %v2642_v59  ;;  %v6770_v36 = vld [vmem:[%s8352_s1 + $0x1e0] sm:$0xff]   ;;  %v615_v57 = vrot.slane %v7000_v11, 1 }
  0x28   : > { %6203 = vmatprep.subr.bf16.mxu0 %v6759_v30  ;;  %v2656_v6 = vshll.u32 %v7163_v61, 16  ;;  %v2647_v14 = vsel %vm775_vm3, %v2642_v59, %v2646_v63  ;;  %v2650_v29 = vor.u32 %v2649_v23, %v2648_v18  ;;  %v7222_v59 = vld [vmem:[%s6987_s12 + $0x18] sm:$0xf]  ;;  %v2813_v18 = vsel %vm961_vm4, %v2810_v13, %v2812_v55 }
  0x29   : > { %5950 = vmatpush3.bf16.msra.mxu1 %v6760_v31 }
  0x2a   : > { %6192 = vmatmul.mubr.msk.bf16.vlgmr.msra.gmra.mrb[0].mxu0 %vm383_vm0, %v2639_v53  ;;  %5963 = vmatprep.subr.bf16.mxu1 %v6762_v50  ;;  %v2658_v26 = vrot.slane %v2656_v6, 2  ;;  %v2651_v31 = vsel %vm775_vm3, %v2646_v63, %v2650_v29  ;;  %v6771_v53 = vld [vmem:[%s8352_s1 + $0x58] sm:$0xff]   ;;  %v2814_v6 = vrot.slane %v7052_v41, 2 }
  0x2b   : > { %6204 = vmatpush3.bf16.msra.mxu0 %v6759_v30  ;;  %6195 = vmatprep.mubr.msk.bf16.mxu0 %vm383_vm0, %v2643_v3  ;;  %v6767_v30 = vld [vmem:[%s8352_s1 + $0x1d8] sm:$0xff]  }
  0x2c   : > { %5940 = vmatmul.mubr.msk.bf16.gmra.mrb[8].mxu1 %vm383_vm0, %v358_v40  ;;  %6205 = vmatprep.subr.bf16.mxu0 %v6761_v43  ;;  %v7203_v40 = vcombine.low %v600_v34, %v6994_v9  ;;  %v7226_v63 = vld [vmem:[%s6987_s12 + $0x1c] sm:$0xf]  ;;  %v2815_v28 = vsel %vm961_vm4, %v2812_v55, %v2814_v6  ;;  %v792_v34 = vrot.slane %v335_v47, 1  ;;  %v2957_v55 = vld [vmem:[%s6987_s12 + $0x10] sm:$0xc] }
  0x2d   : > { %5951 = vmatprep.mubr.msk.bf16.mxu1 %vm383_vm0, %v6997_v10  ;;  %v2653_v10 = vshrl.u32 %v7163_v61, 16  ;;  %v7292_v47 = vld [vmem:[%s6987_s12 + $0x34] sm:$0xf] }
  0x2e   : > { %v614_v56 = vrot.slane %v7203_v40, 1 }
  0x2f   : > { %6206 = vmatpush3.bf16.msra.mxu0 %v6761_v43  ;;  %v2655_v25 = vrot.slane %v2653_v10, 1  ;;  %v785_v10 = vrot.slane %v315_v16, 2  ;;  %v784_v16 = vrot.slane %v319_v17, 1 }
  0x30   : > { %6207 = vmatprep.subr.bf16.mxu0 %v6763_v2  ;;  %v616_v23 = vsel %vm613_vm2, %v614_v56, %v615_v57 }
  0x31   : > { %v2659_v32 = vor.u32 %v2658_v26, %v2655_v25  ;;  %v7244_v25 = vld [vmem:[%s6987_s12 + $0x24] sm:$0xf]  ;;  %v7249_v26 = vld [vmem:[%s6987_s12 + $0x28] sm:$0xf]  ;;  %v7265_v17 = vor.u32 %v785_v10, %v784_v16  ;;  %v7295_v10 = vld [vmem:[%s6987_s12 + $0x38] sm:$0xf] }
  0x32   : > { %6196 = vmatmul.mubr.msk.bf16.gmra.mrb[4].mxu0 %vm383_vm0, %v2647_v14  ;;  %v6805_v16 = vld [vmem:[%s8352_s1 + $0xb0] sm:$0xff]   ;;  %v7575_v14 = vld [vmem:[%s6987_s12 + $0x2c] sm:$0xf] }
  0x33   : > { %6208 = vmatpush3.bf16.msra.mxu0 %v6763_v2  ;;  %6199 = vmatprep.mubr.msk.bf16.mxu0 %vm383_vm0, %v2651_v31  ;;  %v2660_v43 = vsel %vm775_vm3, %v2650_v29, %v2659_v32  ;;  %v7229_v2 = vld [vmem:[%s6987_s12 + $0x20] sm:$0xf]  ;;  %v7256_v29 = vld [vmem:[%s6987_s12 + $0x2c] sm:$0xf]  ;;  %v7287_v56 = vsel %vm775_vm3, %v7265_v17, %v7067_v52  ;;  %v7561_v32 = vld [vmem:[%s6987_s12 + $0x24] sm:$0xf]  ;;  %v7626_v31 = vcombine.low %v7547_v1, %v7550_v42 }
  0x34   : > { %5952 = vmatmul.mubr.msk.bf16.vlgmr.msra.gmra.mrb[0].mxu1 %vm383_vm0, %v7000_v11  ;;  %6209 = vmatprep.subr.bf16.mxu0 %v6767_v30 }
  0x35   : > { %5964 = vmatpush3.bf16.msra.mxu1 %v6762_v50  ;;  %5955 = vmatprep.mubr.msk.bf16.mxu1 %vm383_vm0, %v7018_v21  ;;  %v2811_v50 = vsel %vm961_vm4, %v2809_v35, %v2810_v13  ;;  %v617_v13 = vrot.slane %v7018_v21, 1  ;;  %v793_v35 = vrot.slane %v331_v44, 2  ;;  %v796_v44 = vrot.slane %v343_v62, 1 }
  0x36   : > { %5965 = vmatprep.subr.bf16.mxu1 %v6766_v27 }
  0x37   : > { %6210 = vmatpush3.bf16.msra.mxu0 %v6767_v30  ;;  %v7259_v30 = vld [vmem:[%s6987_s12 + $0x30] sm:$0xf] }
  0x38   : > { %6223 = vmatprep.subr.bf16.mxu0 %v6770_v36 }
  0x39   : > { %5966 = vmatpush3.bf16.msra.mxu1 %v6766_v27  ;;  %v6772_v27 = vld [vmem:[%s8352_s1 + $0x1e8] sm:$0xff]  }
  0x3a   : > { %5967 = vmatprep.subr.bf16.mxu1 %v6769_v33  ;;  %6200 = vmatmul.mubr.msk.bf16.gmra.mrb[8].mxu0 %vm383_vm0, %v2660_v43  ;;  %v6775_v43 = vld [vmem:[%s8352_s1 + $0x1f0] sm:$0xff]  }
  0x3b   : > { %6211 = vmatprep.mubr.msk.bf16.mxu0 %vm383_vm0, %v2811_v50  ;;  %v619_v50 = vrot.slane %v7046_v39, 1 }
  0x3c   : > { %5956 = vmatmul.mubr.msk.bf16.gmra.mrb[4].mxu1 %vm383_vm0, %v7046_v39 }
  0x3d   : > { %5959 = vmatprep.mubr.msk.bf16.mxu1 %vm383_vm0, %v7057_v46  ;;  %5968 = vmatpush3.bf16.msra.mxu1 %v6769_v33  ;;  %v2816_v33 = vrot.slane %v7062_v49, 2 }
  0x3e   : > { %5969 = vmatprep.subr.bf16.mxu1 %v6771_v53 }
  0x41   : > { %5970 = vmatpush3.bf16.msra.mxu1 %v6771_v53  ;;  %v2818_v53 = vrot.slane %v7160_v60, 2 }
  0x42   : > { %5983 = vmatprep.subr.bf16.mxu1 %v6774_v8  ;;  %6212 = vmatmul.mubr.msk.bf16.vlgmr.msra.gmra.mrb[0].mxu0 %vm383_vm0, %v2813_v18  ;;  %v797_v18 = vrot.slane %v339_v51, 2  ;;  %v801_v51 = vrot.slane %v347_v7, 2 }
  0x43   : > { %6224 = vmatpush3.bf16.msra.mxu0 %v6770_v36  ;;  %6215 = vmatprep.mubr.msk.bf16.mxu0 %vm383_vm0, %v2815_v28  ;;  %v794_v36 = vor.u32 %v793_v35, %v792_v34  ;;  %v618_v28 = vsel %vm613_vm2, %v615_v57, %v617_v13  ;;  %v2817_v34 = vsel %vm961_vm4, %v2814_v6, %v2816_v33  ;;  %v6776_v57 = vld [vmem:[%s8352_s1 + $0x68] sm:$0xff]  }
  0x44   : > { %5960 = vmatmul.mubr.msk.bf16.gmra.mrb[8].mxu1 %vm383_vm0, %v7093_v0  ;;  %6225 = vmatprep.subr.bf16.mxu0 %v6772_v27  ;;  %v7310_v35 = vcombine.low %v2957_v55, %v7216_v58  ;;  %v798_v54 = vor.u32 %v797_v18, %v796_v44  ;;  %v2819_v6 = vsel %vm961_vm4, %v2816_v33, %v2818_v53  ;;  %v621_v55 = vrot.slane %v7057_v46, 1 }
  0x45   : > { %5971 = vmatprep.mubr.msk.bf16.mxu1 %vm383_vm0, %v616_v23  ;;  %v800_v23 = vrot.slane %v351_v19, 1  ;;  %v7306_v62 = vsel %vm775_vm3, %v7067_v52, %v794_v36  ;;  %v620_v19 = vsel %vm613_vm2, %v617_v13, %v619_v50  ;;  %v7320_v52 = vcombine.low %v7222_v59, %v7226_v63 }
  0x46   : > { %v7328_v7 = vsel %vm775_vm3, %v794_v36, %v798_v54  ;;  %v2820_v44 = vrot.slane %v7163_v61, 2  ;;  %v623_v18 = vrot.slane %v7093_v0, 1  ;;  %v3012_v33 = vrot.slane %v7310_v35, 2  ;;  %v6780_v36 = vld [vmem:[%s8352_s1 + $0x70] sm:$0xff]  }
  0x47   : > { %6226 = vmatpush3.bf16.msra.mxu0 %v6772_v27  ;;  %v6777_v27 = vld [vmem:[%s8352_s1 + $0x1f8] sm:$0xff]   ;;  %v7330_v13 = vor.u32 %v801_v51, %v800_v23  ;;  %v777_v23 = vshrl.u32 %v7203_v40, 16  ;;  %v3013_v61 = vrot.slane %v7320_v52, 2  ;;  %v3384_v20 = vrot.slane %v7320_v52, 3 }
  0x48   : > { %6227 = vmatprep.subr.bf16.mxu0 %v6775_v43  ;;  %v2821_v51 = vsel %vm961_vm4, %v2818_v53, %v2820_v44  ;;  %v6783_v53 = vld [vmem:[%s8352_s1 + $0x78] sm:$0xff]   ;;  %v967_v44 = vrot.slane %v7046_v39, 2  ;;  %v969_v39 = vrot.slane %v7057_v46, 2  ;;  %v6784_v46 = vld [vmem:[%s8352_s1 + $0x208] sm:$0xff]  }
  0x49   : > { %v779_v5 = vrot.slane %v777_v23, 1 }
  0x4a   : > { %6216 = vmatmul.mubr.msk.bf16.gmra.mrb[4].mxu0 %vm383_vm0, %v2817_v34  ;;  %v622_v34 = vsel %vm613_vm2, %v619_v50, %v621_v55  ;;  %v3014_v50 = vsel %vm961_vm4, %v3012_v33, %v3013_v61 }
  0x4b   : > { %6228 = vmatpush3.bf16.msra.mxu0 %v6775_v43  ;;  %6219 = vmatprep.mubr.msk.bf16.mxu0 %vm383_vm0, %v2819_v6  ;;  %v6782_v43 = vld [vmem:[%s8352_s1 + $0x200] sm:$0xff]   ;;  %v7359_v6 = vcombine.low %v7229_v2, %v7244_v25 }
  0x4c   : > { %5972 = vmatmul.mubr.msk.bf16.vlgmr.msra.gmra.mrb[0].mxu1 %vm383_vm0, %v618_v28  ;;  %v7345_v28 = vsel %vm775_vm3, %v798_v54, %v7330_v13  ;;  %6229 = vmatprep.subr.bf16.mxu0 %v6777_v27  ;;  %v963_v54 = vrot.slane %v7000_v11, 2  ;;  %v7368_v11 = vcombine.low %v7249_v26, %v7256_v29 }
  0x4d   : > { %5984 = vmatpush3.bf16.msra.mxu1 %v6774_v8  ;;  %5975 = vmatprep.mubr.msk.bf16.mxu1 %vm383_vm0, %v620_v19  ;;  %v780_v8 = vshll.u32 %v7203_v40, 16  ;;  %v624_v40 = vsel %vm613_vm2, %v621_v55, %v623_v18  ;;  %v948_v19 = vld [vmem:[%s6987_s12] sm:$0xc]  ;;  %v3015_v33 = vrot.slane %v7359_v6, 2 }
  0x4e   : > { %5985 = vmatprep.subr.bf16.mxu1 %v6776_v57  ;;  %v5212_v48 = vcombine.low %v948_v19, %v6994_v9  ;;  %v625_v9 = vrot.slane %v7111_v15, 1  ;;  %v3017_v15 = vrot.slane %v7368_v11, 2  ;;  %v7403_v19 = vcombine.low %v7259_v30, %v7292_v47 }
  0x4f   : > { %6230 = vmatpush3.bf16.msra.mxu0 %v6777_v27  ;;  %v782_v4 = vrot.slane %v780_v8, 2 }
  0x50   : > { %6243 = vmatprep.subr.bf16.mxu0 %v6782_v43  ;;  %v962_v27 = vrot.slane %v5212_v48, 2  ;;  %v6787_v48 = vld [vmem:[%s8352_s1 + $0x80] sm:$0xff]  }
  0x51   : > { %5986 = vmatpush3.bf16.msra.mxu1 %v6776_v57  ;;  %v965_v57 = vrot.slane %v7018_v21, 2  ;;  %v783_v21 = vor.u32 %v782_v4, %v779_v5  ;;  %v7395_v4 = vsel %vm961_vm4, %v967_v44, %v969_v39  ;;  %v971_v5 = vrot.slane %v7093_v0, 2 }
  0x52   : > { %5987 = vmatprep.subr.bf16.mxu1 %v6780_v36  ;;  %6220 = vmatmul.mubr.msk.bf16.gmra.mrb[8].mxu0 %vm383_vm0, %v2821_v51  ;;  %v7385_v23 = vsel %vm961_vm4, %v962_v27, %v963_v54  ;;  %v2968_v51 = vld [vmem:[%s6987_s12 + $0x3c] sm:$0xf]  ;;  %v3182_v27 = vshrl.u32 %v7320_v52, 16 }
  0x53   : > { %v7376_v55 = vsel %vm961_vm4, %v963_v54, %v965_v57  ;;  %6231 = vmatprep.mubr.msk.bf16.mxu0 %vm383_vm0, %v3014_v50  ;;  %v7389_v8 = vsel %vm961_vm4, %v965_v57, %v967_v44  ;;  %v3019_v54 = vrot.slane %v7403_v19, 2  ;;  %v6788_v50 = vld [vmem:[%s8352_s1 + $0x210] sm:$0xff]   ;;  %v3177_v57 = vshll.u32 %v7310_v35, 16 }
  0x54   : > { %5976 = vmatmul.mubr.msk.bf16.gmra.mrb[4].mxu1 %vm383_vm0, %v622_v34  ;;  %v626_v34 = vsel %vm613_vm2, %v623_v18, %v625_v9  ;;  %v3018_v18 = vsel %vm961_vm4, %v3015_v33, %v3017_v15  ;;  %v3185_v9 = vshll.u32 %v7320_v52, 16  ;;  %v7430_v44 = vld [vmem:[%s6987_s12 + $0x30] ss:$0 sps:$4 sm:$0x33]  }
  0x55   : > { %5979 = vmatprep.mubr.msk.bf16.mxu1 %vm383_vm0, %v624_v40  ;;  %5988 = vmatpush3.bf16.msra.mxu1 %v6780_v36  ;;  %v3016_v36 = vsel %vm961_vm4, %v3013_v61, %v3015_v33  ;;  %v787_v40 = vsel %vm775_vm3, %v783_v21, %v7265_v17  ;;  %v7412_v61 = vsel %vm961_vm4, %v969_v39, %v971_v5  ;;  %v6790_v21 = vld [vmem:[%s6987_s12 + $0x40] ss:$0 sps:$4 sm:$0x33]   ;;  %v6791_v39 = vld [vmem:[%s8352_s1 + $0x88] sm:$0xff]  }
  0x56   : > { %5989 = vmatprep.subr.bf16.mxu1 %v6783_v53  ;;  %v7416_v17 = vcombine.low %v7295_v10, %v2968_v51  ;;  %v3020_v33 = vsel %vm961_vm4, %v3017_v15, %v3019_v54  ;;  %v3179_v51 = vrot.slane %v3177_v57, 3  ;;  %v6792_v15 = vld [vmem:[%s8352_s1 + $0x218] sm:$0xff]   ;;  %v3194_v57 = vshll.u32 %v7359_v6, 16  ;;  %v6819_v52 = vld [vmem:[%s6987_s12 + $0x34] ss:$0 sps:$4 sm:$0x33]  }
  0x59   : > { %5990 = vmatpush3.bf16.msra.mxu1 %v6783_v53  ;;  %v3174_v53 = vshrl.u32 %v7310_v35, 16  ;;  %v3184_v35 = vrot.slane %v3182_v27, 2 }
  0x5a   : > { %6003 = vmatprep.subr.bf16.mxu1 %v6787_v48  ;;  %6232 = vmatmul.mubr.msk.bf16.vlgmr.msra.gmra.mrb[0].mxu0 %vm383_vm0, %v3016_v36  ;;  %v3187_v36 = vrot.slane %v3185_v9, 3 }
  0x5b   : > { %6244 = vmatpush3.bf16.msra.mxu0 %v6782_v43  ;;  %6235 = vmatprep.mubr.msk.bf16.mxu0 %vm383_vm0, %v3018_v18  ;;  %v3021_v43 = vrot.slane %v7416_v17, 2  ;;  %v808_v18 = vshll.u32 %v7430_v44, 16 }
  0x5c   : > { %5980 = vmatmul.mubr.msk.bf16.gmra.mrb[8].mxu1 %vm383_vm0, %v626_v34  ;;  %6245 = vmatprep.subr.bf16.mxu0 %v6784_v46  ;;  %v3176_v34 = vrot.slane %v3174_v53, 2  ;;  %v3191_v53 = vshrl.u32 %v7359_v6, 16 }
  0x5d   : > { %5991 = vmatprep.mubr.msk.bf16.mxu1 %vm383_vm0, %v787_v40  ;;  %v3022_v40 = vsel %vm961_vm4, %v3019_v54, %v3021_v43  ;;  %v6794_v54 = vld [vmem:[%s8352_s1 + $0x90] sm:$0xff]   ;;  %v810_v45 = vrot.slane %v808_v18, 2  ;;  %v8370_v18 = vshll.u32 %v7403_v19, 16 }
  0x5e   : > { %v3193_v37 = vrot.slane %v3191_v53, 2 }
  0x5f   : > { %6246 = vmatpush3.bf16.msra.mxu0 %v6784_v46  ;;  %v805_v46 = vshrl.u32 %v7430_v44, 16 }
  0x60   : > { %6247 = vmatprep.subr.bf16.mxu0 %v6788_v50 }
  0x62   : > { %6236 = vmatmul.mubr.msk.bf16.gmra.mrb[4].mxu0 %vm383_vm0, %v3020_v33  ;;  %v3180_v33 = vor.u32 %v3179_v51, %v3176_v34  ;;  %v3196_v34 = vrot.slane %v3194_v57, 3  ;;  %v6796_v51 = vld [vmem:[%s8352_s1 + $0x98] sm:$0xff]  }
  0x63   : > { %6248 = vmatpush3.bf16.msra.mxu0 %v6788_v50  ;;  %6239 = vmatprep.mubr.msk.bf16.mxu0 %vm383_vm0, %v3022_v40  ;;  %v3200_v50 = vshrl.u32 %v7368_v11, 16 }
  0x64   : > { %5992 = vmatmul.mubr.msk.bf16.vlgmr.msra.gmra.mrb[0].mxu1 %vm383_vm0, %v7287_v56  ;;  %v3023_v56 = vrot.slane %v6790_v21, 2  ;;  %6249 = vmatprep.subr.bf16.mxu0 %v6792_v15  ;;  %v807_v21 = vrot.slane %v805_v46, 1  ;;  %v8371_v46 = vshrl.u32 %v7403_v19, 16 }
  0x65   : > { %6004 = vmatpush3.bf16.msra.mxu1 %v6787_v48  ;;  %5995 = vmatprep.mubr.msk.bf16.mxu1 %vm383_vm0, %v7306_v62  ;;  %v3188_v48 = vor.u32 %v3187_v36, %v3184_v35  ;;  %v8372_v62 = vshll.u32 %v7368_v11, 16 }
  0x66   : > { %6005 = vmatprep.subr.bf16.mxu1 %v6791_v39  ;;  %v3024_v40 = vsel %vm961_vm4, %v3021_v43, %v3023_v56  ;;  %v811_v43 = vor.u32 %v810_v45, %v807_v21  ;;  %v8368_v45 = vshll.u32 %v7416_v17, 16 }
  0x67   : > { %6250 = vmatpush3.bf16.msra.mxu0 %v6792_v15  ;;  %v3189_v35 = vsel %vm1326_vm5, %v3180_v33, %v3188_v48  ;;  %v3205_v36 = vrot.slane %v8372_v62, 3  ;;  %v3197_v15 = vor.u32 %v3196_v34, %v3193_v37  ;;  %v7489_v33 = vld [vmem:[%s6987_s12 + $0x40] ss:$0 sps:$4 sm:$0x77]   ;;  %v3211_v34 = vrot.slane %v8371_v46, 2 }
  0x68   : > { %6263 = vmatprep.subr.bf16.mxu0 %v6795_v38  ;;  %v812_v37 = vsel %vm775_vm3, %v7330_v13, %v811_v43  ;;  %v3230_v13 = vshll.u32 %v7489_v33, 16 }
  0x69   : > { %6006 = vmatpush3.bf16.msra.mxu1 %v6791_v39  ;;  %v3202_v39 = vrot.slane %v3200_v50, 2  ;;  %v3198_v21 = vsel %vm1326_vm5, %v3188_v48, %v3197_v15 }
  0x6a   : > { %6007 = vmatprep.subr.bf16.mxu1 %v6794_v54  ;;  %6240 = vmatmul.mubr.msk.bf16.gmra.mrb[8].mxu0 %vm383_vm0, %v3024_v40  ;;  %v8369_v40 = vshrl.u32 %v7416_v17, 16  ;;  %v3232_v22 = vrot.slane %v3230_v13, 3  ;;  %v6803_v13 = vld [vmem:[%s8352_s1 + $0x238] sm:$0xff]  }
  0x6b   : > { %6251 = vmatprep.mubr.msk.bf16.mxu0 %vm383_vm0, %v3189_v35  ;;  %v3206_v56 = vor.u32 %v3205_v36, %v3202_v39  ;;  %v3214_v35 = vrot.slane %v8370_v18, 3  ;;  %v3227_v36 = vshrl.u32 %v7489_v33, 16 }
  0x6c   : > { %5996 = vmatmul.mubr.msk.bf16.gmra.mrb[4].mxu1 %vm383_vm0, %v7328_v7  ;;  %v6799_v7 = vld [vmem:[%s8352_s1 + $0xa0] sm:$0xff]   ;;  %v3220_v48 = vrot.slane %v8369_v40, 2 }
  0x6d   : > { %5999 = vmatprep.mubr.msk.bf16.mxu1 %vm383_vm0, %v7345_v28  ;;  %6008 = vmatpush3.bf16.msra.mxu1 %v6794_v54  ;;  %v3370_v28 = vld [vmem:[%s6987_s12 + $0x10] sm:$0x8]  ;;  %v6797_v54 = vld [vmem:[%s8352_s1 + $0x228] sm:$0xff]   ;;  %v3207_v39 = vsel %vm1326_vm5, %v3197_v15, %v3206_v56  ;;  %v3215_v15 = vor.u32 %v3214_v35, %v3211_v34 }
  0x6e   : > { %6009 = vmatprep.subr.bf16.mxu1 %v6796_v51  ;;  %v7508_v43 = vcombine.low %v3370_v28, %v7216_v58  ;;  %v6800_v28 = vld [vmem:[%s8352_s1 + $0x230] sm:$0xff]   ;;  %v6802_v34 = vld [vmem:[%s8352_s1 + $0xa8] sm:$0xff]  }
  0x6f   : > { %v7531_v35 = vld [vmem:[%s6987_s12 + $0xc] sm:$0xf] }
  0x71   : > { %6010 = vmatpush3.bf16.msra.mxu1 %v6796_v51  ;;  %v3223_v51 = vrot.slane %v8368_v45, 3 }
  0x72   : > { %6023 = vmatprep.subr.bf16.mxu1 %v6799_v7  ;;  %6252 = vmatmul.mubr.msk.bf16.vlgmr.msra.gmra.mrb[0].mxu0 %vm383_vm0, %v3198_v21  ;;  %v3383_v21 = vrot.slane %v7508_v43, 3 }
  0x73   : > { %6264 = vmatpush3.bf16.msra.mxu0 %v6795_v38  ;;  %6255 = vmatprep.mubr.msk.bf16.mxu0 %vm383_vm0, %v3207_v39  ;;  %v7525_v38 = vld [vmem:[%s6987_s12 + $0x8] sm:$0xf]  ;;  %v7534_v39 = vld [vmem:[%s6987_s12 + $0x10] sm:$0xf] }
  0x74   : > { %6000 = vmatmul.mubr.msk.bf16.gmra.mrb[8].mxu1 %vm383_vm0, %v812_v37  ;;  %6265 = vmatprep.subr.bf16.mxu0 %v6797_v54  ;;  %v3229_v37 = vrot.slane %v3227_v36, 2  ;;  %v3216_v36 = vsel %vm1326_vm5, %v3206_v56, %v3215_v15 }
  0x75   : > { %6011 = vmatprep.mubr.msk.bf16.mxu1 %vm383_vm0, %v7385_v23  ;;  %v3224_v23 = vor.u32 %v3223_v51, %v3220_v48  ;;  %v7541_v48 = vld [vmem:[%s6987_s12 + $0x14] sm:$0xf]  ;;  %v7544_v51 = vld [vmem:[%s6987_s12 + $0x18] sm:$0xf] }
  0x77   : > { %6266 = vmatpush3.bf16.msra.mxu0 %v6797_v54  ;;  %v3225_v56 = vsel %vm1326_vm5, %v3215_v15, %v3224_v23  ;;  %v6806_v54 = vld [vmem:[%s8352_s1 + $0x240] sm:$0xff]   ;;  %v3233_v15 = vor.u32 %v3232_v22, %v3229_v37  ;;  %v3385_v37 = vsel %vm1537_vm6, %v3383_v21, %v3384_v20 }
  0x78   : > { %6267 = vmatprep.subr.bf16.mxu0 %v6800_v28 }
  0x79   : > { %v3234_v22 = vsel %vm1326_vm5, %v3224_v23, %v3233_v15  ;;  %v973_v23 = vrot.slane %v7430_v44, 2  ;;  %v6812_v15 = vld [vmem:[%s8352_s1 + $0xc0] sm:$0xff]  }
  0x7a   : > { %6256 = vmatmul.mubr.msk.bf16.gmra.mrb[4].mxu0 %vm383_vm0, %v3216_v36  ;;  %v6816_v36 = vld [vmem:[%s8352_s1 + $0xc8] sm:$0xff]  }
  0x7b   : > { %6268 = vmatpush3.bf16.msra.mxu0 %v6800_v28  ;;  %6259 = vmatprep.mubr.msk.bf16.mxu0 %vm383_vm0, %v3225_v56  ;;  %v7591_v28 = vcombine.low %v7531_v35, %v7534_v39  ;;  %v6807_v56 = vld [vmem:[%s8352_s1 + $0xb8] sm:$0xff]  }
  0x7c   : > { %6012 = vmatmul.mubr.msk.bf16.vlgmr.msra.gmra.mrb[0].mxu1 %vm383_vm0, %v7376_v55  ;;  %v7570_v55 = vld [vmem:[%s6987_s12 + $0x28] sm:$0xf]  ;;  %6269 = vmatprep.subr.bf16.mxu0 %v6803_v13 }
  0x7d   : > { %6024 = vmatpush3.bf16.msra.mxu1 %v6799_v7  ;;  %6015 = vmatprep.mubr.msk.bf16.mxu1 %vm383_vm0, %v7389_v8  ;;  %v1110_v7 = vld [vmem:[%s6987_s12 + $0x4] sm:$0xc] }
  0x7e   : > { %6025 = vmatprep.subr.bf16.mxu1 %v6802_v34  ;;  %v7587_v8 = vcombine.low %v1110_v7, %v7525_v38 }
  0x7f   : > { %6270 = vmatpush3.bf16.msra.mxu0 %v6803_v13  ;;  %v1166_v13 = vrot.slane %v7591_v28, 2 }
  0x80   : > { %6283 = vmatprep.subr.bf16.mxu0 %v6806_v54  ;;  %v1165_v21 = vrot.slane %v7587_v8, 2  ;;  %v1328_v62 = vshrl.u32 %v7587_v8, 16 }
  0x81   : > { %6026 = vmatpush3.bf16.msra.mxu1 %v6802_v34  ;;  %v3386_v34 = vrot.slane %v7359_v6, 3  ;;  %v6822_v6 = vld [vmem:[%s8352_s1 + $0xd8] sm:$0xff]  }
  0x82   : > { %6027 = vmatprep.subr.bf16.mxu1 %v6805_v16  ;;  %6260 = vmatmul.mubr.msk.bf16.gmra.mrb[8].mxu0 %vm383_vm0, %v3234_v22  ;;  %v1167_v7 = vsel %vm961_vm4, %v1165_v21, %v1166_v13  ;;  %v6808_v22 = vld [vmem:[%s8352_s1 + $0x248] sm:$0xff]   ;;  %v1170_v21 = vrot.slane %v7626_v31, 2 }
  0x83   : > { %6271 = vmatprep.mubr.msk.bf16.mxu0 %vm383_vm0, %v3385_v37  ;;  %v3387_v44 = vsel %vm1537_vm6, %v3384_v20, %v3386_v34  ;;  %v7633_v20 = vld [vmem:[%s6987_s12 + $0x30] sm:$0xf] }
  0x84   : > { %6016 = vmatmul.mubr.msk.bf16.gmra.mrb[4].mxu1 %vm383_vm0, %v7395_v4  ;;  %v3388_v4 = vrot.slane %v7368_v11, 3 }
  0x85   : > { %6019 = vmatprep.mubr.msk.bf16.mxu1 %vm383_vm0, %v7412_v61  ;;  %6028 = vmatpush3.bf16.msra.mxu1 %v6805_v16  ;;  %v7613_v61 = vcombine.low %v7541_v48, %v7544_v51  ;;  %v974_v16 = vsel %vm961_vm4, %v971_v5, %v973_v23  ;;  %v3390_v5 = vrot.slane %v7403_v19, 3  ;;  %v3545_v23 = vshrl.u32 %v7508_v43, 16 }
  0x86   : > { %6029 = vmatprep.subr.bf16.mxu1 %v6807_v56  ;;  %v3389_v37 = vsel %vm1537_vm6, %v3386_v34, %v3388_v4  ;;  %v6813_v34 = vld [vmem:[%s8352_s1 + $0x250] sm:$0xff]  }
  0x87   : > { %v1168_v0 = vrot.slane %v7613_v61, 2  ;;  %v3391_v3 = vsel %vm1537_vm6, %v3388_v4, %v3390_v5  ;;  %v3547_v40 = vrot.slane %v3545_v23, 3  ;;  %v6820_v23 = vld [vmem:[%s8352_s1 + $0xd0] sm:$0xff]  }
  0x89   : > { %6030 = vmatpush3.bf16.msra.mxu1 %v6807_v56  ;;  %v7639_v56 = vcombine.low %v7561_v32, %v7570_v55 }
  0x8a   : > { %6043 = vmatprep.subr.bf16.mxu1 %v6812_v15  ;;  %6272 = vmatmul.mubr.msk.bf16.vlgmr.msra.gmra.mrb[0].mxu0 %vm383_vm0, %v3387_v44  ;;  %v7650_v44 = vcombine.low %v7575_v14, %v7633_v20 }
  0x8b   : > { %6284 = vmatpush3.bf16.msra.mxu0 %v6806_v54  ;;  %6275 = vmatprep.mubr.msk.bf16.mxu0 %vm383_vm0, %v3389_v37  ;;  %v3392_v54 = vrot.slane %v7416_v17, 3  ;;  %v3394_v37 = vrot.slane %v7489_v33, 3  ;;  %v1172_v45 = vrot.slane %v7639_v56, 2  ;;  %v1171_v33 = vsel %vm961_vm4, %v1168_v0, %v1170_v21 }
  0x8c   : > { %6020 = vmatmul.mubr.msk.bf16.gmra.mrb[8].mxu1 %vm383_vm0, %v974_v16  ;;  %6285 = vmatprep.subr.bf16.mxu0 %v6808_v22  ;;  %v3548_v16 = vshll.u32 %v7508_v43, 16  ;;  %v6817_v43 = vld [vmem:[%s8352_s1 + $0x258] sm:$0xff]   ;;  %v1174_v46 = vrot.slane %v7650_v44, 2 }
  0x8d   : > { %6031 = vmatprep.mubr.msk.bf16.mxu1 %vm383_vm0, %v1167_v7  ;;  %v1169_v7 = vsel %vm961_vm4, %v1166_v13, %v1168_v0  ;;  %v3552_v13 = vrot.slane %v3182_v27, 3  ;;  %v3393_v4 = vsel %vm1537_vm6, %v3390_v5, %v3392_v54  ;;  %v1331_v27 = vshll.u32 %v7587_v8, 16  ;;  %v6821_v8 = vld [vmem:[%s8352_s1 + $0x260] sm:$0xff]  }
  0x8e   : > { %v3550_v18 = vrot.slane %v3548_v16, 4  ;;  %v1339_v0 = vshll.u32 %v7591_v28, 16 }
  0x8f   : > { %6286 = vmatpush3.bf16.msra.mxu0 %v6808_v22  ;;  %v3553_v22 = vrot.slane %v3185_v9, 4  ;;  %v1336_v9 = vshrl.u32 %v7591_v28, 16 }
  0x90   : > { %6287 = vmatprep.subr.bf16.mxu0 %v6813_v34  ;;  %v3551_v5 = vor.u32 %v3550_v18, %v3547_v40  ;;  %v3395_v18 = vsel %vm1537_vm6, %v3392_v54, %v3394_v37  ;;  %v1175_v40 = vsel %vm961_vm4, %v1172_v45, %v1174_v46  ;;  %v1345_v37 = vshrl.u32 %v7613_v61, 16 }
  0x91   : > { %v3554_v16 = vor.u32 %v3553_v22, %v3552_v13 }
  0x92   : > { %6276 = vmatmul.mubr.msk.bf16.gmra.mrb[4].mxu0 %vm383_vm0, %v3391_v3  ;;  %v1173_v3 = vsel %vm961_vm4, %v1170_v21, %v1172_v45  ;;  %v1338_v21 = vrot.slane %v1336_v9, 2  ;;  %v1176_v45 = vrot.slane %v6819_v52, 2  ;;  %v8373_v52 = vshll.u32 %v7626_v31, 16 }
  0x93   : > { %6288 = vmatpush3.bf16.msra.mxu0 %v6813_v34  ;;  %6279 = vmatprep.mubr.msk.bf16.mxu0 %vm383_vm0, %v3393_v4  ;;  %v3557_v34 = vrot.slane %v3194_v57, 4  ;;  %v3555_v13 = vsel %vm1699_vm7, %v3551_v5, %v3554_v16  ;;  %v8375_v57 = vshll.u32 %v7368_v11, 16  ;;  %v1354_v11 = vshrl.u32 %v7626_v31, 16  ;;  %v7715_v5 = vld [vmem:[%s6987_s12 + $0x40] sm:$0xf] }
  0x94   : > { %6032 = vmatmul.mubr.msk.bf16.vlgmr.msra.gmra.mrb[0].mxu1 %vm383_vm0, %v1169_v7  ;;  %6289 = vmatprep.subr.bf16.mxu0 %v6817_v43  ;;  %v1330_v7 = vrot.slane %v1328_v62, 2 }
  0x95   : > { %6044 = vmatpush3.bf16.msra.mxu1 %v6812_v15  ;;  %6035 = vmatprep.mubr.msk.bf16.mxu1 %vm383_vm0, %v1171_v33  ;;  %v3556_v15 = vrot.slane %v3191_v53, 3  ;;  %v1333_v33 = vrot.slane %v1331_v27, 3  ;;  %v3560_v53 = vrot.slane %v3200_v50, 3  ;;  %v3561_v62 = vrot.slane %v8375_v57, 4  ;;  %v6824_v27 = vld [vmem:[%s8352_s1 + $0xe0] sm:$0xff]  }
  0x96   : > { %6045 = vmatprep.subr.bf16.mxu1 %v6816_v36  ;;  %v1359_v57 = vrot.slane %v8373_v52, 3 }
  0x97   : > { %6290 = vmatpush3.bf16.msra.mxu0 %v6817_v43  ;;  %v3558_v54 = vor.u32 %v3557_v34, %v3556_v15  ;;  %v1348_v43 = vshll.u32 %v7613_v61, 16  ;;  %v1334_v50 = vor.u32 %v1333_v33, %v1330_v7  ;;  %v3562_v4 = vor.u32 %v3561_v62, %v3560_v53 }
  0x98   : > { %6303 = vmatprep.subr.bf16.mxu0 %v6821_v8  ;;  %v8377_v34 = vshll.u32 %v7403_v19, 16  ;;  %v1177_v7 = vsel %vm961_vm4, %v1174_v46, %v1176_v45  ;;  %v8378_v46 = vshrl.u32 %v7416_v17, 16  ;;  %v8379_v62 = vshll.u32 %v7416_v17, 16 }
  0x99   : > { %6046 = vmatpush3.bf16.msra.mxu1 %v6816_v36  ;;  %v1341_v36 = vrot.slane %v1339_v0, 3  ;;  %v3559_v33 = vsel %vm1699_vm7, %v3554_v16, %v3558_v54  ;;  %v5506_v16 = vcombine.low %v7715_v5, %v7715_v5  ;;  %v3563_v53 = vsel %vm1699_vm7, %v3558_v54, %v3562_v4 }
  0x9a   : > { %6047 = vmatprep.subr.bf16.mxu1 %v6820_v23  ;;  %6280 = vmatmul.mubr.msk.bf16.gmra.mrb[8].mxu0 %vm383_vm0, %v3395_v18  ;;  %v6823_v18 = vld [vmem:[%s8352_s1 + $0x268] sm:$0xff]   ;;  %v1363_v45 = vshrl.u32 %v7639_v56, 16  ;;  %v1372_v54 = vshrl.u32 %v7650_v44, 16 }
  0x9b   : > { %6291 = vmatprep.mubr.msk.bf16.mxu0 %vm383_vm0, %v3555_v13  ;;  %v1342_v22 = vor.u32 %v1341_v36, %v1338_v21  ;;  %v1350_v21 = vrot.slane %v1348_v43, 3  ;;  %v3568_v13 = vrot.slane %v8378_v46, 3  ;;  %v3573_v46 = vshrl.u32 %v5506_v16, 16 }
  0x9c   : > { %6036 = vmatmul.mubr.msk.bf16.gmra.mrb[4].mxu1 %vm383_vm0, %v1173_v3  ;;  %v8376_v3 = vshrl.u32 %v7403_v19, 16  ;;  %v1356_v19 = vrot.slane %v1354_v11, 2 }
  0x9d   : > { %6039 = vmatprep.mubr.msk.bf16.mxu1 %vm383_vm0, %v1175_v40  ;;  %6048 = vmatpush3.bf16.msra.mxu1 %v6820_v23  ;;  %v3565_v23 = vrot.slane %v8377_v34, 4  ;;  %v1347_v40 = vrot.slane %v1345_v37, 2  ;;  %v1343_v36 = vsel %vm1326_vm5, %v1334_v50, %v1342_v22  ;;  %v1366_v50 = vshll.u32 %v7639_v56, 16 }
  0x9e   : > { %6049 = vmatprep.subr.bf16.mxu1 %v6822_v6  ;;  %v3564_v15 = vrot.slane %v8376_v3, 3  ;;  %v8374_v34 = vshll.u32 %v7650_v44, 16  ;;  %v1360_v52 = vor.u32 %v1359_v57, %v1356_v19 }
  0x9f   : > { %v1351_v3 = vor.u32 %v1350_v21, %v1347_v40  ;;  %v1365_v40 = vrot.slane %v1363_v45, 2 }
  0xa0   : > { %v3566_v17 = vor.u32 %v3565_v23, %v3564_v15  ;;  %v6827_v15 = vld [vmem:[%s8352_s1 + $0xe8] sm:$0xff]   ;;  %v1374_v23 = vrot.slane %v1372_v54, 2  ;;  %v1377_v19 = vrot.slane %v8374_v34, 3 }
  0xa1   : > { %6050 = vmatpush3.bf16.msra.mxu1 %v6822_v6  ;;  %v3569_v6 = vrot.slane %v8379_v62, 4  ;;  %v6825_v62 = vld [vmem:[%s8352_s1 + $0x270] sm:$0xff]   ;;  %v1352_v21 = vsel %vm1326_vm5, %v1342_v22, %v1351_v3  ;;  %v1361_v57 = vsel %vm1326_vm5, %v1351_v3, %v1360_v52  ;;  %v6828_v22 = vld [vmem:[%s8352_s1 + $0x278] sm:$0xff]  }
  0xa2   : > { %6063 = vmatprep.subr.bf16.mxu1 %v6824_v27  ;;  %6292 = vmatmul.mubr.msk.bf16.vlgmr.msra.gmra.mrb[0].mxu0 %vm383_vm0, %v3559_v33  ;;  %v7754_v33 = vld [vmem:[%s6987_s12 + $0x34] ss:$0 sps:$4 sm:$0x77]   ;;  %v1378_v34 = vor.u32 %v1377_v19, %v1374_v23 }
  0xa3   : > { %6304 = vmatpush3.bf16.msra.mxu0 %v6821_v8  ;;  %6295 = vmatprep.mubr.msk.bf16.mxu0 %vm383_vm0, %v3563_v53  ;;  %v1368_v8 = vrot.slane %v1366_v50, 3  ;;  %v1384_v3 = vshll.u32 %v7754_v33, 16 }
  0xa4   : > { %6040 = vmatmul.mubr.msk.bf16.gmra.mrb[8].mxu1 %vm383_vm0, %v1177_v7  ;;  %v3576_v7 = vshll.u32 %v5506_v16, 16  ;;  %6305 = vmatprep.subr.bf16.mxu0 %v6823_v18  ;;  %v3575_v16 = vrot.slane %v3573_v46, 3  ;;  %v1381_v46 = vshrl.u32 %v7754_v33, 16 }
  0xa5   : > { %6051 = vmatprep.mubr.msk.bf16.mxu1 %vm383_vm0, %v1343_v36  ;;  %v3570_v36 = vor.u32 %v3569_v6, %v3568_v13  ;;  %v3567_v13 = vsel %vm1699_vm7, %v3562_v4, %v3566_v17  ;;  %v1369_v4 = vor.u32 %v1368_v8, %v1365_v40  ;;  %v1386_v8 = vrot.slane %v1384_v3, 3  ;;  %v7825_v3 = vld [vmem:[%s6987_s12 + $0x38] sm:$0xff]  }
  0xa6   : > { %v3578_v53 = vrot.slane %v3576_v7, 4  ;;  %v1383_v40 = vrot.slane %v1381_v46, 2  ;;  %v7817_v46 = vld [vmem:[%s6987_s12 + $0x28] sm:$0xff]  }
  0xa7   : > { %6306 = vmatpush3.bf16.msra.mxu0 %v6823_v18  ;;  %v3571_v6 = vsel %vm1699_vm7, %v3566_v17, %v3570_v36  ;;  %v6831_v18 = vld [vmem:[%s8352_s1 + $0xf0] sm:$0xff]   ;;  %v6833_v17 = vld [vmem:[%s8352_s1 + $0x280] sm:$0xff]   ;;  %v1379_v23 = vsel %vm1326_vm5, %v1369_v4, %v1378_v34 }
  0xa8   : > { %6307 = vmatprep.subr.bf16.mxu0 %v6825_v62  ;;  %v3579_v7 = vor.u32 %v3578_v53, %v3575_v16  ;;  %v7806_v53 = vld [vmem:[%s6987_s12 + $0x1c] sm:$0xf] }
  0xaa   : > { %6296 = vmatmul.mubr.msk.bf16.gmra.mrb[4].mxu0 %vm383_vm0, %v3567_v13  ;;  %v8380_v13 = vcombine.low %v7216_v58, %v7222_v59 }
  0xab   : > { %6308 = vmatpush3.bf16.msra.mxu0 %v6825_v62  ;;  %6299 = vmatprep.mubr.msk.bf16.mxu0 %vm383_vm0, %v3571_v6  ;;  %v3580_v62 = vsel %vm1699_vm7, %v3570_v36, %v3579_v7  ;;  %v1387_v36 = vor.u32 %v1386_v8, %v1383_v40  ;;  %v6839_v6 = vld [vmem:[%s8352_s1 + $0x100] sm:$0xff]   ;;  %v6835_v40 = vld [vmem:[%s8352_s1 + $0x288] sm:$0xff]  }
  0xac   : > { %6052 = vmatmul.mubr.msk.bf16.vlgmr.msra.gmra.mrb[0].mxu1 %vm383_vm0, %v1352_v21  ;;  %v1524_v21 = vld [vmem:[%s6987_s12 + $0x4] sm:$0x8]  ;;  %6309 = vmatprep.subr.bf16.mxu0 %v6828_v22 }
  0xad   : > { %6064 = vmatpush3.bf16.msra.mxu1 %v6824_v27  ;;  %6055 = vmatprep.mubr.msk.bf16.mxu1 %vm383_vm0, %v1361_v57  ;;  %v1370_v27 = vsel %vm1326_vm5, %v1360_v52, %v1369_v4  ;;  %v7791_v19 = vcombine.low %v1524_v21, %v7525_v38  ;;  %v6834_v52 = vld [vmem:[%s8352_s1 + $0xf8] sm:$0xff]   ;;  %v7809_v57 = vld [vmem:[%s6987_s12 + $0x20] sm:$0xff]   ;;  %v1388_v59 = vsel %vm1326_vm5, %v1378_v34, %v1387_v36  ;;  %v1541_v36 = vrot.slane %v7613_v61, 3 }
  0xae   : > { %6065 = vmatprep.subr.bf16.mxu1 %v6827_v15  ;;  %v4654_v58 = vrot.slane %v7809_v57, 2  ;;  %v8385_v61 = vshll.u32 %v7626_v31, 16 }
  0xaf   : > { %6310 = vmatpush3.bf16.msra.mxu0 %v6828_v22  ;;  %v1538_v16 = vrot.slane %v7791_v19, 3  ;;  %v4640_v22 = vld [vmem:[%s6987_s12 + $0x18] sm:$0xc] }
  0xb0   : > { %6323 = vmatprep.subr.bf16.mxu0 %v6833_v17  ;;  %v5636_v4 = vcombine.low %v4640_v22, %v7806_v53  ;;  %v8382_v22 = vcombine.low %v7244_v25, %v7249_v26 }
  0xb1   : > { %6066 = vmatpush3.bf16.msra.mxu1 %v6827_v15  ;;  %v1539_v15 = vrot.slane %v7591_v28, 3  ;;  %v1549_v28 = vrot.slane %v7754_v33, 3  ;;  %v4866_v33 = vld [vmem:[%s8353_s2 + $0x20] sm:$0xff] }
  0xb2   : > { %6067 = vmatprep.subr.bf16.mxu1 %v6831_v18  ;;  %6300 = vmatmul.mubr.msk.bf16.gmra.mrb[8].mxu0 %vm383_vm0, %v3580_v62  ;;  %v4653_v7 = vrot.slane %v5636_v4, 2  ;;  %v4660_v62 = vrot.slane %v7825_v3, 2  ;;  %v7858_v4 = vld [vmem:[%s6987_s12 + $0x40] sm:$0xff]  }
  0xb3   : > { %6311 = vmatprep.mubr.msk.bf16.mxu0 %vm383_vm0, %v8380_v13  ;;  %v1540_v21 = vsel %vm1537_vm6, %v1538_v16, %v1539_v15 }
  0xb4   : > { %6056 = vmatmul.mubr.msk.bf16.gmra.mrb[4].mxu1 %vm383_vm0, %v1370_v27  ;;  %v4656_v27 = vrot.slane %v7817_v46, 2  ;;  %v7833_v8 = vsel %vm961_vm4, %v4653_v7, %v4654_v58  ;;  %v6844_v7 = vld [vmem:[%s8352_s1 + $0x298] sm:$0xff]  }
  0xb5   : > { %6059 = vmatprep.mubr.msk.bf16.mxu1 %vm383_vm0, %v1379_v23  ;;  %6068 = vmatpush3.bf16.msra.mxu1 %v6831_v18  ;;  %v7822_v18 = vld [vmem:[%s6987_s12 + $0x30] sm:$0xff]  }
  0xb6   : > { %6069 = vmatprep.subr.bf16.mxu1 %v6834_v52  ;;  %v4658_v34 = vrot.slane %v7822_v18, 2  ;;  %v7839_v23 = vsel %vm961_vm4, %v4654_v58, %v4656_v27  ;;  %v4662_v58 = vrot.slane %v7858_v4, 2 }
  0xb8   : > { %v7848_v13 = vsel %vm961_vm4, %v4656_v27, %v4658_v34  ;;  %v7851_v16 = vsel %vm961_vm4, %v4658_v34, %v4660_v62  ;;  %v7869_v25 = vsel %vm961_vm4, %v4660_v62, %v4662_v58  ;;  %v1547_v27 = vrot.slane %v7650_v44, 3 }
  0xb9   : > { %6070 = vmatpush3.bf16.msra.mxu1 %v6834_v52  ;;  %v8381_v52 = vcombine.low %v7226_v63, %v7229_v2  ;;  %v6840_v63 = vld [vmem:[%s8352_s1 + $0x290] sm:$0xff]   ;;  %v1543_v2 = vrot.slane %v7626_v31, 3  ;;  %v1701_v34 = vshrl.u32 %v7791_v19, 16  ;;  %v1704_v62 = vshll.u32 %v7791_v19, 16  ;;  %v4869_v31 = vld [vmem:[%s8353_s2 + $0x38] sm:$0xff] }
  0xba   : > { %6083 = vmatprep.subr.bf16.mxu1 %v6839_v6 }
  0xbb   : > { %6312 = vmatmul.mubr.msk.bf16.vlgmr.msra.gmra.mrb[0].mxu0 %vm383_vm0, %v8381_v52  ;;  %v1544_v26 = vsel %vm1537_vm6, %v1541_v36, %v1543_v2  ;;  %v6921_v52 = vmov 0  }
  0xbc   : > { %6060 = vmatmul.mubr.msk.bf16.gmra.mrb[8].mxu1 %vm383_vm0, %v1388_v59  ;;  %6324 = vmatpush3.bf16.msra.mxu0 %v6833_v17  ;;  %v1542_v59 = vsel %vm1537_vm6, %v1539_v15, %v1541_v36  ;;  %v6843_v17 = vld [vmem:[%s8352_s1 + $0x108] sm:$0xff]   ;;  %v8383_v15 = vcombine.low %v7256_v29, %v7259_v30  ;;  %v4862_v29 = vld [vmem:[%s8353_s2] sm:$0xff]  ;;  %v8384_v30 = vcombine.low %v7292_v47, %v7295_v10  ;;  %v6906_v36 = vld [vmem:[%s6987_s12 + $0x3c] sm:$0xf] }
  0xbd   : > { %6071 = vmatprep.mubr.msk.bf16.mxu1 %vm383_vm0, %v1540_v21  ;;  %6315 = vmatprep.mubr.msk.bf16.mxu0 %vm383_vm0, %v8382_v22  ;;  %v1545_v21 = vrot.slane %v7639_v56, 3  ;;  %v5530_v22 = vcombine.low %v6906_v36, %v7715_v5  ;;  %v4864_v47 = vld [vmem:[%s8353_s2 + $0x10] sm:$0xff]  ;;  %v6845_v10 = vld [vmem:[%s6987_s12 + $0x18] sm:$0xff]   ;;  %v6851_v36 = vld [vmem:[%s6987_s12 + $0x28] sm:$0xff]  }
  0xbe   : > { %6325 = vmatprep.subr.bf16.mxu0 %v6835_v40  ;;  %6730 = vset.pattern.permute.xlu0 %v6921_v52  ;;  %v6849_v5 = vld [vmem:[%s8352_s1 + $0x118] sm:$0xff]   ;;  %v6857_v56 = vld [vmem:[%s8352_s1 + $0x128] sm:$0xff]  }
  0xbf   : > { %v1546_v19 = vsel %vm1537_vm6, %v1543_v2, %v1545_v21  ;;  %4876 = vperm.xlu0 %6730, %v4862_v29   ;;  %v1709_v2 = vrot.slane %v1339_v0, 4  ;;  %6731 = vset.pattern.permute.xlu1 %v6921_v52  ;;  %v6847_v29 = vld [vmem:[%s6987_s12 + $0x20] sm:$0xff]   ;;  %v4867_v52 = vld [vmem:[%s8353_s2 + $0x28] sm:$0xff] }
  0xc0   : > { %6326 = vmatpush3.bf16.msra.mxu0 %v6835_v40  ;;  %v6846_v40 = vld [vmem:[%s8352_s1 + $0x110] sm:$0xff]   ;;  %4886 = vperm.xlu1 %6731, %v4864_v47  }
  0xc1   : > { %6327 = vmatprep.subr.bf16.mxu0 %v6840_v63 }
  0xc3   : > { %6316 = vmatmul.mubr.msk.bf16.gmra.mrb[4].mxu0 %vm383_vm0, %v8383_v15  ;;  %v1708_v15 = vrot.slane %v1336_v9, 3  ;;  %v4865_v9 = vld [vmem:[%s8353_s2 + $0x18] sm:$0xff] }
  0xc4   : > { %6072 = vmatmul.mubr.msk.bf16.vlgmr.msra.gmra.mrb[0].mxu1 %vm383_vm0, %v1542_v59  ;;  %6328 = vmatpush3.bf16.msra.mxu0 %v6840_v63  ;;  %v1548_v63 = vsel %vm1537_vm6, %v1545_v21, %v1547_v27  ;;  %v1703_v59 = vrot.slane %v1701_v34, 3  ;;  %v6853_v21 = vld [vmem:[%s8352_s1 + $0x120] sm:$0xff]   ;;  %v4052_v34 = vld [vmem:[%s6987_s12 + $0x18] sm:$0xf] }
  0xc5   : > { %6084 = vmatpush3.bf16.msra.mxu1 %v6839_v6  ;;  %6075 = vmatprep.mubr.msk.bf16.mxu1 %vm383_vm0, %v1544_v26  ;;  %v6848_v6 = vld [vmem:[%s8352_s1 + $0x2a0] sm:$0xff]   ;;  %v1706_v26 = vrot.slane %v1704_v62, 4  ;;  %v1550_v62 = vsel %vm1537_vm6, %v1547_v27, %v1549_v28  ;;  %v6850_v27 = vld [vmem:[%s8352_s1 + $0x2a8] sm:$0xff]  }
  0xc6   : > { %6319 = vmatprep.mubr.msk.bf16.mxu0 %vm383_vm0, %v8384_v30  ;;  %6085 = vmatprep.subr.bf16.mxu1 %v6843_v17  ;;  %v1713_v30 = vrot.slane %v1348_v43, 4  ;;  %v1717_v43 = vrot.slane %v8385_v61, 4  ;;  %v6864_v61 = vld [vmem:[%s8352_s1 + $0x2c0] sm:$0xff]  }
  0xc7   : > { %6329 = vmatprep.subr.bf16.mxu0 %v6844_v7  ;;  %v1707_v0 = vor.u32 %v1706_v26, %v1703_v59  ;;  %4891 = vperm.xlu1 %6731, %v4865_v9   ;;  %v4871_v9 = vld [vmem:[%s8353_s2 + $0x48] sm:$0xff] }
  0xc8   : > { %6330 = vmatpush3.bf16.msra.mxu0 %v6844_v7  ;;  %v1710_v7 = vor.u32 %v1709_v2, %v1708_v15  ;;  %v4870_v15 = vld [vmem:[%s8353_s2 + $0x40] sm:$0xff]  ;;  %v6852_v2 = vld [vmem:[%s6987_s12 + $0x30] sm:$0xff]  }
  0xc9   : > { %6086 = vmatpush3.bf16.msra.mxu1 %v6843_v17  ;;  %6343 = vmatprep.subr.bf16.mxu0 %v6848_v6  ;;  %v4863_v17 = vld [vmem:[%s8353_s2 + $0x8] sm:$0xff] }
  0xca   : > { %6087 = vmatprep.subr.bf16.mxu1 %v6846_v40  ;;  %4881 = vperm.xlu0 %6730, %v4863_v17   ;;  %v1721_v17 = vrot.slane %v1366_v50, 4 }
  0xcb   : > { %6320 = vmatmul.mubr.msk.bf16.gmra.mrb[8].mxu0 %vm383_vm0, %v5530_v22  ;;  %v5573_v22 = vcombine.low %v4052_v34, %v7806_v53  ;;  %4901 = vperm.xlu1 %6731, %v4867_v52   ;;  %v4872_v52 = vld [vmem:[%s8353_s2 + $0x50] sm:$0xff] }
  0xcc   : > { %6076 = vmatmul.mubr.msk.bf16.gmra.mrb[4].mxu1 %vm383_vm0, %v1546_v19  ;;  %6331 = vmatprep.mubr.msk.bf16.mxu0 %vm383_vm0, %v6845_v10  ;;  %v1711_v19 = vsel %vm1699_vm7, %v1707_v0, %v1710_v7  ;;  %v6854_v10 = vld [vmem:[%s8352_s1 + $0x2b0] sm:$0xff]   ;;  %v1724_v0 = vrot.slane %v1372_v54, 3 }
  0xcd   : > { %6079 = vmatprep.mubr.msk.bf16.mxu1 %vm383_vm0, %v1548_v63  ;;  %6088 = vmatpush3.bf16.msra.mxu1 %v6846_v40  ;;  %v1712_v40 = vrot.slane %v1345_v37, 3  ;;  %v1716_v37 = vrot.slane %v1354_v11, 3  ;;  %v4868_v63 = vld [vmem:[%s8353_s2 + $0x30] sm:$0xff]  ;;  %v4110_v26 = vshll.u32 %v5573_v22, 16  ;;  %v4108_v50 = vshrl.u32 %v5573_v22, 16  ;;  %v6856_v22 = vld [vmem:[%s6987_s12 + $0x40] sm:$0xff]  }
  0xce   : > { %6089 = vmatprep.subr.bf16.mxu1 %v6849_v5  ;;  %4896 = vperm.xlu0 %6730, %v4866_v33   ;;  %v7964_v11 = vld [vmem:[%s6987_s12 + $0x34] sm:$0xf]  ;;  %v6855_v33 = vld [vmem:[%s6987_s12 + $0x38] sm:$0xff]  }
  0xcf   : > { %v1714_v47 = vor.u32 %v1713_v30, %v1712_v40  ;;  %v1718_v59 = vor.u32 %v1717_v43, %v1716_v37  ;;  %4911 = vperm.xlu1 %6731, %v4869_v31   ;;  %v5294_v28 = vcombine.low %v7964_v11, %v7964_v11  ;;  %v4123_v31 = vshll.u32 %v7817_v46, 16 }
  0xd1   : > { %6090 = vmatpush3.bf16.msra.mxu1 %v6849_v5  ;;  %v1720_v5 = vrot.slane %v1363_v45, 3  ;;  %v1719_v45 = vsel %vm1699_vm7, %v1714_v47, %v1718_v59  ;;  %v1729_v40 = vshrl.u32 %v5294_v28, 16  ;;  %v1732_v30 = vshll.u32 %v5294_v28, 16 }
  0xd2   : > { %6103 = vmatprep.subr.bf16.mxu1 %v6853_v21  ;;  %4906 = vperm.xlu0 %6730, %v4868_v63  }
  0xd3   : > { %6332 = vmatmul.mubr.msk.bf16.vlgmr.msra.gmra.mrb[0].mxu0 %vm383_vm0, %v6847_v29  ;;  %v4115_v29 = vshll.u32 %v7809_v57, 16  ;;  %4921 = vperm.xlu1 %6731, %v4871_v9   ;;  %v1722_v54 = vor.u32 %v1721_v17, %v1720_v5  ;;  %v1731_v63 = vrot.slane %v1729_v40, 3  ;;  %v4125_v17 = vrot.slane %v4123_v31, 1 }
  0xd4   : > { %6080 = vmatmul.mubr.msk.bf16.gmra.mrb[8].mxu1 %vm383_vm0, %v1550_v62  ;;  %6344 = vmatpush3.bf16.msra.mxu0 %v6848_v6  ;;  %v1715_v6 = vsel %vm1699_vm7, %v1710_v7, %v1714_v47  ;;  %v8386_v7 = vshll.u32 %v7650_v44, 16  ;;  %v4112_v62 = vrot.slane %v4110_v26, 1  ;;  %v6858_v44 = vld [vmem:[%s8352_s1 + $0x2b8] sm:$0xff]   ;;  %v1734_v47 = vrot.slane %v1732_v30, 4 }
  0xd5   : > { %6091 = vmatprep.mubr.msk.bf16.mxu1 %vm383_vm0, %v1711_v19  ;;  %6335 = vmatprep.mubr.msk.bf16.mxu0 %vm383_vm0, %v6851_v36  ;;  %v6862_v36 = vld [vmem:[%s8352_s1 + $0x130] sm:$0xff]   ;;  %v4117_v37 = vrot.slane %v4115_v29, 1  ;;  %v1723_v43 = vsel %vm1699_vm7, %v1718_v59, %v1722_v54  ;;  %v4119_v26 = vshrl.u32 %v7809_v57, 16  ;;  %v6865_v59 = vld [vmem:[%s8352_s1 + $0x138] sm:$0xff]   ;;  %v8387_v40 = vcombine.low %v7525_v38, %v7531_v35 }
  0xd6   : > { %6345 = vmatprep.subr.bf16.mxu0 %v6850_v27  ;;  %v1725_v34 = vrot.slane %v8386_v7, 4  ;;  %4916 = vperm.xlu0 %6730, %v4870_v15   ;;  %v1735_v5 = vor.u32 %v1734_v47, %v1731_v63  ;;  %v6871_v7 = vld [vmem:[%s8352_s1 + $0x140] sm:$0xff]   ;;  %v8388_v63 = vcombine.low %v7534_v39, %v7541_v48 }
  0xd7   : > { %v4121_v28 = vor.u32 %v4119_v26, %v4117_v37 }
  0xd8   : > { %6346 = vmatpush3.bf16.msra.mxu0 %v6850_v27  ;;  %v1726_v19 = vor.u32 %v1725_v34, %v1724_v0  ;;  %v4113_v27 = vor.u32 %v4112_v62, %v4108_v50  ;;  %v6866_v50 = vld [vmem:[%s8352_s1 + $0x2c8] sm:$0xff]  }
  0xd9   : > { %6347 = vmatprep.subr.bf16.mxu0 %v6854_v10 }
  0xda   : > { %4926 = vperm.xlu0 %6730, %v4872_v52   ;;  %v4118_v15 = vsel %vm306_vm1, %v4113_v27, %v4117_v37  ;;  %v1736_v34 = vsel %vm1699_vm7, %v1726_v19, %v1735_v5  ;;  %v4151_v37 = vshrl.u32 %v7858_v4, 16  ;;  %v4308_v5 = vrot.slane %v7809_v57, 1  ;;  %v6896_v57 = vld [vmem:[%s8352_s1 + $0x170] sm:$0xff]  }
  0xdb   : > { %6336 = vmatmul.mubr.msk.bf16.gmra.mrb[4].mxu0 %vm383_vm0, %v6852_v2  ;;  %v4131_v2 = vshll.u32 %v7822_v18, 16 }
  0xdc   : > { %6092 = vmatmul.mubr.msk.bf16.vlgmr.msra.gmra.mrb[0].mxu1 %vm383_vm0, %v1715_v6  ;;  %6348 = vmatpush3.bf16.msra.mxu0 %v6854_v10  ;;  %v1727_v10 = vsel %vm1699_vm7, %v1722_v54, %v1726_v19  ;;  %v4127_v6 = vshrl.u32 %v7817_v46, 16  ;;  %v4147_v54 = vshll.u32 %v7858_v4, 16  ;;  %v8062_v19 = vld [vmem:[%s6987_s12 + $0x48] ss:$0 sps:$4 sm:$0x11]  }
  0xdd   : > { %6104 = vmatpush3.bf16.msra.mxu1 %v6853_v21  ;;  %6095 = vmatprep.mubr.msk.bf16.mxu1 %vm383_vm0, %v1719_v45  ;;  %v4873_v21 = vld [vmem:[%s8353_s2 + $0x58] sm:$0xff]  ;;  %v4133_v0 = vrot.slane %v4131_v2, 1  ;;  %v4126_v45 = vsel %vm306_vm1, %v4121_v28, %v4125_v17 }
  0xde   : > { %6339 = vmatprep.mubr.msk.bf16.mxu0 %vm383_vm0, %v6855_v33  ;;  %6105 = vmatprep.subr.bf16.mxu1 %v6857_v56  ;;  %v4129_v9 = vor.u32 %v4127_v6, %v4125_v17  ;;  %v4135_v33 = vshrl.u32 %v7822_v18, 16  ;;  %v4149_v35 = vrot.slane %v4147_v54, 1  ;;  %v6884_v28 = vld [vmem:[%s8352_s1 + $0x158] sm:$0xff]  }
  0xdf   : > { %6349 = vmatprep.subr.bf16.mxu0 %v6858_v44  ;;  %4931 = vperm.xlu1 %6731, %v4873_v21   ;;  %v4294_v21 = vld [vmem:[%s6987_s12 + $0x18] sm:$0xe] }
  0xe0   : > { %6350 = vmatpush3.bf16.msra.mxu0 %v6858_v44  ;;  %v4134_v62 = vsel %vm306_vm1, %v4129_v9, %v4133_v0  ;;  %v4143_v44 = vshrl.u32 %v7825_v3, 16  ;;  %v4137_v30 = vor.u32 %v4135_v33, %v4133_v0  ;;  %v4153_v39 = vor.u32 %v4151_v37, %v4149_v35 }
  0xe1   : > { %6106 = vmatpush3.bf16.msra.mxu1 %v6857_v56  ;;  %6363 = vmatprep.subr.bf16.mxu0 %v6864_v61  ;;  %v4139_v56 = vshll.u32 %v7825_v3, 16  ;;  %v8390_v9 = vcombine.low %v7550_v42, %v7561_v32  ;;  %v8391_v0 = vcombine.low %v7570_v55, %v7575_v14  ;;  %v6888_v42 = vld [vmem:[%s8352_s1 + $0x160] sm:$0xff]   ;;  %v5318_v32 = vcombine.low %v7633_v20, %v7964_v11  ;;  %v6885_v55 = vld [vmem:[%s8352_s1 + $0x2e8] sm:$0xff]   ;;  %v6889_v11 = vld [vmem:[%s8352_s1 + $0x2f0] sm:$0xff]  }
  0xe2   : > { %6107 = vmatprep.subr.bf16.mxu1 %v6862_v36  ;;  %v4314_v20 = vrot.slane %v7825_v3, 1  ;;  %v4493_v3 = vrot.slane %v4147_v54, 2  ;;  %v6901_v54 = vld [vmem:[%s8352_s1 + $0x310] sm:$0xff]  }
  0xe3   : > { %6340 = vmatmul.mubr.msk.bf16.gmra.mrb[8].mxu0 %vm383_vm0, %v6856_v22  ;;  %v4141_v52 = vrot.slane %v4139_v56, 1  ;;  %v5598_v22 = vcombine.low %v4294_v21, %v7806_v53  ;;  %v6882_v53 = vld [vmem:[%s8352_s1 + $0x150] sm:$0xff]  }
  0xe4   : > { %6096 = vmatmul.mubr.msk.bf16.gmra.mrb[4].mxu1 %vm383_vm0, %v1723_v43  ;;  %6351 = vmatprep.mubr.msk.bf16.mxu0 %vm383_vm0, %v4118_v15  ;;  %v6877_v43 = vld [vmem:[%s8352_s1 + $0x148] sm:$0xff]   ;;  %v8389_v15 = vcombine.low %v7544_v51, %v7547_v1  ;;  %v6883_v1 = vld [vmem:[%s8352_s1 + $0x2e0] sm:$0xff]   ;;  %v6907_v21 = vld [vmem:[%s6987_s12 + $0x10] sm:$0xf] }
  0xe5   : > { %6099 = vmatprep.mubr.msk.bf16.mxu1 %vm383_vm0, %v1727_v10  ;;  %6108 = vmatpush3.bf16.msra.mxu1 %v6862_v36  ;;  %v6872_v36 = vld [vmem:[%s8352_s1 + $0x2d0] sm:$0xff]   ;;  %v4145_v38 = vor.u32 %v4143_v44, %v4141_v52  ;;  %v4142_v27 = vsel %vm306_vm1, %v4137_v30, %v4141_v52  ;;  %v6878_v10 = vld [vmem:[%s8352_s1 + $0x2d8] sm:$0xff]   ;;  %v2208_v30 = vld [vmem:[%s6987_s12 + $0xc] sm:$0xf] }
  0xe6   : > { %6109 = vmatprep.subr.bf16.mxu1 %v6865_v59  ;;  %v6887_v52 = vld [vmem:[%s6987_s12 + $0x14] sm:$0xff]  }
  0xe7   : > { %v4150_v47 = vsel %vm306_vm1, %v4145_v38, %v4149_v35  ;;  %v6890_v35 = vld [vmem:[%s6987_s12 + $0x1c] sm:$0xff]  }
  0xe9   : > { %6110 = vmatpush3.bf16.msra.mxu1 %v6865_v59  ;;  %v4307_v59 = vrot.slane %v5598_v22, 1 }
  0xea   : > { %6123 = vmatprep.subr.bf16.mxu1 %v6871_v7 }
  0xeb   : > { %6352 = vmatmul.mubr.msk.bf16.vlgmr.msra.gmra.mrb[0].mxu0 %vm383_vm0, %v4126_v45  ;;  %v4309_v17 = vsel %vm613_vm2, %v4307_v59, %v4308_v5  ;;  %v6886_v45 = vld [vmem:[%s6987_s12 + $0xc] sm:$0xff]   ;;  %v6891_v59 = vld [vmem:[%s6987_s12 + $0x24] sm:$0xff]  }
  0xec   : > { %6100 = vmatmul.mubr.msk.bf16.gmra.mrb[8].mxu1 %vm383_vm0, %v1736_v34  ;;  %6364 = vmatpush3.bf16.msra.mxu0 %v6864_v61  ;;  %v4155_v61 = vshll.u32 %v8062_v19, 16  ;;  %v4312_v34 = vrot.slane %v7822_v18, 1 }
  0xed   : > { %6111 = vmatprep.mubr.msk.bf16.mxu1 %vm383_vm0, %v8387_v40  ;;  %6355 = vmatprep.mubr.msk.bf16.mxu0 %vm383_vm0, %v4134_v62  ;;  %v4469_v62 = vshrl.u32 %v5598_v22, 16  ;;  %v4472_v40 = vshll.u32 %v5598_v22, 16  ;;  %v4476_v22 = vrot.slane %v4119_v26, 1  ;;  %v4318_v26 = vrot.slane %v8062_v19, 1  ;;  %v6894_v19 = vld [vmem:[%s6987_s12 + $0x2c] sm:$0xff]  }
  0xee   : > { %6365 = vmatprep.subr.bf16.mxu0 %v6866_v50  ;;  %v4157_v48 = vrot.slane %v4155_v61, 1  ;;  %v4315_v38 = vsel %vm613_vm2, %v4312_v34, %v4314_v20  ;;  %v6892_v61 = vld [vmem:[%s8352_s1 + $0x168] sm:$0xff]  }
  0xf0   : > { %6366 = vmatpush3.bf16.msra.mxu0 %v6866_v50  ;;  %v4158_v51 = vsel %vm306_vm1, %v4153_v39, %v4157_v48 }
  0xf1   : > { %6367 = vmatprep.subr.bf16.mxu0 %v6872_v36 }
  0xf3   : > { %6356 = vmatmul.mubr.msk.bf16.gmra.mrb[4].mxu0 %vm383_vm0, %v4142_v27  ;;  %v5361_v27 = vcombine.low %v2208_v30, %v6907_v21 }
  0xf4   : > { %6112 = vmatmul.mubr.msk.bf16.vlgmr.msra.gmra.mrb[0].mxu1 %vm383_vm0, %v8388_v63  ;;  %6368 = vmatpush3.bf16.msra.mxu0 %v6872_v36  ;;  %v4316_v36 = vrot.slane %v7858_v4, 1  ;;  %v4474_v63 = vrot.slane %v4472_v40, 2  ;;  %v8394_v40 = vshll.u32 %v7023_v24, 16 }
  0xf5   : > { %6124 = vmatpush3.bf16.msra.mxu1 %v6871_v7  ;;  %6115 = vmatprep.mubr.msk.bf16.mxu1 %vm383_vm0, %v8389_v15  ;;  %v4310_v7 = vrot.slane %v7817_v46, 1  ;;  %v6893_v15 = vld [vmem:[%s8352_s1 + $0x2f8] sm:$0xff]  }
  0xf6   : > { %6359 = vmatprep.mubr.msk.bf16.mxu0 %vm383_vm0, %v4150_v47  ;;  %6125 = vmatprep.subr.bf16.mxu1 %v6877_v43  ;;  %v4477_v47 = vrot.slane %v4115_v29, 2  ;;  %v2266_v29 = vshll.u32 %v5361_v27, 16  ;;  %v2281_v30 = vrot.slane %v8394_v40, 1 }
  0xf7   : > { %6369 = vmatprep.subr.bf16.mxu0 %v6878_v10  ;;  %v4311_v14 = vsel %vm613_vm2, %v4308_v5, %v4310_v7  ;;  %v4313_v50 = vsel %vm613_vm2, %v4310_v7, %v4312_v34  ;;  %v4480_v5 = vrot.slane %v4127_v6, 1  ;;  %v4484_v6 = vrot.slane %v4135_v33, 1 }
  0xf8   : > { %6370 = vmatpush3.bf16.msra.mxu0 %v6878_v10  ;;  %v4317_v10 = vsel %vm613_vm2, %v4314_v20, %v4316_v36  ;;  %v4478_v48 = vor.u32 %v4477_v47, %v4476_v22  ;;  %v4485_v7 = vrot.slane %v4131_v2, 2  ;;  %v8392_v34 = vshll.u32 %v7003_v12, 16 }
  0xf9   : > { %6126 = vmatpush3.bf16.msra.mxu1 %v6877_v43  ;;  %6383 = vmatprep.subr.bf16.mxu0 %v6883_v1  ;;  %v4471_v43 = vrot.slane %v4469_v62, 1 }
  0xfa   : > { %6127 = vmatprep.subr.bf16.mxu1 %v6882_v53  ;;  %v4486_v33 = vor.u32 %v4485_v7, %v4484_v6 }
  0xfb   : > { %6360 = vmatmul.mubr.msk.bf16.gmra.mrb[8].mxu0 %vm383_vm0, %v4158_v51  ;;  %v4475_v39 = vor.u32 %v4474_v63, %v4471_v43  ;;  %v4481_v51 = vrot.slane %v4123_v31, 2 }
  0xfc   : > { %6116 = vmatmul.mubr.msk.bf16.gmra.mrb[4].mxu1 %vm383_vm0, %v8390_v9  ;;  %6371 = vmatprep.mubr.msk.bf16.mxu0 %vm383_vm0, %v4309_v17  ;;  %v2264_v17 = vshrl.u32 %v5361_v27, 16 }
  0xfd   : > { %6119 = vmatprep.mubr.msk.bf16.mxu1 %vm383_vm0, %v8391_v0  ;;  %6128 = vmatpush3.bf16.msra.mxu1 %v6882_v53  ;;  %v6897_v53 = vld [vmem:[%s8352_s1 + $0x300] sm:$0xff]   ;;  %v4479_v9 = vsel %vm775_vm3, %v4475_v39, %v4478_v48  ;;  %v6898_v0 = vld [vmem:[%s8352_s1 + $0x178] sm:$0xff]   ;;  %v4482_v46 = vor.u32 %v4481_v51, %v4480_v5  ;;  %v8400_v5 = vshll.u32 %v7160_v60, 16 }
  0xfe   : > { %6129 = vmatprep.subr.bf16.mxu1 %v6884_v28  ;;  %v6905_v39 = vld [vmem:[%s6987_s12 + $0x3c] ss:$0 sps:$4 sm:$0x11]  }
  0xff   : > { %v4483_v18 = vsel %vm775_vm3, %v4478_v48, %v4482_v46  ;;  %v4487_v20 = vsel %vm775_vm3, %v4482_v46, %v4486_v33  ;;  %v2311_v51 = vshll.u32 %v6905_v39, 16  ;;  %v6911_v46 = vld [vmem:[%s6987_s12 + $0x34] sm:$0xff]  }
 0x101   : > { %6130 = vmatpush3.bf16.msra.mxu1 %v6884_v28  ;;  %v2268_v28 = vrot.slane %v2266_v29, 1  ;;  %v2313_v7 = vrot.slane %v2311_v51, 1 }
 0x102   : > { %6143 = vmatprep.subr.bf16.mxu1 %v6888_v42 }
 0x103   : > { %6372 = vmatmul.mubr.msk.bf16.vlgmr.msra.gmra.mrb[0].mxu0 %vm383_vm0, %v4311_v14  ;;  %v2269_v31 = vor.u32 %v2268_v28, %v2264_v17  ;;  %v4489_v14 = vrot.slane %v4139_v56, 2  ;;  %v8393_v56 = vshrl.u32 %v7003_v12, 16  ;;  %v8395_v12 = vshrl.u32 %v7023_v24, 16  ;;  %v6903_v24 = vld [vmem:[%s8352_s1 + $0x318] sm:$0xff]  }
 0x104   : > { %6120 = vmatmul.mubr.msk.bf16.gmra.mrb[8].mxu1 %vm383_vm0, %v5318_v32  ;;  %6384 = vmatpush3.bf16.msra.mxu0 %v6883_v1  ;;  %v4319_v1 = vsel %vm613_vm2, %v4316_v36, %v4318_v26  ;;  %v6895_v32 = vld [vmem:[%s6987_s12 + $0x34] sm:$0xff]  }
 0x105   : > { %6131 = vmatprep.mubr.msk.bf16.mxu1 %vm383_vm0, %v6886_v45  ;;  %6375 = vmatprep.mubr.msk.bf16.mxu0 %vm383_vm0, %v4313_v50  ;;  %v4488_v45 = vrot.slane %v4143_v44, 1  ;;  %v6899_v50 = vld [vmem:[%s8352_s1 + $0x308] sm:$0xff]   ;;  %v4492_v44 = vrot.slane %v4151_v37, 1 }
 0x106   : > { %6385 = vmatprep.subr.bf16.mxu0 %v6885_v55 }
 0x107   : > { %v4494_v27 = vor.u32 %v4493_v3, %v4492_v44 }
 0x108   : > { %6386 = vmatpush3.bf16.msra.mxu0 %v6885_v55  ;;  %v8195_v55 = vld [vmem:[%s6987_s12 + $0x48] ss:$0 sps:$4 sm:$0x33]   ;;  %s6720_s12 = smul.u32 48, %s8404_s19 }
 0x109   : > { %6387 = vmatprep.subr.bf16.mxu0 %v6889_v11  ;;  %v4497_v36 = vshrl.u32 %v8195_v55, 16  ;;  %v4500_v37 = vshll.u32 %v8195_v55, 16 }
 0x10a   : > { %s8290_s13 = scalar_lea.vmem %s8354_s3, %s6720_s12 }
 0x10b   : > { %6376 = vmatmul.mubr.msk.bf16.gmra.mrb[4].mxu0 %vm383_vm0, %v4315_v38  ;;  %v2285_v38 = vor.u32 %v8395_v12, %v2281_v30  ;;  %v4499_v63 = vrot.slane %v4497_v36, 1  ;;  %v4502_v22 = vrot.slane %v4500_v37, 2 }
 0x10c   : > { %6132 = vmatmul.mubr.msk.bf16.vlgmr.msra.gmra.mrb[0].mxu1 %vm383_vm0, %v6887_v52  ;;  %6388 = vmatpush3.bf16.msra.mxu0 %v6889_v11  ;;  %v6908_v11 = vld [vmem:[%s8352_s1 + $0x180] sm:$0xff]   ;;  %v4490_v52 = vor.u32 %v4489_v14, %v4488_v45 }
 0x10d   : > { %6144 = vmatpush3.bf16.msra.mxu1 %v6888_v42  ;;  %6135 = vmatprep.mubr.msk.bf16.mxu1 %vm383_vm0, %v6890_v35  ;;  %v2273_v42 = vrot.slane %v8392_v34, 1  ;;  %v8396_v35 = vshll.u32 %v7052_v41, 16  ;;  %v4503_v48 = vor.u32 %v4502_v22, %v4499_v63  ;;  %v6912_v34 = vld [vmem:[%s8352_s1 + $0x198] sm:$0xff]  }
 0x10e   : > { %6379 = vmatprep.mubr.msk.bf16.mxu0 %vm383_vm0, %v4317_v10  ;;  %6145 = vmatprep.subr.bf16.mxu1 %v6892_v61  ;;  %v4491_v43 = vsel %vm775_vm3, %v4486_v33, %v4490_v52  ;;  %v4495_v10 = vsel %vm775_vm3, %v4490_v52, %v4494_v27  ;;  %v8402_v33 = vrot.slane %v7062_v49, 1 }
 0x10f   : > { %6389 = vmatprep.subr.bf16.mxu0 %v6893_v15  ;;  %v2274_v2 = vsel %vm306_vm1, %v2269_v31, %v2273_v42  ;;  %v2277_v62 = vor.u32 %v8393_v56, %v2273_v42  ;;  %v2289_v21 = vrot.slane %v8396_v35, 1  ;;  %v4504_v17 = vsel %vm775_vm3, %v4494_v27, %v4503_v48 }
 0x110   : > { %6390 = vmatpush3.bf16.msra.mxu0 %v6893_v15  ;;  %v8397_v15 = vshll.u32 %v7062_v49, 16  ;;  %v2472_v31 = vrot.slane %v6911_v46, 1 }
 0x111   : > { %6146 = vmatpush3.bf16.msra.mxu1 %v6892_v61  ;;  %6403 = vmatprep.subr.bf16.mxu0 %v6897_v53  ;;  %v2282_v61 = vsel %vm306_vm1, %v2277_v62, %v2281_v30  ;;  %v2290_v47 = vsel %vm306_vm1, %v2285_v38, %v2289_v21 }
 0x112   : > { %6147 = vmatprep.subr.bf16.mxu1 %v6896_v57  ;;  %v2297_v26 = vrot.slane %v8397_v15, 1 }
 0x113   : > { %6380 = vmatmul.mubr.msk.bf16.gmra.mrb[8].mxu0 %vm383_vm0, %v4319_v1  ;;  %v6909_v1 = vld [vmem:[%s8352_s1 + $0x188] sm:$0xff]  }
 0x114   : > { %6136 = vmatmul.mubr.msk.bf16.gmra.mrb[4].mxu1 %vm383_vm0, %v6891_v59  ;;  %6391 = vmatprep.mubr.msk.bf16.mxu0 %vm383_vm0, %v4479_v9  ;;  %v6910_v9 = vld [vmem:[%s8352_s1 + $0x190] sm:$0xff]  }
 0x115   : > { %6139 = vmatprep.mubr.msk.bf16.mxu1 %vm383_vm0, %v6894_v19  ;;  %6148 = vmatpush3.bf16.msra.mxu1 %v6896_v57  ;;  %v8398_v57 = vshrl.u32 %v7052_v41, 16  ;;  %v2305_v19 = vrot.slane %v8400_v5, 1 }
 0x116   : > { %6149 = vmatprep.subr.bf16.mxu1 %v6898_v0 }
 0x117   : > { %v2293_v29 = vor.u32 %v8398_v57, %v2289_v21 }
 0x119   : > { %6150 = vmatpush3.bf16.msra.mxu1 %v6898_v0  ;;  %v2298_v41 = vsel %vm306_vm1, %v2293_v29, %v2297_v26  ;;  %v8401_v0 = vshrl.u32 %v7160_v60, 16  ;;  %v2473_v60 = vsel %vm613_vm2, %v8402_v33, %v2472_v31 }
 0x11a   : > { %6423 = vmatprep.subr.bf16.mxu1 %v6908_v11 }
 0x11b   : > { %6392 = vmatmul.mubr.msk.bf16.vlgmr.msra.gmra.mrb[0].mxu0 %vm383_vm0, %v4483_v18  ;;  %v2309_v6 = vor.u32 %v8401_v0, %v2305_v19 }
 0x11c   : > { %6140 = vmatmul.mubr.msk.bf16.gmra.mrb[8].mxu1 %vm383_vm0, %v6895_v32  ;;  %6404 = vmatpush3.bf16.msra.mxu0 %v6897_v53  ;;  %v8399_v53 = vshrl.u32 %v7062_v49, 16  ;;  %v4664_v49 = vrot.slane %v8195_v55, 2 }
 0x11d   : > { %6151 = vmatprep.mubr.msk.bf16.mxu1 %vm383_vm0, %v2274_v2  ;;  %6395 = vmatprep.mubr.msk.bf16.mxu0 %vm383_vm0, %v4487_v20  ;;  %v2314_v42 = vsel %vm306_vm1, %v2309_v6, %v2313_v7 }
 0x11e   : > { %6405 = vmatprep.subr.bf16.mxu0 %v6899_v50  ;;  %v2301_v59 = vor.u32 %v8399_v53, %v2297_v26 }
 0x120   : > { %6406 = vmatpush3.bf16.msra.mxu0 %v6899_v50  ;;  %v2306_v28 = vsel %vm306_vm1, %v2301_v59, %v2305_v19 }
 0x121   : > { %6407 = vmatprep.subr.bf16.mxu0 %v6901_v54 }
 0x123   : > { %6396 = vmatmul.mubr.msk.bf16.gmra.mrb[4].mxu0 %vm383_vm0, %v4491_v43 }
 0x124   : > { %6152 = vmatmul.mubr.msk.bf16.vlgmr.msra.gmra.mrb[0].mxu1 %vm383_vm0, %v2282_v61  ;;  %6408 = vmatpush3.bf16.msra.mxu0 %v6901_v54 }
 0x125   : > { %6427 = vmatpush3.bf16.msra.mxu1 %v6908_v11  ;;  %6155 = vmatprep.mubr.msk.bf16.mxu1 %vm383_vm0, %v2290_v47 }
 0x126   : > { %6399 = vmatprep.mubr.msk.bf16.mxu0 %vm383_vm0, %v4495_v10  ;;  %6409 = vmatprep.subr.bf16.mxu0 %v6903_v24 }
 0x127   : > { %6424 = vmatprep.subr.bf16.mxu1 %v6909_v1 }
 0x128   : > { %6410 = vmatpush3.bf16.msra.mxu0 %v6903_v24 }
 0x129   : > { %6428 = vmatpush3.bf16.msra.mxu1 %v6909_v1 }
 0x12a   : > { %6425 = vmatprep.subr.bf16.mxu1 %v6910_v9 }
 0x12b   : > { %6400 = vmatmul.mubr.msk.bf16.gmra.mrb[8].mxu0 %vm383_vm0, %v4504_v17 }
 0x12c   : > { %6156 = vmatmul.mubr.msk.bf16.gmra.mrb[4].mxu1 %vm383_vm0, %v2298_v41  ;;  %6411 = vmatprep.mubr.msk.bf16.mxu0 %vm383_vm0, %v7833_v8  ;;  %v2474_v8 = vrot.slane %v6905_v39, 1 }
 0x12d   : > { %6159 = vmatprep.mubr.msk.bf16.mxu1 %vm383_vm0, %v2306_v28  ;;  %6429 = vmatpush3.bf16.msra.mxu1 %v6910_v9 }
 0x12e   : > { %6426 = vmatprep.subr.bf16.mxu1 %v6912_v34  ;;  %v2475_v32 = vsel %vm613_vm2, %v2472_v31, %v2474_v8 }
 0x131   : > { %6430 = vmatpush3.bf16.msra.mxu1 %v6912_v34 }
 0x133   : > { %6412 = vmatmul.mubr.msk.bf16.vlgmr.msra.gmra.mrb[0].mxu0 %vm383_vm0, %v7839_v23  ;;  %v4665_v23 = vsel %vm961_vm4, %v4662_v58, %v4664_v49 }
 0x134   : > { %6160 = vmatmul.mubr.msk.bf16.gmra.mrb[8].mxu1 %vm383_vm0, %v2314_v42  ;;  %6415 = vmatprep.mubr.msk.bf16.mxu0 %vm383_vm0, %v7848_v13 }
 0x135   : > { %6179 = vmatprep.mubr.msk.bf16.mxu1 %vm383_vm0, %v2473_v60 }
 0x13b   : > { %6416 = vmatmul.mubr.msk.bf16.gmra.mrb[4].mxu0 %vm383_vm0, %v7851_v16 }
 0x13c   : > { %6419 = vmatprep.mubr.msk.bf16.mxu0 %vm383_vm0, %v7869_v25 }
 0x13e   : > { %v4877_v45 = vpop.permute.xlu0 %4876 }
 0x13f   : > { %v4887_v50 = vpop.permute.xlu1 %4886 }
 0x140   : > { %6180 = vmatmul.mubr.msk.bf16.vlgmr.msra.gmra.mrb[8].mxu1 %vm383_vm0, %v2475_v32 }
 0x143   : > { %6420 = vmatmul.mubr.msk.bf16.gmra.mrb[8].mxu0 %vm383_vm0, %v4665_v23 }
 0x146   : > { %v4892_v44 = vpop.permute.xlu1 %4891 }
 0x149   : > { %v4882_v55 = vpop.permute.xlu0 %4881 }
 0x14a   : > { %v4902_v54 = vpop.permute.xlu1 %4901 }
 0x14d   : > { %v4897_v40 = vpop.permute.xlu0 %4896 }
 0x14e   : > { %v4912_v59 = vpop.permute.xlu1 %4911 }
 0x151   : > { %v4907_v26 = vpop.permute.xlu0 %4906 }
 0x1f7   : > { %v6153_v13 = vpop.f32.mrb[0].mxu1 }
 0x1f8   : > { %v2391_v18 = vpop.f32.mrb[1].mxu1 }
 0x1f9   : > { %v6154_v2 = vpop.f32.mrb[2].mxu1 }
 0x1fa   : > { %v2394_v16 = vpop.f32.mrb[3].mxu1 }
 0x1ff   : > { %v6157_v14 = vpop.f32.mrb[4].mxu1 }
 0x200   : > { %v2407_v20 = vpop.f32.mrb[5].mxu1 }
 0x201   : > { %v6158_v25 = vpop.f32.mrb[6].mxu1 }
 0x202   : > { %v2410_v11 = vpop.f32.mrb[7].mxu1 }
 0x206   : > { %v6413_v3 = vpop.f32.mrb[0].mxu0 }
 0x207   : > { %v6431_v56 = vadd.f32 %v6413_v3, %v6153_v13  ;;  %v4742_v4 = vpop.f32.mrb[1].mxu0  ;;  %v4922_v3 = vpop.permute.xlu1 %4921 }
 0x208   : > { %v6432_v58 = vadd.f32 %v4742_v4, %v2391_v18  ;;  %v6414_v62 = vpop.f32.mrb[2].mxu0 }
 0x209   : > { %v5663_v30 = vpack.c.bf16 %v6431_v56, %v6431_v56  ;;  %v4936_v52 = vmul.f32 %v6431_v56, %v4887_v50  ;;  %v6433_v36 = vadd.f32 %v6414_v62, %v6154_v2  ;;  %v4745_v37 = vpop.f32.mrb[3].mxu0 }
 0x20a   : > { %v5661_v12 = vpack.c.bf16 %v6432_v58, %v6432_v58  ;;  %v4934_v38 = vmul.f32 %v6432_v58, %v4877_v45  ;;  %v6434_v35 = vadd.f32 %v4745_v37, %v2394_v16  ;;  %v4917_v45 = vpop.permute.xlu0 %4916 }
 0x20b   : > { %4852 = vst.msk [vmem:[%s8290_s13 + $0x8] sm:$0xf] %vm4849_vm8, %v5663_v30  ;;  %v4979_v21 = vmul.f32 %v6431_v56, %v4936_v52  ;;  %v5664_v27 = vpack.c.bf16 %v6433_v36, %v6433_v36  ;;  %v4937_v43 = vmul.f32 %v6433_v36, %v4892_v44  ;;  %v4949_v57 = vsel %vm383_vm0, %v4936_v52, 0.0 }
 0x20c   : > { %4850 = vst.msk [vmem:[%s8290_s13] sm:$0xf] %vm4849_vm8, %v5661_v12  ;;  %v4977_v61 = vmul.f32 %v6432_v58, %v4934_v38  ;;  %v5662_v63 = vpack.c.bf16 %v6434_v35, %v6434_v35  ;;  %v4935_v22 = vmul.f32 %v6434_v35, %v4882_v55  ;;  %v4946_v47 = vsel %vm383_vm0, %v4934_v38, 0.0 }
 0x20d   : > { %4853 = vst.msk [vmem:[%s8290_s13 + $0xc] sm:$0xf] %vm4849_vm8, %v5664_v27  ;;  %v4992_v29 = vsel %vm383_vm0, %v4979_v21, 0.0  ;;  %v4980_v19 = vmul.f32 %v6433_v36, %v4937_v43  ;;  %v4951_v17 = vsel %vm383_vm0, %v4937_v43, 0.0 }
 0x20e   : > { %4851 = vst.msk [vmem:[%s8290_s13 + $0x4] sm:$0xf] %vm4849_vm8, %v5662_v63  ;;  %v4947_v24 = vsel %vm383_vm0, %v4935_v22, 0.0  ;;  %v4978_v10 = vmul.f32 %v6434_v35, %v4935_v22  ;;  %v6417_v15 = vpop.f32.mrb[4].mxu0  ;;  %v4989_v5 = vsel %vm383_vm0, %v4977_v61, 0.0  ;;  %v4927_v22 = vpop.permute.xlu0 %4926 }
 0x20f   : > { %v4948_v39 = vadd.f32 %v4947_v24, %v4946_v47  ;;  %v6435_v48 = vadd.f32 %v6417_v15, %v6157_v14  ;;  %v4758_v53 = vpop.f32.mrb[5].mxu0  ;;  %v4994_v23 = vsel %vm383_vm0, %v4980_v19, 0.0 }
 0x210   : > { %v4990_v1 = vsel %vm383_vm0, %v4978_v10, 0.0  ;;  %v6436_v41 = vadd.f32 %v4758_v53, %v2407_v20  ;;  %v6418_v51 = vpop.f32.mrb[6].mxu0 }
 0x211   : > { %v4950_v28 = vadd.f32 %v4949_v57, %v4948_v39  ;;  %v4991_v9 = vadd.f32 %v4990_v1, %v4989_v5  ;;  %v5667_v0 = vpack.c.bf16 %v6435_v48, %v6435_v48  ;;  %v4761_v6 = vpop.f32.mrb[7].mxu0  ;;  %v6437_v34 = vadd.f32 %v6418_v51, %v6158_v25 }
 0x212   : > { %v5665_v46 = vpack.c.bf16 %v6436_v41, %v6436_v41  ;;  %v4938_v31 = vmul.f32 %v6436_v41, %v4897_v40  ;;  %v6438_v42 = vadd.f32 %v4761_v6, %v2410_v11  ;;  %v4940_v8 = vmul.f32 %v6435_v48, %v4907_v26 }
 0x213   : > { %v6181_v7 = vpop.f32.mrb[8].mxu1  ;;  %v4993_v60 = vadd.f32 %v4992_v29, %v4991_v9  ;;  %4856 = vst.msk [vmem:[%s8290_s13 + $0x18] sm:$0xf] %vm4849_vm8, %v5667_v0  ;;  %v4952_v32 = vadd.f32 %v4951_v17, %v4950_v28  ;;  %v5668_v2 = vpack.c.bf16 %v6437_v34, %v6437_v34  ;;  %v4941_v20 = vmul.f32 %v6437_v34, %v4912_v59 }
 0x214   : > { %v2584_v33 = vpop.f32.mrb[9].mxu1  ;;  %4854 = vst.msk [vmem:[%s8290_s13 + $0x10] sm:$0xf] %vm4849_vm8, %v5665_v46  ;;  %v4953_v13 = vsel %vm383_vm0, %v4938_v31, 0.0  ;;  %v4981_v18 = vmul.f32 %v6436_v41, %v4938_v31  ;;  %v5666_v25 = vpack.c.bf16 %v6438_v42, %v6438_v42  ;;  %v4939_v55 = vmul.f32 %v6438_v42, %v4902_v54 }
 0x215   : > { %v6182_v49 = vpop.f32.mrb[10].mxu1  ;;  %v4954_v14 = vadd.f32 %v4953_v13, %v4952_v32  ;;  %v4995_v50 = vadd.f32 %v4994_v23, %v4993_v60  ;;  %4857 = vst.msk [vmem:[%s8290_s13 + $0x1c] sm:$0xf] %vm4849_vm8, %v5668_v2  ;;  %v4983_v56 = vmul.f32 %v6435_v48, %v4940_v8  ;;  %v4957_v40 = vsel %vm383_vm0, %v4940_v8, 0.0  ;;  %v4932_v48 = vpop.permute.xlu1 %4931 }
 0x216   : > { %v2587_v16 = vpop.f32.mrb[11].mxu1  ;;  %v4996_v11 = vsel %vm383_vm0, %v4981_v18, 0.0  ;;  %v6421_v44 = vpop.f32.mrb[8].mxu0  ;;  %4855 = vst.msk [vmem:[%s8290_s13 + $0x14] sm:$0xf] %vm4849_vm8, %v5666_v25  ;;  %v4955_v30 = vsel %vm383_vm0, %v4939_v55, 0.0  ;;  %v4982_v52 = vmul.f32 %v6438_v42, %v4939_v55  ;;  %v4984_v12 = vmul.f32 %v6437_v34, %v4941_v20 }
 0x217   : > { %v4997_v4 = vadd.f32 %v4996_v11, %v4995_v50  ;;  %v6439_v58 = vadd.f32 %v6421_v44, %v6181_v7  ;;  %v4774_v62 = vpop.f32.mrb[9].mxu0  ;;  %v4956_v38 = vadd.f32 %v4955_v30, %v4954_v14  ;;  %v5000_v47 = vsel %vm383_vm0, %v4983_v56, 0.0 }
 0x218   : > { %v6440_v36 = vadd.f32 %v4774_v62, %v2584_v33  ;;  %v6422_v37 = vpop.f32.mrb[10].mxu0  ;;  %v4998_v27 = vsel %vm383_vm0, %v4982_v52, 0.0  ;;  %v4959_v24 = vsel %vm383_vm0, %v4941_v20, 0.0  ;;  %v5002_v19 = vsel %vm383_vm0, %v4984_v12, 0.0 }
 0x219   : > { %v5671_v54 = vpack.c.bf16 %v6439_v58, %v6439_v58  ;;  %v6441_v35 = vadd.f32 %v6422_v37, %v6182_v49  ;;  %v4777_v21 = vpop.f32.mrb[11].mxu0  ;;  %v4958_v10 = vadd.f32 %v4957_v40, %v4956_v38  ;;  %v4999_v15 = vadd.f32 %v4998_v27, %v4997_v4 }
 0x21a   : > { %v5669_v61 = vpack.c.bf16 %v6440_v36, %v6440_v36  ;;  %v4942_v43 = vmul.f32 %v6440_v36, %v4917_v45  ;;  %v6442_v63 = vadd.f32 %v4777_v21, %v2587_v16  ;;  %v4944_v26 = vmul.f32 %v6439_v58, %v4927_v22 }
 0x21b   : > { %4860 = vst.msk [vmem:[%s8290_s13 + $0x28] sm:$0xf] %vm4849_vm8, %v5671_v54  ;;  %v5672_v39 = vpack.c.bf16 %v6441_v35, %v6441_v35  ;;  %v5001_v53 = vadd.f32 %v5000_v47, %v4999_v15  ;;  %v4960_v59 = vadd.f32 %v4959_v24, %v4958_v10  ;;  %v4945_v41 = vmul.f32 %v6441_v35, %v4932_v48 }
 0x21c   : > { %4858 = vst.msk [vmem:[%s8290_s13 + $0x20] sm:$0xf] %vm4849_vm8, %v5669_v61  ;;  %v4961_v57 = vsel %vm383_vm0, %v4942_v43, 0.0  ;;  %v4985_v29 = vmul.f32 %v6440_v36, %v4942_v43  ;;  %v5670_v5 = vpack.c.bf16 %v6442_v63, %v6442_v63  ;;  %v4943_v51 = vmul.f32 %v6442_v63, %v4922_v3 }
 0x21d   : > { %4861 = vst.msk [vmem:[%s8290_s13 + $0x2c] sm:$0xf] %vm4849_vm8, %v5672_v39  ;;  %v4962_v17 = vadd.f32 %v4961_v57, %v4960_v59  ;;  %v5003_v28 = vadd.f32 %v5002_v19, %v5001_v53  ;;  %v4987_v9 = vmul.f32 %v6439_v58, %v4944_v26  ;;  %v4965_v31 = vsel %vm383_vm0, %v4944_v26, 0.0 }
 0x21e   : > { %v5004_v1 = vsel %vm383_vm0, %v4985_v29, 0.0  ;;  %4859 = vst.msk [vmem:[%s8290_s13 + $0x24] sm:$0xf] %vm4849_vm8, %v5670_v5  ;;  %v4963_v0 = vsel %vm383_vm0, %v4943_v51, 0.0  ;;  %v4986_v6 = vmul.f32 %v6442_v63, %v4943_v51  ;;  %v4988_v34 = vmul.f32 %v6441_v35, %v4945_v41 }
 0x21f   : > { %v5005_v7 = vadd.f32 %v5004_v1, %v5003_v28  ;;  %v4964_v46 = vadd.f32 %v4963_v0, %v4962_v17  ;;  %v5008_v8 = vsel %vm383_vm0, %v4987_v9, 0.0  ;;  %v4967_v32 = vsel %vm383_vm0, %v4945_v41, 0.0 }
 0x220   : > { %v5006_v42 = vsel %vm383_vm0, %v4986_v6, 0.0  ;;  %v5010_v13 = vsel %vm383_vm0, %v4988_v34, 0.0 }
 0x221   : > { %v4966_v33 = vadd.f32 %v4965_v31, %v4964_v46  ;;  %v5007_v60 = vadd.f32 %v5006_v42, %v5005_v7 }
 0x223   : > { %v4968_v49 = vadd.f32 %v4967_v32, %v4966_v33  ;;  %v5009_v23 = vadd.f32 %v5008_v8, %v5007_v60 }
 0x225   : > { %v4969_v18 = vrot.slane %v4968_v49, 4  ;;  %v5011_v2 = vadd.f32 %v5010_v13, %v5009_v23 }
 0x227   : > { %v4970_v16 = vadd.f32 %v4969_v18, %v4968_v49  ;;  %v5012_v45 = vrot.slane %v5011_v2, 4 }
 0x229   : > { %v4971_v14 = vrot.slane %v4970_v16, 2  ;;  %v5013_v50 = vadd.f32 %v5012_v45, %v5011_v2 }
 0x22b   : > { %v4972_v20 = vadd.f32 %v4971_v14, %v4970_v16  ;;  %v5014_v25 = vrot.slane %v5013_v50, 2 }
 0x22d   : > { %v4973_v11 = vrot.slane %v4972_v20, 1  ;;  %v5015_v55 = vadd.f32 %v5014_v25, %v5013_v50 }
 0x22f   : > { %v4974_v44 = vadd.f32 %v4973_v11, %v4972_v20  ;;  %v5016_v3 = vrot.slane %v5015_v55, 1 }
 0x231   : > { %4976 = vst.msk [vmem:[%s238_s16] sm:$0x1] %vm4975_vm9, %v4974_v44  ;;  %v5017_v56 = vadd.f32 %v5016_v3, %v5015_v55 }
 0x233   : > { %5018 = vst.msk [vmem:[%s241_s21] sm:$0x1] %vm4975_vm9, %v5017_v56 }
 0x234 PF: > { %s16_s18 = sadd.s32 1, %s6919_s18  }
 0x235   : > { %p13_p4 = scmp.ge.s32.totalorder %s16_s18, 4  }
 0x237   :  { %15 = sbr.rel (!%p13_p4) target bundleno = 1 (0x1), region = 110 }

// kernel: _lambda_.27
= control target key start
LH: loop header
LB: loop body
LE: loop exit
PB: predicated region body
PF: predicated region fallthrough
CT: control target
= control target key end

     0   :  { %s2377_s12 = smov 0   ;;  %s2923_s0 = inlined_call_operand.vmem [shape: bf16[2,112,64], index: 0, kind: input, shape index: {}]   ;;  %s2924_s1 = inlined_call_operand.vmem [shape: bf16[9,64,8], index: 1, kind: input, shape index: {}]   ;;  %s2925_s2 = inlined_call_operand.vmem [shape: f32[1,8], index: 2, kind: input, shape index: {}]   ;;  %s2926_s3 = inlined_call_operand.vmem [shape: f32[2,80,8], index: 3, kind: output, shape index: {}]  }
   0x1 LB: > { %s1757_s13 = sadd.s32 4294967295, %s2353_s12   ;;  %p1761_p0 = scmp.ge.s32.totalorder %s2353_s12, 1  ;;  %s2353_s12 = sphi %s2377_s12, %s13_s12  }
   0x2   : > { %p137_p1 = scmp.lt.s32.totalorder %s2353_s12, 3 }
   0x4   : > { %p138_p2 = pnand %p1761_p0, %p137_p1 }
   0x5   : > { %v2288_v0 = vld [vmem:[%s2924_s1 + $0x20] sm:$0xff] (!%p138_p2)   ;;  %v2355_v1 = vmov (!%p138_p2), 0.0   ;;  %v2289_v2 = vld [vmem:[%s2924_s1 + $0x28] sm:$0xff] (!%p138_p2)   ;;  %p161_p3 = scmp.lt.s32.totalorder (!%p138_p2), %s1757_s13, 1  ;;  %vm2356_vm0 = vmmov (!%p138_p2), 0   ;;  %v2290_v3 = vld [vmem:[%s2924_s1 + $0x30] sm:$0xff] (!%p138_p2)  }
   0x6   : > { %141 = sbr.rel (%p138_p2) target bundleno = 422 (0x1a6), region = 32  ;;  %2268 = vmatprep.subr.bf16.mxu1 (!%p138_p2), %v2355_v1  ;;  %2016 = vmatprep.subr.bf16.mxu0 (!%p138_p2), %v2355_v1  ;;  %v2291_v4 = vld [vmem:[%s2924_s1 + $0x38] sm:$0xff] (!%p138_p2)   ;;  %vm228_vm1 = vsmask.f32 (!%p138_p2), 7424  ;;  %vm297_vm2 = vcmask (!%p138_p2), 523264   ;;  %v2294_v21 = vld [vmem:[%s2924_s1] sm:$0xff] (!%p138_p2)  }
   0x7   : > { %2272 = vmatpush3.bf16.msra.mxu1 (!%p138_p2), %v2288_v0  ;;  %2017 = vmatpush3.bf16.msra.mxu0 (!%p138_p2), %v2288_v0  ;;  %v2299_v28 = vld [vmem:[%s2924_s1 + $0x40] sm:$0xff] (!%p138_p2)   ;;  %v2295_v31 = vld [vmem:[%s2924_s1 + $0x8] sm:$0xff] (!%p138_p2)   ;;  %v2300_v35 = vld [vmem:[%s2924_s1 + $0x10] sm:$0xff] (!%p138_p2)   ;;  %vm506_vm3 = vcmask (!%p138_p2), 1046528   ;;  %vm834_vm4 = vsmask.f32 (!%p138_p2), 6400 }
   0x8   : > { %2269 = vmatprep.subr.bf16.mxu1 (!%p138_p2), %v2355_v1  ;;  %2018 = vmatprep.subr.bf16.mxu0 (!%p138_p2), %v2355_v1  ;;  %v2301_v36 = vld [vmem:[%s2924_s1 + $0x48] sm:$0xff] (!%p138_p2)   ;;  %v2303_v43 = vld [vmem:[%s2924_s1 + $0x50] sm:$0xff] (!%p138_p2)   ;;  %v2304_v47 = vld [vmem:[%s2924_s1 + $0x18] sm:$0xff] (!%p138_p2)   ;;  %vm1023_vm5 = vcmask (!%p138_p2), 1045504   ;;  %vm1540_vm6 = vcmask (!%p138_p2), 1044480   ;;  %vm1691_vm8 = vcmask (!%p138_p2), 64512  }
   0x9   : > { %2032 = vmatprep.mubr.msk.bf16.mxu1 (!%p138_p2), %vm2356_vm0, %v2355_v1  ;;  %2024 = vmatprep.mubr.msk.bf16.mxu0 (!%p138_p2), %vm2356_vm0, %v2355_v1  ;;  %v2305_v48 = vld [vmem:[%s2924_s1 + $0x58] sm:$0xff] (!%p138_p2)   ;;  %v2308_v53 = vld [vmem:[%s2924_s1 + $0x80] sm:$0xff] (!%p138_p2)   ;;  %v2310_v55 = vld [vmem:[%s2924_s1 + $0x88] sm:$0xff] (!%p138_p2)   ;;  %vm1351_vm7 = vsmask.f32 (!%p138_p2), 5376 }
   0xa   : > { %v2307_v56 = vld [vmem:[%s2924_s1 + $0x60] sm:$0xff] (!%p138_p2)   ;;  %v2312_v60 = vld [vmem:[%s2924_s1 + $0x90] sm:$0xff] (!%p138_p2)   ;;  %v2309_v0 = vld [vmem:[%s2924_s1 + $0x68] sm:$0xff] (!%p138_p2)  }
   0xb   : > { %2273 = vmatpush3.bf16.msra.mxu1 (!%p138_p2), %v2289_v2  ;;  %2019 = vmatpush3.bf16.msra.mxu0 (!%p138_p2), %v2289_v2 }
   0xc   : > { %2270 = vmatprep.subr.bf16.mxu1 (!%p138_p2), %v2355_v1  ;;  %2020 = vmatprep.subr.bf16.mxu0 (!%p138_p2), %v2355_v1 }
   0xd   : > { %s2928_s13 = smov (!%p161_p3, %s1757_s13), 1 }
   0xe   : > { %s2276_s20 = smul.u32 56, %s2928_s13 }
   0xf   : > { %2274 = vmatpush3.bf16.msra.mxu1 %v2290_v3  ;;  %2021 = vmatpush3.bf16.msra.mxu0 %v2290_v3 }
  0x10   : > { %s2413_s25 = scalar_lea.vmem %s2923_s0, %s2276_s20  ;;  %2271 = vmatprep.subr.bf16.mxu1 %v2355_v1  ;;  %2022 = vmatprep.subr.bf16.mxu0 %v2355_v1 }
  0x11   : > { %v2416_v5 = vld [vmem:[%s2413_s25 + $0x10] sm:$0xff]   ;;  %v2419_v6 = vld [vmem:[%s2413_s25 + $0x18] sm:$0xff]   ;;  %v172_v7 = vld [vmem:[%s2413_s25] sm:$0xf] }
  0x12   : > { %v2425_v8 = vld [vmem:[%s2413_s25 + $0x4] sm:$0xf]  ;;  %v245_v9 = vshll.u32 %v2416_v5, 16  ;;  %v249_v10 = vshrl.u32 %v2416_v5, 16  ;;  %v253_v11 = vshll.u32 %v2419_v6, 16  ;;  %v2434_v13 = vld [vmem:[%s2413_s25 + $0x8] sm:$0xff]  }
  0x13   : > { %v2431_v12 = vcombine.low %v172_v7, %v2425_v8  ;;  %v2437_v14 = vld [vmem:[%s2413_s25 + $0x20] sm:$0xff]   ;;  %2275 = vmatpush3.bf16.msra.mxu1 %v2291_v4  ;;  %2023 = vmatpush3.bf16.msra.mxu0 %v2291_v4  ;;  %v237_v19 = vshll.u32 %v2434_v13, 16  ;;  %v257_v23 = vshrl.u32 %v2419_v6, 16  ;;  %v241_v29 = vshrl.u32 %v2434_v13, 16  ;;  %v2314_v7 = vld [vmem:[%s2924_s1 + $0x98] sm:$0xff]  }
  0x14   : > { %v247_v15 = vrot.slane %v245_v9, 1  ;;  %v255_v16 = vrot.slane %v253_v11, 1  ;;  %2044 = vmatprep.subr.bf16.mxu1 %v2355_v1  ;;  %2072 = vmatprep.subr.bf16.mxu0 %v2355_v1  ;;  %v261_v24 = vshll.u32 %v2437_v14, 16  ;;  %v2456_v30 = vld [vmem:[%s2413_s25 + $0x28] ss:$0 sps:$4 sm:$0x11]  }
  0x15   : > { %v230_v17 = vshrl.u32 %v2431_v12, 16  ;;  %v232_v18 = vshll.u32 %v2431_v12, 16  ;;  %v239_v25 = vrot.slane %v237_v19, 1  ;;  %v493_v38 = vld [vmem:[%s2413_s25] sm:$0xe]  ;;  %v265_v40 = vshrl.u32 %v2437_v14, 16 }
  0x16   : > { %v251_v20 = vor.u32 %v249_v10, %v247_v15  ;;  %v259_v33 = vor.u32 %v257_v23, %v255_v16  ;;  %v263_v34 = vrot.slane %v261_v24, 1  ;;  %v269_v41 = vshll.u32 %v2456_v30, 16  ;;  %v2523_v57 = vld [vmem:[%s2413_s25 + $0x1c] sm:$0xff]   ;;  %v2526_v58 = vld [vmem:[%s2413_s25 + $0x24] sm:$0xff]   ;;  %v2311_v9 = vld [vmem:[%s2924_s1 + $0x70] sm:$0xff]  }
  0x17   : > { %v234_v22 = vrot.slane %v232_v18, 1  ;;  %v243_v37 = vor.u32 %v241_v29, %v239_v25  ;;  %v1804_v44 = vcombine.low %v493_v38, %v2425_v8  ;;  %v508_v50 = vrot.slane %v2434_v13, 1  ;;  %v2327_v63 = vld [vmem:[%s2413_s25 + $0x2c] ss:$0 sps:$4 sm:$0x11]  }
  0x18   : > { %v256_v26 = vsel %vm228_vm1, %v251_v20, %v255_v16  ;;  %v264_v39 = vsel %vm228_vm1, %v259_v33, %v263_v34  ;;  %v267_v45 = vor.u32 %v265_v40, %v263_v34  ;;  %v271_v46 = vrot.slane %v269_v41, 1  ;;  %v2586_v18 = vld [vmem:[%s2413_s25 + $0xc] sm:$0xff]  }
  0x19   : > { %v235_v27 = vor.u32 %v234_v22, %v230_v17  ;;  %2033 = vmatmul.mubr.msk.bf16.vlgmr.msra.gmra.mrb[0].mxu1 %vm297_vm2, %v256_v26  ;;  %v248_v42 = vsel %vm228_vm1, %v243_v37, %v247_v15  ;;  %v507_v49 = vrot.slane %v1804_v44, 1  ;;  %v510_v54 = vrot.slane %v2416_v5, 1  ;;  %v2580_v15 = vld [vmem:[%s2413_s25 + $0x8] sm:$0xf] }
  0x1a   : > { %2045 = vmatpush3.bf16.msra.mxu1 %v2294_v21  ;;  %2036 = vmatprep.mubr.msk.bf16.mxu1 %vm2356_vm0, %v2355_v1  ;;  %v272_v51 = vsel %vm228_vm1, %v267_v45, %v271_v46  ;;  %v693_v61 = vrot.slane %v2523_v57, 1  ;;  %v695_v62 = vrot.slane %v2526_v58, 1  ;;  %v697_v3 = vrot.slane %v2327_v63, 1  ;;  %v2324_v46 = vld [vmem:[%s2924_s1 + $0xd0] sm:$0xff]  }
  0x1b   : > { %v240_v32 = vsel %vm228_vm1, %v235_v27, %v239_v25  ;;  %2046 = vmatprep.subr.bf16.mxu1 %v2355_v1  ;;  %v509_v52 = vsel %vm506_vm3, %v507_v49, %v508_v50  ;;  %v511_v59 = vsel %vm506_vm3, %v508_v50, %v510_v54  ;;  %v512_v4 = vrot.slane %v2419_v6, 1 }
  0x1c   : > { %2025 = vmatmul.mubr.msk.bf16.vlgmr.msra.gmra.mrb[0].mxu0 %vm297_vm2, %v240_v32  ;;  %v2546_v2 = vsel %vm506_vm3, %v693_v61, %v695_v62  ;;  %v2558_v8 = vsel %vm506_vm3, %v695_v62, %v697_v3  ;;  %v514_v11 = vrot.slane %v2437_v14, 1  ;;  %v516_v19 = vrot.slane %v2456_v30, 1  ;;  %v2326_v62 = vld [vmem:[%s2924_s1 + $0xb8] sm:$0xff]  }
  0x1d   : > { %2073 = vmatpush3.bf16.msra.mxu0 %v2299_v28  ;;  %2028 = vmatprep.mubr.msk.bf16.mxu0 %vm2356_vm0, %v2355_v1  ;;  %v513_v10 = vsel %vm506_vm3, %v510_v54, %v512_v4  ;;  %v844_v22 = vshrl.u32 %v2586_v18, 16  ;;  %v847_v23 = vshll.u32 %v2586_v18, 16  ;;  %v2600_v28 = vld [vmem:[%s2413_s25 + $0x14] sm:$0xff]   ;;  %v689_v37 = vrot.slane %v2586_v18, 1 }
  0x1e   : > { %2074 = vmatprep.subr.bf16.mxu0 %v2355_v1  ;;  %2047 = vmatpush3.bf16.msra.mxu1 %v2295_v31  ;;  %v515_v16 = vsel %vm506_vm3, %v512_v4, %v514_v11  ;;  %v517_v24 = vsel %vm506_vm3, %v514_v11, %v516_v19  ;;  %v853_v31 = vshrl.u32 %v2600_v28, 16  ;;  %v856_v32 = vshll.u32 %v2600_v28, 16  ;;  %v2323_v54 = vld [vmem:[%s2924_s1 + $0xb0] sm:$0xff]   ;;  %v1010_v19 = vld [vmem:[%s2413_s25 + $0x4] sm:$0xc] }
  0x1f   : > { %2048 = vmatprep.subr.bf16.mxu1 %v2355_v1  ;;  %v846_v26 = vrot.slane %v844_v22, 1  ;;  %v849_v27 = vrot.slane %v847_v23, 2  ;;  %v862_v40 = vshrl.u32 %v2523_v57, 16  ;;  %v871_v50 = vshrl.u32 %v2526_v58, 16 }
  0x20   : > { %v855_v34 = vrot.slane %v853_v31, 1  ;;  %v1863_v22 = vcombine.low %v1010_v19, %v2580_v15  ;;  %v1027_v31 = vrot.slane %v2600_v28, 2 }
  0x21   : > { %2075 = vmatpush3.bf16.msra.mxu0 %v2301_v36  ;;  %2037 = vmatmul.mubr.msk.bf16.gmra.mrb[4].mxu1 %vm297_vm2, %v264_v39  ;;  %v850_v30 = vor.u32 %v849_v27, %v846_v26  ;;  %v2321_v39 = vld [vmem:[%s2924_s1 + $0xc8] sm:$0xff]   ;;  %v864_v44 = vrot.slane %v862_v40, 1 }
  0x22   : > { %2076 = vmatprep.subr.bf16.mxu0 %v2355_v1  ;;  %2049 = vmatpush3.bf16.msra.mxu1 %v2300_v35  ;;  %v858_v35 = vrot.slane %v856_v32, 2  ;;  %v2337_v26 = vld [vmem:[%s2924_s1 + $0x108] sm:$0xff]  }
  0x23   : > { %2040 = vmatprep.mubr.msk.bf16.mxu1 %vm2356_vm0, %v2355_v1  ;;  %2050 = vmatprep.subr.bf16.mxu1 %v2355_v1  ;;  %v2336_v32 = vld [vmem:[%s2924_s1 + $0xe8] sm:$0xff]  }
  0x24   : > { %2029 = vmatmul.mubr.msk.bf16.gmra.mrb[4].mxu0 %vm297_vm2, %v248_v42  ;;  %v859_v38 = vor.u32 %v858_v35, %v855_v34  ;;  %v2317_v42 = vld [vmem:[%s2924_s1 + $0xa0] sm:$0xff]   ;;  %v2339_v34 = vld [vmem:[%s2924_s1 + $0xf0] sm:$0xff]  }
  0x25   : > { %2077 = vmatpush3.bf16.msra.mxu0 %v2303_v43  ;;  %2080 = vmatprep.mubr.msk.bf16.mxu0 %vm2356_vm0, %v2355_v1 }
  0x26   : > { %2078 = vmatprep.subr.bf16.mxu0 %v2355_v1  ;;  %2051 = vmatpush3.bf16.msra.mxu1 %v2304_v47  ;;  %v860_v43 = vsel %vm834_vm4, %v850_v30, %v859_v38  ;;  %v691_v47 = vrot.slane %v2600_v28, 1 }
  0x27   : > { %2100 = vmatprep.subr.bf16.mxu1 %v2355_v1 }
  0x28   : > { %v694_v4 = vsel %vm506_vm3, %v691_v47, %v693_v61  ;;  %v1157_v61 = vld [vmem:[%s2413_s25 + $0x8] sm:$0xc] }
  0x29   : > { %2079 = vmatpush3.bf16.msra.mxu0 %v2305_v48  ;;  %2041 = vmatmul.mubr.msk.bf16.gmra.mrb[8].mxu1 %vm297_vm2, %v272_v51  ;;  %v2320_v48 = vld [vmem:[%s2924_s1 + $0xa8] sm:$0xff]   ;;  %v874_v51 = vshll.u32 %v2526_v58, 16 }
  0x2a   : > { %2128 = vmatprep.subr.bf16.mxu0 %v2355_v1  ;;  %2052 = vmatprep.mubr.msk.bf16.mxu1 %vm2356_vm0, %v2355_v1 }
  0x2c   : > { %2081 = vmatmul.mubr.msk.bf16.vlgmr.msra.gmra.mrb[8].mxu0 %vm297_vm2, %v509_v52  ;;  %v2329_v52 = vld [vmem:[%s2924_s1 + $0xd8] sm:$0xff]  }
  0x2d   : > { %2129 = vmatpush3.bf16.msra.mxu0 %v2308_v53  ;;  %2084 = vmatprep.mubr.msk.bf16.mxu0 %vm2356_vm0, %v2355_v1  ;;  %v692_v53 = vsel %vm506_vm3, %v689_v37, %v691_v47 }
  0x2e   : > { %2130 = vmatprep.subr.bf16.mxu0 %v2355_v1 }
  0x31   : > { %2131 = vmatpush3.bf16.msra.mxu0 %v2310_v55  ;;  %2053 = vmatmul.mubr.msk.bf16.vlgmr.msra.gmra.mrb[12].mxu1 %vm297_vm2, %v2431_v12  ;;  %v2313_v12 = vld [vmem:[%s2924_s1 + $0x78] sm:$0xff]  }
  0x32   : > { %2132 = vmatprep.subr.bf16.mxu0 %v2355_v1  ;;  %2101 = vmatpush3.bf16.msra.mxu1 %v2307_v56  ;;  %v873_v56 = vrot.slane %v871_v50, 1 }
  0x33   : > { %2056 = vmatprep.mubr.msk.bf16.mxu1 %vm2356_vm0, %v2355_v1  ;;  %2102 = vmatprep.subr.bf16.mxu1 %v2355_v1 }
  0x34   : > { %2085 = vmatmul.mubr.msk.bf16.gmra.mrb[12].mxu0 %vm297_vm2, %v511_v59  ;;  %v876_v59 = vrot.slane %v874_v51, 2 }
  0x35   : > { %2088 = vmatprep.mubr.msk.bf16.mxu0 %vm2356_vm0, %v2355_v1  ;;  %2133 = vmatpush3.bf16.msra.mxu0 %v2312_v60  ;;  %v2662_v60 = vld [vmem:[%s2413_s25 + $0x2c] ss:$0 sps:$4 sm:$0x33]  }
  0x36   : > { %2134 = vmatprep.subr.bf16.mxu0 %v2355_v1  ;;  %2103 = vmatpush3.bf16.msra.mxu1 %v2309_v0  ;;  %v877_v63 = vor.u32 %v876_v59, %v873_v56  ;;  %v880_v0 = vshrl.u32 %v2662_v60, 16  ;;  %v883_v3 = vshll.u32 %v2662_v60, 16  ;;  %v1033_v47 = vrot.slane %v2662_v60, 2 }
  0x37   : > { %2104 = vmatprep.subr.bf16.mxu1 %v2355_v1 }
  0x39   : > { %2135 = vmatpush3.bf16.msra.mxu0 %v2314_v7  ;;  %2057 = vmatmul.mubr.msk.bf16.gmra.mrb[16].mxu1 %vm297_vm2, %v2434_v13  ;;  %v640_v13 = vld [vmem:[%s2413_s25 + $0x4] sm:$0xe] }
  0x3a   : > { %2184 = vmatprep.subr.bf16.mxu0 %v2355_v1  ;;  %2060 = vmatprep.mubr.msk.bf16.mxu1 %vm2356_vm0, %v2355_v1  ;;  %v1822_v17 = vcombine.low %v640_v13, %v2580_v15 }
  0x3b   : > { %2105 = vmatpush3.bf16.msra.mxu1 %v2311_v9  ;;  %v882_v9 = vrot.slane %v880_v0, 1 }
  0x3c   : > { %2089 = vmatmul.mubr.msk.bf16.gmra.mrb[16].mxu0 %vm297_vm2, %v513_v10  ;;  %2106 = vmatprep.subr.bf16.mxu1 %v2355_v1  ;;  %v836_v20 = vshrl.u32 %v1822_v17, 16  ;;  %v839_v21 = vshll.u32 %v1822_v17, 16  ;;  %v688_v36 = vrot.slane %v1822_v17, 1  ;;  %v885_v10 = vrot.slane %v883_v3, 2  ;;  %v2697_v17 = vld [vmem:[%s2413_s25 + $0x10] sm:$0xff]  }
  0x3d   : > { %2092 = vmatprep.mubr.msk.bf16.mxu0 %vm2356_vm0, %v2355_v1  ;;  %v1364_v50 = vshll.u32 %v2697_v17, 16 }
  0x3e   : > { %v838_v25 = vrot.slane %v836_v20, 1  ;;  %v690_v41 = vsel %vm506_vm3, %v688_v36, %v689_v37  ;;  %v886_v11 = vor.u32 %v885_v10, %v882_v9  ;;  %v2765_v36 = vld [vmem:[%s2413_s25 + $0x28] sm:$0xff]   ;;  %v1029_v37 = vrot.slane %v2523_v57, 2 }
  0x3f   : > { %2107 = vmatpush3.bf16.msra.mxu1 %v2313_v12  ;;  %v2690_v12 = vld [vmem:[%s2413_s25 + $0xc] sm:$0xf]  ;;  %v1366_v59 = vrot.slane %v1364_v50, 3 }
  0x40   : > { %2156 = vmatprep.subr.bf16.mxu1 %v2355_v1  ;;  %v887_v13 = vsel %vm834_vm4, %v877_v63, %v886_v11  ;;  %v1030_v40 = vsel %vm1023_vm5, %v1027_v31, %v1029_v37 }
  0x41   : > { %2061 = vmatmul.mubr.msk.bf16.gmra.mrb[20].mxu1 %vm297_vm2, %v2416_v5  ;;  %v841_v5 = vrot.slane %v839_v21, 2  ;;  %v1206_v21 = vrot.slane %v2697_v17, 2 }
  0x42   : > { %2064 = vmatprep.mubr.msk.bf16.mxu1 %vm2356_vm0, %v2355_v1 }
  0x43   : > { %v842_v29 = vor.u32 %v841_v5, %v838_v25  ;;  %v1024_v25 = vrot.slane %v1863_v22, 2  ;;  %v1025_v5 = vrot.slane %v2586_v18, 2  ;;  %v2333_v18 = vld [vmem:[%s2924_s1 + $0xe0] sm:$0xff]  }
  0x44   : > { %2093 = vmatmul.mubr.msk.bf16.gmra.mrb[20].mxu0 %vm297_vm2, %v515_v16  ;;  %v2694_v16 = vcombine.low %v1157_v61, %v2690_v12 }
  0x45   : > { %2096 = vmatprep.mubr.msk.bf16.mxu0 %vm2356_vm0, %v2355_v1  ;;  %v851_v33 = vsel %vm834_vm4, %v842_v29, %v850_v30  ;;  %v2736_v29 = vld [vmem:[%s2413_s25 + $0x20] sm:$0xff]   ;;  %v2340_v30 = vld [vmem:[%s2924_s1 + $0x110] sm:$0xff]   ;;  %v1028_v28 = vsel %vm1023_vm5, %v1025_v5, %v1027_v31 }
  0x46   : > { %v1205_v20 = vrot.slane %v2694_v16, 2 }
  0x48   : > { %v1207_v23 = vsel %vm1023_vm5, %v1205_v20, %v1206_v21 }
  0x49   : > { %2065 = vmatmul.mubr.msk.bf16.gmra.mrb[24].mxu1 %vm297_vm2, %v2419_v6  ;;  %v2318_v6 = vld [vmem:[%s2924_s1 + $0xc0] sm:$0xff]  }
  0x4a   : > { %2068 = vmatprep.mubr.msk.bf16.mxu1 %vm2356_vm0, %v2355_v1 }
  0x4c   : > { %2097 = vmatmul.mubr.msk.bf16.gmra.mrb[24].mxu0 %vm297_vm2, %v517_v24  ;;  %v2715_v24 = vld [vmem:[%s2413_s25 + $0x18] sm:$0xff]  }
  0x4d   : > { %2136 = vmatprep.mubr.msk.bf16.mxu0 %vm2356_vm0, %v2355_v1  ;;  %v1208_v15 = vrot.slane %v2715_v24, 2  ;;  %v1370_v0 = vshrl.u32 %v2715_v24, 16  ;;  %v1373_v3 = vshll.u32 %v2715_v24, 16 }
  0x4f   : > { %v1209_v27 = vsel %vm1023_vm5, %v1206_v21, %v1208_v15  ;;  %v1372_v9 = vrot.slane %v1370_v0, 2  ;;  %v1375_v10 = vrot.slane %v1373_v3, 3 }
  0x51   : > { %2069 = vmatmul.mubr.msk.bf16.gmra.mrb[28].mxu1 %vm297_vm2, %v2437_v14  ;;  %v865_v14 = vshll.u32 %v2523_v57, 16  ;;  %v1376_v61 = vor.u32 %v1375_v10, %v1372_v9 }
  0x52   : > { %2108 = vmatprep.mubr.msk.bf16.mxu1 %vm2356_vm0, %v2355_v1 }
  0x53   : > { %v867_v45 = vrot.slane %v865_v14, 2  ;;  %v2343_v14 = vld [vmem:[%s2413_s25 + $0x30] ss:$0 sps:$4 sm:$0x33]  }
  0x54   : > { %2137 = vmatmul.mubr.msk.bf16.vlgmr.msra.gmra.mrb[28].mxu0 %vm297_vm2, %v851_v33  ;;  %v1210_v33 = vrot.slane %v2736_v29, 2 }
  0x55   : > { %2185 = vmatpush3.bf16.msra.mxu0 %v2318_v6  ;;  %2140 = vmatprep.mubr.msk.bf16.mxu0 %vm2356_vm0, %v2355_v1  ;;  %v868_v49 = vor.u32 %v867_v45, %v864_v44  ;;  %v2344_v6 = vld [vmem:[%s2924_s1 + $0x118] sm:$0xff]  }
  0x56   : > { %2186 = vmatprep.subr.bf16.mxu0 %v2355_v1  ;;  %v1211_v35 = vsel %vm1023_vm5, %v1208_v15, %v1210_v33 }
  0x57   : > { %v869_v55 = vsel %vm834_vm4, %v859_v38, %v868_v49  ;;  %v878_v7 = vsel %vm834_vm4, %v868_v49, %v877_v63  ;;  %v2342_v38 = vld [vmem:[%s2924_s1 + $0xf8] sm:$0xff]   ;;  %v1361_v49 = vshrl.u32 %v2697_v17, 16 }
  0x59   : > { %2187 = vmatpush3.bf16.msra.mxu0 %v2321_v39  ;;  %2109 = vmatmul.mubr.msk.bf16.vlgmr.msra.gmra.mrb[32].mxu1 %vm297_vm2, %v690_v41  ;;  %v1212_v39 = vrot.slane %v2765_v36, 2  ;;  %v1031_v41 = vrot.slane %v2526_v58, 2  ;;  %v1353_v58 = vshrl.u32 %v2694_v16, 16  ;;  %v1363_v56 = vrot.slane %v1361_v49, 2 }
  0x5a   : > { %2188 = vmatprep.subr.bf16.mxu0 %v2355_v1  ;;  %2157 = vmatpush3.bf16.msra.mxu1 %v2317_v42  ;;  %v1214_v42 = vrot.slane %v2343_v14, 2 }
  0x5b   : > { %2112 = vmatprep.mubr.msk.bf16.mxu1 %vm2356_vm0, %v2355_v1  ;;  %2158 = vmatprep.subr.bf16.mxu1 %v2355_v1  ;;  %v1213_v57 = vsel %vm1023_vm5, %v1210_v33, %v1212_v39  ;;  %v1032_v44 = vsel %vm1023_vm5, %v1029_v37, %v1031_v41  ;;  %v1367_v63 = vor.u32 %v1366_v59, %v1363_v56 }
  0x5c   : > { %2141 = vmatmul.mubr.msk.bf16.gmra.mrb[32].mxu0 %vm297_vm2, %v860_v43  ;;  %v1527_v43 = vld [vmem:[%s2413_s25 + $0x8] sm:$0x8]  ;;  %v1215_v45 = vsel %vm1023_vm5, %v1212_v39, %v1214_v42 }
  0x5d   : > { %2144 = vmatprep.mubr.msk.bf16.mxu0 %vm2356_vm0, %v2355_v1  ;;  %2189 = vmatpush3.bf16.msra.mxu0 %v2324_v46  ;;  %v1922_v46 = vcombine.low %v1527_v43, %v2690_v12  ;;  %v1379_v12 = vshrl.u32 %v2736_v29, 16 }
  0x5e   : > { %2190 = vmatprep.subr.bf16.mxu0 %v2355_v1  ;;  %2159 = vmatpush3.bf16.msra.mxu1 %v2320_v48  ;;  %v1356_v48 = vshll.u32 %v2694_v16, 16  ;;  %v1546_v16 = vrot.slane %v2736_v29, 3 }
  0x5f   : > { %2160 = vmatprep.subr.bf16.mxu1 %v2355_v1  ;;  %v1541_v51 = vrot.slane %v1922_v46, 3  ;;  %v1381_v19 = vrot.slane %v1379_v12, 2 }
  0x61   : > { %2191 = vmatpush3.bf16.msra.mxu0 %v2329_v52  ;;  %2113 = vmatmul.mubr.msk.bf16.gmra.mrb[36].mxu1 %vm297_vm2, %v692_v53  ;;  %v1542_v52 = vrot.slane %v2697_v17, 3  ;;  %v1034_v53 = vsel %vm1023_vm5, %v1031_v41, %v1033_v47  ;;  %v1377_v17 = vsel %vm1351_vm7, %v1367_v63, %v1376_v61 }
  0x62   : > { %2240 = vmatprep.subr.bf16.mxu0 %v2355_v1  ;;  %2116 = vmatprep.mubr.msk.bf16.mxu1 %vm2356_vm0, %v2355_v1 }
  0x63   : > { %2161 = vmatpush3.bf16.msra.mxu1 %v2323_v54  ;;  %v1355_v54 = vrot.slane %v1353_v58, 2  ;;  %v1543_v60 = vsel %vm1540_vm6, %v1541_v51, %v1542_v52 }
  0x64   : > { %2145 = vmatmul.mubr.msk.bf16.gmra.mrb[36].mxu0 %vm297_vm2, %v869_v55  ;;  %2162 = vmatprep.subr.bf16.mxu1 %v2355_v1  ;;  %v1358_v55 = vrot.slane %v1356_v48, 3 }
  0x65   : > { %2148 = vmatprep.mubr.msk.bf16.mxu0 %vm2356_vm0, %v2355_v1 }
  0x67   : > { %2163 = vmatpush3.bf16.msra.mxu1 %v2326_v62  ;;  %v1359_v62 = vor.u32 %v1358_v55, %v1355_v54 }
  0x68   : > { %2212 = vmatprep.subr.bf16.mxu1 %v2355_v1 }
  0x69   : > { %2117 = vmatmul.mubr.msk.bf16.gmra.mrb[40].mxu1 %vm297_vm2, %v694_v4  ;;  %v1544_v4 = vrot.slane %v2715_v24, 3  ;;  %v1548_v24 = vrot.slane %v2765_v36, 3 }
  0x6a   : > { %2120 = vmatprep.mubr.msk.bf16.mxu1 %vm2356_vm0, %v2355_v1 }
  0x6b   : > { %v1545_v11 = vsel %vm1540_vm6, %v1542_v52, %v1544_v4  ;;  %v1547_v21 = vsel %vm1540_vm6, %v1544_v4, %v1546_v16 }
  0x6c   : > { %2149 = vmatmul.mubr.msk.bf16.gmra.mrb[40].mxu0 %vm297_vm2, %v878_v7  ;;  %v1368_v7 = vsel %vm1351_vm7, %v1359_v62, %v1367_v63 }
  0x6d   : > { %2152 = vmatprep.mubr.msk.bf16.mxu0 %vm2356_vm0, %v2355_v1 }
  0x71   : > { %2121 = vmatmul.mubr.msk.bf16.gmra.mrb[44].mxu1 %vm297_vm2, %v2546_v2  ;;  %v2334_v2 = vld [vmem:[%s2924_s1 + $0x100] sm:$0xff]  }
  0x72   : > { %2124 = vmatprep.mubr.msk.bf16.mxu1 %vm2356_vm0, %v2355_v1 }
  0x74   : > { %2153 = vmatmul.mubr.msk.bf16.gmra.mrb[44].mxu0 %vm297_vm2, %v887_v13  ;;  %v1382_v13 = vshll.u32 %v2736_v29, 16 }
  0x75   : > { %2192 = vmatprep.mubr.msk.bf16.mxu0 %vm2356_vm0, %v2355_v1 }
  0x76   : > { %v1384_v20 = vrot.slane %v1382_v13, 3 }
  0x78   : > { %v1385_v22 = vor.u32 %v1384_v20, %v1381_v19 }
  0x79   : > { %2125 = vmatmul.mubr.msk.bf16.gmra.mrb[48].mxu1 %vm297_vm2, %v2558_v8  ;;  %v1026_v8 = vsel %vm1023_vm5, %v1024_v25, %v1025_v5 }
  0x7a   : > { %2164 = vmatprep.mubr.msk.bf16.mxu1 %vm2356_vm0, %v2355_v1  ;;  %v1386_v25 = vsel %vm1351_vm7, %v1376_v61, %v1385_v22 }
  0x7c   : > { %2193 = vmatmul.mubr.msk.bf16.vlgmr.msra.gmra.mrb[48].mxu0 %vm297_vm2, %v1207_v23  ;;  %v1388_v23 = vshrl.u32 %v2765_v36, 16 }
  0x7d   : > { %2241 = vmatpush3.bf16.msra.mxu0 %v2334_v2  ;;  %2196 = vmatprep.mubr.msk.bf16.mxu0 %vm2356_vm0, %v2355_v1  ;;  %v1391_v2 = vshll.u32 %v2765_v36, 16 }
  0x7e   : > { %2242 = vmatprep.subr.bf16.mxu0 %v2355_v1  ;;  %v1390_v5 = vrot.slane %v1388_v23, 2 }
  0x7f   : > { %v1393_v15 = vrot.slane %v1391_v2, 3 }
  0x81   : > { %2243 = vmatpush3.bf16.msra.mxu0 %v2337_v26  ;;  %2165 = vmatmul.mubr.msk.bf16.vlgmr.msra.gmra.mrb[52].mxu1 %vm297_vm2, %v1026_v8  ;;  %v2346_v26 = vld [vmem:[%s2413_s25 + $0x30] ss:$0 sps:$4 sm:$0x77]   ;;  %v1549_v8 = vsel %vm1540_vm6, %v1546_v16, %v1548_v24  ;;  %s2277_s25 = smul.u32 80, %s2928_s13 }
  0x82   : > { %2244 = vmatprep.subr.bf16.mxu0 %v2355_v1  ;;  %2213 = vmatpush3.bf16.msra.mxu1 %v2333_v18  ;;  %v1394_v18 = vor.u32 %v1393_v15, %v1390_v5  ;;  %v1400_v29 = vshll.u32 %v2346_v26, 16 }
  0x83   : > { %2168 = vmatprep.mubr.msk.bf16.mxu1 %vm2356_vm0, %v2355_v1  ;;  %2214 = vmatprep.subr.bf16.mxu1 %v2355_v1  ;;  %s2880_s21 = scalar_lea.vmem %s2926_s3, %s2277_s25 }
  0x84   : > { %2197 = vmatmul.mubr.msk.bf16.gmra.mrb[52].mxu0 %vm297_vm2, %v1209_v27  ;;  %v1397_v27 = vshrl.u32 %v2346_v26, 16  ;;  %v1395_v31 = vsel %vm1351_vm7, %v1385_v22, %v1394_v18  ;;  %v1402_v33 = vrot.slane %v1400_v29, 3 }
  0x85   : > { %2200 = vmatprep.mubr.msk.bf16.mxu0 %vm2356_vm0, %v2355_v1  ;;  %2245 = vmatpush3.bf16.msra.mxu0 %v2340_v30  ;;  %v1550_v30 = vrot.slane %v2346_v26, 3 }
  0x86   : > { %2246 = vmatprep.subr.bf16.mxu0 %v2355_v1  ;;  %2215 = vmatpush3.bf16.msra.mxu1 %v2336_v32  ;;  %v1399_v32 = vrot.slane %v1397_v27, 2 }
  0x87   : > { %2216 = vmatprep.subr.bf16.mxu1 %v2355_v1 }
  0x89   : > { %2247 = vmatpush3.bf16.msra.mxu0 %v2344_v6  ;;  %2169 = vmatmul.mubr.msk.bf16.gmra.mrb[56].mxu1 %vm297_vm2, %v1028_v28  ;;  %v1551_v6 = vsel %vm1540_vm6, %v1548_v24, %v1550_v30  ;;  %v1403_v28 = vor.u32 %v1402_v33, %v1399_v32 }
  0x8a   : > { %2172 = vmatprep.mubr.msk.bf16.mxu1 %vm2356_vm0, %v2355_v1  ;;  %2217 = vmatpush3.bf16.msra.mxu1 %v2339_v34 }
  0x8b   : > { %2218 = vmatprep.subr.bf16.mxu1 %v2355_v1  ;;  %v1404_v34 = vsel %vm1351_vm7, %v1394_v18, %v1403_v28 }
  0x8c   : > { %2201 = vmatmul.mubr.msk.bf16.gmra.mrb[56].mxu0 %vm297_vm2, %v1211_v35 }
  0x8d   : > { %2204 = vmatprep.mubr.msk.bf16.mxu0 %vm2356_vm0, %v2355_v1 }
  0x8e   : > { %2219 = vmatpush3.bf16.msra.mxu1 %v2342_v38 }
  0x91   : > { %2173 = vmatmul.mubr.msk.bf16.gmra.mrb[60].mxu1 %vm297_vm2, %v1030_v40 }
  0x92   : > { %2176 = vmatprep.mubr.msk.bf16.mxu1 %vm2356_vm0, %v2355_v1 }
  0x94   : > { %2205 = vmatmul.mubr.msk.bf16.gmra.mrb[60].mxu0 %vm297_vm2, %v1213_v57 }
  0x95   : > { %2208 = vmatprep.mubr.msk.bf16.mxu0 %vm2356_vm0, %v2355_v1 }
  0x99   : > { %2177 = vmatmul.mubr.msk.bf16.gmra.mrb[64].mxu1 %vm297_vm2, %v1032_v44 }
  0x9a   : > { %2180 = vmatprep.mubr.msk.bf16.mxu1 %vm2356_vm0, %v2355_v1 }
  0x9c   : > { %2209 = vmatmul.mubr.msk.bf16.gmra.mrb[64].mxu0 %vm297_vm2, %v1215_v45 }
  0x9d   : > { %2248 = vmatprep.mubr.msk.bf16.mxu0 %vm2356_vm0, %v2355_v1 }
  0xa1   : > { %2181 = vmatmul.mubr.msk.bf16.gmra.mrb[68].mxu1 %vm297_vm2, %v1034_v53 }
  0xa2   : > { %2220 = vmatprep.mubr.msk.bf16.mxu1 %vm2356_vm0, %v2355_v1 }
  0xa4   : > { %2249 = vmatmul.mubr.msk.bf16.vlgmr.msra.gmra.mrb[68].mxu0 %vm297_vm2, %v1543_v60 }
  0xa5   : > { %2252 = vmatprep.mubr.msk.bf16.mxu0 %vm2356_vm0, %v2355_v1 }
  0xa9   : > { %2221 = vmatmul.mubr.msk.bf16.vlgmr.msra.gmra.mrb[72].mxu1 %vm297_vm2, %v1368_v7 }
  0xaa   : > { %2224 = vmatprep.mubr.msk.bf16.mxu1 %vm2356_vm0, %v2355_v1 }
  0xac   : > { %2253 = vmatmul.mubr.msk.bf16.gmra.mrb[72].mxu0 %vm297_vm2, %v1545_v11 }
  0xad   : > { %2256 = vmatprep.mubr.msk.bf16.mxu0 %vm2356_vm0, %v2355_v1 }
  0xb1   : > { %2225 = vmatmul.mubr.msk.bf16.gmra.mrb[76].mxu1 %vm297_vm2, %v1377_v17 }
  0xb2   : > { %2228 = vmatprep.mubr.msk.bf16.mxu1 %vm2356_vm0, %v2355_v1 }
  0xb4   : > { %2257 = vmatmul.mubr.msk.bf16.gmra.mrb[76].mxu0 %vm297_vm2, %v1547_v21 }
  0xb5   : > { %2260 = vmatprep.mubr.msk.bf16.mxu0 %vm2356_vm0, %v2355_v1 }
  0xb9   : > { %2229 = vmatmul.mubr.msk.bf16.gmra.mrb[80].mxu1 %vm297_vm2, %v1386_v25 }
  0xba   : > { %2232 = vmatprep.mubr.msk.bf16.mxu1 %vm2356_vm0, %v2355_v1 }
  0xbc   : > { %2261 = vmatmul.mubr.msk.bf16.gmra.mrb[80].mxu0 %vm297_vm2, %v1549_v8 }
  0xbd   : > { %2264 = vmatprep.mubr.msk.bf16.mxu0 %vm2356_vm0, %v2355_v1 }
  0xc1   : > { %2233 = vmatmul.mubr.msk.bf16.gmra.mrb[84].mxu1 %vm297_vm2, %v1395_v31 }
  0xc2   : > { %2236 = vmatprep.mubr.msk.bf16.mxu1 %vm2356_vm0, %v2355_v1 }
  0xc4   : > { %2265 = vmatmul.mubr.msk.bf16.gmra.mrb[84].mxu0 %vm297_vm2, %v1551_v6 }
  0xc9   : > { %2237 = vmatmul.mubr.msk.bf16.gmra.mrb[88].mxu1 %vm297_vm2, %v1404_v34 }
  0xec   : > { %v363_v35 = vpop.f32.mrb[0].mxu1 }
  0xed   : > { %v2034_v36 = vpop.f32.mrb[1].mxu1 }
  0xee   : > { %v366_v37 = vpop.f32.mrb[2].mxu1 }
  0xef   : > { %v347_v38 = vpop.f32.mrb[0].mxu0  ;;  %v2035_v39 = vpop.f32.mrb[3].mxu1 }
  0xf0   : > { %v2026_v40 = vpop.f32.mrb[1].mxu0 }
  0xf1   : > { %v350_v57 = vpop.f32.mrb[2].mxu0 }
  0xf2   : > { %v2027_v14 = vpop.f32.mrb[3].mxu0 }
  0xf4   : > { %v371_v41 = vpop.f32.mrb[4].mxu1 }
  0xf5   : > { %v2038_v42 = vpop.f32.mrb[5].mxu1 }
  0xf6   : > { %v374_v43 = vpop.f32.mrb[6].mxu1 }
  0xf7   : > { %v355_v44 = vpop.f32.mrb[4].mxu0  ;;  %v2039_v1 = vpop.f32.mrb[7].mxu1 }
  0xf8   : > { %v2030_v45 = vpop.f32.mrb[5].mxu0 }
  0xf9   : > { %v358_v46 = vpop.f32.mrb[6].mxu0 }
  0xfa   : > { %v2031_v47 = vpop.f32.mrb[7].mxu0 }
  0xfc   : > { %v379_v58 = vpop.f32.mrb[8].mxu1 }
  0xfd   : > { %v2042_v48 = vpop.f32.mrb[9].mxu1 }
  0xfe   : > { %v382_v49 = vpop.f32.mrb[10].mxu1 }
  0xff   : > { %v591_v50 = vpop.f32.mrb[8].mxu0  ;;  %v2043_v51 = vpop.f32.mrb[11].mxu1 }
 0x100   : > { %v2082_v52 = vpop.f32.mrb[9].mxu0 }
 0x101   : > { %v594_v53 = vpop.f32.mrb[10].mxu0 }
 0x102   : > { %v2083_v54 = vpop.f32.mrb[11].mxu0 }
 0x104   : > { %v454_v55 = vpop.f32.mrb[12].mxu1 }
 0x105   : > { %v455_v56 = vadd.f32 %v454_v55, %v347_v38  ;;  %v2054_v59 = vpop.f32.mrb[13].mxu1 }
 0x106   : > { %v457_v60 = vpop.f32.mrb[14].mxu1 }
 0x107   : > { %v599_v62 = vpop.f32.mrb[12].mxu0  ;;  %v630_v63 = vadd.f32 %v591_v50, %v455_v56  ;;  %v458_v0 = vadd.f32 %v457_v60, %v350_v57  ;;  %v2055_v3 = vpop.f32.mrb[15].mxu1 }
 0x108   : > { %v2086_v4 = vpop.f32.mrb[13].mxu0 }
 0x109   : > { %v602_v7 = vpop.f32.mrb[14].mxu0  ;;  %v631_v9 = vadd.f32 %v594_v53, %v458_v0 }
 0x10a   : > { %v2087_v10 = vpop.f32.mrb[15].mxu0 }
 0x10c   : > { %v462_v11 = vpop.f32.mrb[16].mxu1 }
 0x10d   : > { %v463_v61 = vadd.f32 %v462_v11, %v355_v44  ;;  %v2058_v12 = vpop.f32.mrb[17].mxu1 }
 0x10e   : > { %v465_v13 = vpop.f32.mrb[18].mxu1 }
 0x10f   : > { %v607_v16 = vpop.f32.mrb[16].mxu0  ;;  %v632_v17 = vadd.f32 %v599_v62, %v463_v61  ;;  %v466_v19 = vadd.f32 %v465_v13, %v358_v46  ;;  %v2059_v20 = vpop.f32.mrb[19].mxu1 }
 0x110   : > { %v2090_v21 = vpop.f32.mrb[17].mxu0 }
 0x111   : > { %v610_v22 = vpop.f32.mrb[18].mxu0  ;;  %v633_v23 = vadd.f32 %v602_v7, %v466_v19 }
 0x112   : > { %v2091_v2 = vpop.f32.mrb[19].mxu0 }
 0x114   : > { %v470_v24 = vpop.f32.mrb[20].mxu1 }
 0x115   : > { %v471_v25 = vadd.f32 %v470_v24, %v363_v35  ;;  %v2062_v5 = vpop.f32.mrb[21].mxu1 }
 0x116   : > { %v473_v15 = vpop.f32.mrb[22].mxu1 }
 0x117   : > { %v615_v26 = vpop.f32.mrb[20].mxu0  ;;  %v634_v8 = vadd.f32 %v607_v16, %v471_v25  ;;  %v474_v18 = vadd.f32 %v473_v15, %v366_v37  ;;  %v2063_v27 = vpop.f32.mrb[23].mxu1 }
 0x118   : > { %v2094_v29 = vpop.f32.mrb[21].mxu0 }
 0x119   : > { %v618_v30 = vpop.f32.mrb[22].mxu0  ;;  %v635_v31 = vadd.f32 %v610_v22, %v474_v18 }
 0x11a   : > { %v2095_v32 = vpop.f32.mrb[23].mxu0 }
 0x11c   : > { %v478_v33 = vpop.f32.mrb[24].mxu1 }
 0x11d   : > { %v479_v6 = vadd.f32 %v478_v33, %v371_v41  ;;  %v2066_v28 = vpop.f32.mrb[25].mxu1 }
 0x11e   : > { %v481_v34 = vpop.f32.mrb[26].mxu1 }
 0x11f   : > { %v623_v36 = vpop.f32.mrb[24].mxu0  ;;  %v636_v38 = vadd.f32 %v615_v26, %v479_v6  ;;  %v482_v39 = vadd.f32 %v481_v34, %v374_v43  ;;  %v2067_v40 = vpop.f32.mrb[27].mxu1 }
 0x120   : > { %v2098_v57 = vpop.f32.mrb[25].mxu0 }
 0x121   : > { %v626_v35 = vpop.f32.mrb[26].mxu0  ;;  %v637_v14 = vadd.f32 %v618_v30, %v482_v39 }
 0x122   : > { %v2099_v42 = vpop.f32.mrb[27].mxu0 }
 0x124   : > { %v486_v44 = vpop.f32.mrb[28].mxu1 }
 0x125   : > { %v487_v1 = vadd.f32 %v486_v44, %v379_v58  ;;  %v2070_v37 = vpop.f32.mrb[29].mxu1 }
 0x126   : > { %v489_v45 = vpop.f32.mrb[30].mxu1 }
 0x127   : > { %v961_v46 = vpop.f32.mrb[28].mxu0  ;;  %v638_v47 = vadd.f32 %v623_v36, %v487_v1  ;;  %v490_v48 = vadd.f32 %v489_v45, %v382_v49  ;;  %v2071_v50 = vpop.f32.mrb[31].mxu1 }
 0x128   : > { %v2138_v51 = vpop.f32.mrb[29].mxu0 }
 0x129   : > { %v964_v41 = vpop.f32.mrb[30].mxu0  ;;  %v639_v52 = vadd.f32 %v626_v35, %v490_v48 }
 0x12a   : > { %v2139_v53 = vpop.f32.mrb[31].mxu0 }
 0x12c   : > { %v772_v54 = vpop.f32.mrb[32].mxu1 }
 0x12d   : > { %v811_v55 = vadd.f32 %v772_v54, %v630_v63  ;;  %v2110_v43 = vpop.f32.mrb[33].mxu1 }
 0x12e   : > { %v775_v56 = vpop.f32.mrb[34].mxu1 }
 0x12f   : > { %v969_v59 = vpop.f32.mrb[32].mxu0  ;;  %v1000_v60 = vadd.f32 %v961_v46, %v811_v55  ;;  %v812_v62 = vadd.f32 %v775_v56, %v631_v9  ;;  %v2111_v0 = vpop.f32.mrb[35].mxu1 }
 0x130   : > { %v2142_v3 = vpop.f32.mrb[33].mxu0 }
 0x131   : > { %v972_v58 = vpop.f32.mrb[34].mxu0  ;;  %v1001_v4 = vadd.f32 %v964_v41, %v812_v62 }
 0x132   : > { %v2143_v7 = vpop.f32.mrb[35].mxu0 }
 0x134   : > { %v780_v10 = vpop.f32.mrb[36].mxu1 }
 0x135   : > { %v813_v11 = vadd.f32 %v780_v10, %v632_v17  ;;  %v2114_v49 = vpop.f32.mrb[37].mxu1 }
 0x136   : > { %v783_v61 = vpop.f32.mrb[38].mxu1 }
 0x137   : > { %v977_v12 = vpop.f32.mrb[36].mxu0  ;;  %v1002_v13 = vadd.f32 %v969_v59, %v813_v11  ;;  %v814_v16 = vadd.f32 %v783_v61, %v633_v23  ;;  %v2115_v19 = vpop.f32.mrb[39].mxu1 }
 0x138   : > { %v2146_v20 = vpop.f32.mrb[37].mxu0 }
 0x139   : > { %v980_v63 = vpop.f32.mrb[38].mxu0  ;;  %v1003_v21 = vadd.f32 %v972_v58, %v814_v16 }
 0x13a   : > { %v2147_v22 = vpop.f32.mrb[39].mxu0 }
 0x13c   : > { %v788_v2 = vpop.f32.mrb[40].mxu1 }
 0x13d   : > { %v815_v24 = vadd.f32 %v788_v2, %v634_v8  ;;  %v2118_v9 = vpop.f32.mrb[41].mxu1 }
 0x13e   : > { %v791_v25 = vpop.f32.mrb[42].mxu1 }
 0x13f   : > { %v985_v5 = vpop.f32.mrb[40].mxu0  ;;  %v1004_v15 = vadd.f32 %v977_v12, %v815_v24  ;;  %v816_v26 = vadd.f32 %v791_v25, %v635_v31  ;;  %v2119_v18 = vpop.f32.mrb[43].mxu1 }
 0x140   : > { %v2150_v27 = vpop.f32.mrb[41].mxu0 }
 0x141   : > { %v988_v17 = vpop.f32.mrb[42].mxu0  ;;  %v1005_v29 = vadd.f32 %v980_v63, %v816_v26 }
 0x142   : > { %v2151_v30 = vpop.f32.mrb[43].mxu0 }
 0x144   : > { %v796_v32 = vpop.f32.mrb[44].mxu1 }
 0x145   : > { %v817_v33 = vadd.f32 %v796_v32, %v636_v38  ;;  %v2122_v23 = vpop.f32.mrb[45].mxu1 }
 0x146   : > { %v799_v6 = vpop.f32.mrb[46].mxu1 }
 0x147   : > { %v993_v28 = vpop.f32.mrb[44].mxu0  ;;  %v1006_v34 = vadd.f32 %v985_v5, %v817_v33  ;;  %v818_v36 = vadd.f32 %v799_v6, %v637_v14  ;;  %v2123_v39 = vpop.f32.mrb[47].mxu1 }
 0x148   : > { %v2154_v40 = vpop.f32.mrb[45].mxu0 }
 0x149   : > { %v996_v8 = vpop.f32.mrb[46].mxu0  ;;  %v1007_v57 = vadd.f32 %v988_v17, %v818_v36 }
 0x14a   : > { %v2155_v35 = vpop.f32.mrb[47].mxu0 }
 0x14c   : > { %v804_v42 = vpop.f32.mrb[48].mxu1 }
 0x14d   : > { %v819_v44 = vadd.f32 %v804_v42, %v638_v47  ;;  %v2126_v31 = vpop.f32.mrb[49].mxu1 }
 0x14e   : > { %v807_v1 = vpop.f32.mrb[50].mxu1 }
 0x14f   : > { %v1289_v37 = vpop.f32.mrb[48].mxu0  ;;  %v1008_v45 = vadd.f32 %v993_v28, %v819_v44  ;;  %v820_v46 = vadd.f32 %v807_v1, %v639_v52  ;;  %v2127_v48 = vpop.f32.mrb[51].mxu1 }
 0x150   : > { %v2194_v50 = vpop.f32.mrb[49].mxu0 }
 0x151   : > { %v1292_v38 = vpop.f32.mrb[50].mxu0  ;;  %v1009_v51 = vadd.f32 %v996_v8, %v820_v46 }
 0x152   : > { %v2195_v41 = vpop.f32.mrb[51].mxu0 }
 0x154   : > { %v1108_v53 = vpop.f32.mrb[52].mxu1 }
 0x155   : > { %v1147_v54 = vadd.f32 %v1108_v53, %v1000_v60  ;;  %v2166_v14 = vpop.f32.mrb[53].mxu1 }
 0x156   : > { %v1111_v55 = vpop.f32.mrb[54].mxu1 }
 0x157   : > { %v1297_v43 = vpop.f32.mrb[52].mxu0  ;;  %v1328_v56 = vadd.f32 %v1289_v37, %v1147_v54  ;;  %v1148_v59 = vadd.f32 %v1111_v55, %v1001_v4  ;;  %v2167_v62 = vpop.f32.mrb[55].mxu1 }
 0x158   : > { %v2198_v0 = vpop.f32.mrb[53].mxu0 }
 0x159   : > { %v1300_v47 = vpop.f32.mrb[54].mxu0  ;;  %v1329_v3 = vadd.f32 %v1292_v38, %v1148_v59 }
 0x15a   : > { %v2199_v58 = vpop.f32.mrb[55].mxu0 }
 0x15c   : > { %v1116_v7 = vpop.f32.mrb[56].mxu1 }
 0x15d   : > { %v1149_v10 = vadd.f32 %v1116_v7, %v1002_v13  ;;  %v2170_v52 = vpop.f32.mrb[57].mxu1 }
 0x15e   : > { %v1119_v11 = vpop.f32.mrb[58].mxu1 }
 0x15f   : > { %v1305_v49 = vpop.f32.mrb[56].mxu0  ;;  %v2855_v61 = vadd.f32 %v1297_v43, %v1149_v10  ;;  %v1150_v12 = vadd.f32 %v1119_v11, %v1003_v21  ;;  %v2171_v16 = vpop.f32.mrb[59].mxu1 }
 0x160   : > { %v2202_v60 = vpop.f32.mrb[57].mxu0 }
 0x161   : > { %v1308_v19 = vpop.f32.mrb[58].mxu0  ;;  %v2857_v20 = vadd.f32 %v1300_v47, %v1150_v12 }
 0x162   : > { %v2203_v63 = vpop.f32.mrb[59].mxu0 }
 0x164   : > { %v1124_v4 = vpop.f32.mrb[60].mxu1 }
 0x165   : > { %v1151_v22 = vadd.f32 %v1124_v4, %v1004_v15  ;;  %v2174_v2 = vpop.f32.mrb[61].mxu1 }
 0x166   : > { %v1127_v24 = vpop.f32.mrb[62].mxu1 }
 0x167   : > { %v1313_v9 = vpop.f32.mrb[60].mxu0  ;;  %v2859_v25 = vadd.f32 %v1305_v49, %v1151_v22  ;;  %v1152_v13 = vadd.f32 %v1127_v24, %v1005_v29  ;;  %v2175_v5 = vpop.f32.mrb[63].mxu1 }
 0x168   : > { %v2206_v26 = vpop.f32.mrb[61].mxu0 }
 0x169   : > { %v1316_v18 = vpop.f32.mrb[62].mxu0  ;;  %v2861_v27 = vadd.f32 %v1308_v19, %v1152_v13 }
 0x16a   : > { %v2207_v21 = vpop.f32.mrb[63].mxu0 }
 0x16c   : > { %v1132_v17 = vpop.f32.mrb[64].mxu1 }
 0x16d   : > { %v1153_v30 = vadd.f32 %v1132_v17, %v1006_v34  ;;  %v2178_v32 = vpop.f32.mrb[65].mxu1 }
 0x16e   : > { %v1135_v33 = vpop.f32.mrb[66].mxu1 }
 0x16f   : > { %v1321_v23 = vpop.f32.mrb[64].mxu0  ;;  %v2863_v6 = vadd.f32 %v1313_v9, %v1153_v30  ;;  %v1154_v15 = vadd.f32 %v1135_v33, %v1007_v57  ;;  %v2179_v28 = vpop.f32.mrb[67].mxu1 }
 0x170   : > { %v2210_v36 = vpop.f32.mrb[65].mxu0 }
 0x171   : > { %v1324_v39 = vpop.f32.mrb[66].mxu0  ;;  %v2865_v40 = vadd.f32 %v1316_v18, %v1154_v15 }
 0x172   : > { %v2211_v29 = vpop.f32.mrb[67].mxu0 }
 0x174   : > { %v1140_v8 = vpop.f32.mrb[68].mxu1 }
 0x175   : > { %v1155_v35 = vadd.f32 %v1140_v8, %v1008_v45  ;;  %v2182_v42 = vpop.f32.mrb[69].mxu1  ;;  %v2875_v45 = vld [vmem:[%s2925_s2] ss:$0 sm:$0xff] }
 0x176   : > { %v1143_v44 = vpop.f32.mrb[70].mxu1 }
 0x177   : > { %v1625_v31 = vpop.f32.mrb[68].mxu0  ;;  %v2867_v1 = vadd.f32 %v1321_v23, %v1155_v35  ;;  %v1156_v34 = vadd.f32 %v1143_v44, %v1009_v51  ;;  %v2183_v37 = vpop.f32.mrb[71].mxu1 }
 0x178   : > { %v2250_v46 = vpop.f32.mrb[69].mxu0 }
 0x179   : > { %v1628_v48 = vpop.f32.mrb[70].mxu0  ;;  %v2869_v50 = vadd.f32 %v1324_v39, %v1156_v34 }
 0x17a   : > { %v2251_v57 = vpop.f32.mrb[71].mxu0 }
 0x17c   : > { %v1478_v38 = vpop.f32.mrb[72].mxu1 }
 0x17d   : > { %v1517_v41 = vadd.f32 %v1478_v38, %v1328_v56  ;;  %v2222_v53 = vpop.f32.mrb[73].mxu1 }
 0x17e   : > { %v1481_v54 = vpop.f32.mrb[74].mxu1 }
 0x17f   : > { %v1633_v14 = vpop.f32.mrb[72].mxu0  ;;  %v1664_v55 = vadd.f32 %v1625_v31, %v1517_v41  ;;  %v1518_v43 = vadd.f32 %v1481_v54, %v1329_v3  ;;  %v2223_v51 = vpop.f32.mrb[75].mxu1 }
 0x180   : > { %v2254_v59 = vpop.f32.mrb[73].mxu0 }
 0x181   : > { %v1636_v56 = vpop.f32.mrb[74].mxu0  ;;  %v1681_v62 = vadd.f32 %v2875_v45, %v1664_v55  ;;  %v1665_v0 = vadd.f32 %v1628_v48, %v1518_v43 }
 0x182   : > { %v2255_v47 = vpop.f32.mrb[75].mxu0 }
 0x183   : > { %1692 = vst.msk [vmem:[%s2880_s21] sm:$0xff] %vm1691_vm8, %v1681_v62  ;;  %v1682_v3 = vadd.f32 %v2875_v45, %v1665_v0 }
 0x184   : > { %v1486_v58 = vpop.f32.mrb[76].mxu1 }
 0x185   : > { %1693 = vst.msk [vmem:[%s2880_s21 + $0x8] sm:$0xff] %vm1691_vm8, %v1682_v3  ;;  %v1519_v7 = vadd.f32 %v1486_v58, %v2855_v61  ;;  %v2226_v10 = vpop.f32.mrb[77].mxu1 }
 0x186   : > { %v1489_v52 = vpop.f32.mrb[78].mxu1 }
 0x187   : > { %v1641_v11 = vpop.f32.mrb[76].mxu0  ;;  %v1666_v49 = vadd.f32 %v1633_v14, %v1519_v7  ;;  %v1520_v12 = vadd.f32 %v1489_v52, %v2857_v20  ;;  %v2227_v16 = vpop.f32.mrb[79].mxu1 }
 0x188   : > { %v2258_v60 = vpop.f32.mrb[77].mxu0 }
 0x189   : > { %v1644_v19 = vpop.f32.mrb[78].mxu0  ;;  %v1683_v63 = vadd.f32 %v2875_v45, %v1666_v49  ;;  %v1667_v4 = vadd.f32 %v1636_v56, %v1520_v12 }
 0x18a   : > { %v2259_v22 = vpop.f32.mrb[79].mxu0 }
 0x18b   : > { %1694 = vst.msk [vmem:[%s2880_s21 + $0x10] sm:$0xff] %vm1691_vm8, %v1683_v63  ;;  %v1684_v2 = vadd.f32 %v2875_v45, %v1667_v4 }
 0x18c   : > { %v1494_v24 = vpop.f32.mrb[80].mxu1 }
 0x18d   : > { %1695 = vst.msk [vmem:[%s2880_s21 + $0x18] sm:$0xff] %vm1691_vm8, %v1684_v2  ;;  %v1521_v61 = vadd.f32 %v1494_v24, %v2859_v25  ;;  %v2230_v9 = vpop.f32.mrb[81].mxu1 }
 0x18e   : > { %v1497_v20 = vpop.f32.mrb[82].mxu1 }
 0x18f   : > { %v1649_v13 = vpop.f32.mrb[80].mxu0  ;;  %v1668_v5 = vadd.f32 %v1641_v11, %v1521_v61  ;;  %v1522_v26 = vadd.f32 %v1497_v20, %v2861_v27  ;;  %v2231_v18 = vpop.f32.mrb[83].mxu1 }
 0x190   : > { %v2262_v21 = vpop.f32.mrb[81].mxu0 }
 0x191   : > { %v1652_v17 = vpop.f32.mrb[82].mxu0  ;;  %v1685_v30 = vadd.f32 %v2875_v45, %v1668_v5  ;;  %v1669_v32 = vadd.f32 %v1644_v19, %v1522_v26 }
 0x192   : > { %v2263_v33 = vpop.f32.mrb[83].mxu0 }
 0x193   : > { %1696 = vst.msk [vmem:[%s2880_s21 + $0x20] sm:$0xff] %vm1691_vm8, %v1685_v30  ;;  %v1686_v23 = vadd.f32 %v2875_v45, %v1669_v32 }
 0x194   : > { %v1502_v15 = vpop.f32.mrb[84].mxu1 }
 0x195   : > { %1697 = vst.msk [vmem:[%s2880_s21 + $0x28] sm:$0xff] %vm1691_vm8, %v1686_v23  ;;  %v1523_v25 = vadd.f32 %v1502_v15, %v2863_v6  ;;  %v2234_v28 = vpop.f32.mrb[85].mxu1 }
 0x196   : > { %v1505_v27 = vpop.f32.mrb[86].mxu1 }
 0x197   : > { %v1657_v36 = vpop.f32.mrb[84].mxu0  ;;  %v1670_v39 = vadd.f32 %v1649_v13, %v1523_v25  ;;  %v1524_v29 = vadd.f32 %v1505_v27, %v2865_v40  ;;  %v2235_v8 = vpop.f32.mrb[87].mxu1 }
 0x198   : > { %v2266_v35 = vpop.f32.mrb[85].mxu0 }
 0x199   : > { %v1660_v42 = vpop.f32.mrb[86].mxu0  ;;  %v1687_v44 = vadd.f32 %v2875_v45, %v1670_v39  ;;  %v1671_v31 = vadd.f32 %v1652_v17, %v1524_v29 }
 0x19a   : > { %v2267_v34 = vpop.f32.mrb[87].mxu0 }
 0x19b   : > { %1698 = vst.msk [vmem:[%s2880_s21 + $0x30] sm:$0xff] %vm1691_vm8, %v1687_v44  ;;  %v1688_v37 = vadd.f32 %v2875_v45, %v1671_v31 }
 0x19c   : > { %v1510_v6 = vpop.f32.mrb[88].mxu1 }
 0x19d   : > { %1699 = vst.msk [vmem:[%s2880_s21 + $0x38] sm:$0xff] %vm1691_vm8, %v1688_v37  ;;  %v1525_v46 = vadd.f32 %v1510_v6, %v2867_v1  ;;  %v2238_v48 = vpop.f32.mrb[89].mxu1 }
 0x19e   : > { %v1513_v40 = vpop.f32.mrb[90].mxu1 }
 0x19f   : > { %v1672_v57 = vadd.f32 %v1657_v36, %v1525_v46  ;;  %v1526_v38 = vadd.f32 %v1513_v40, %v2869_v50  ;;  %v2239_v41 = vpop.f32.mrb[91].mxu1 }
 0x1a1   : > { %v1689_v53 = vadd.f32 %v2875_v45, %v1672_v57  ;;  %v1673_v54 = vadd.f32 %v1660_v42, %v1526_v38 }
 0x1a3   : > { %1700 = vst.msk [vmem:[%s2880_s21 + $0x40] sm:$0xff] %vm1691_vm8, %v1689_v53  ;;  %v1690_v14 = vadd.f32 %v2875_v45, %v1673_v54 }
 0x1a5   : > { %1701 = vst.msk [vmem:[%s2880_s21 + $0x48] sm:$0xff] %vm1691_vm8, %v1690_v14 }
 0x1a6 PF: > { %s13_s12 = sadd.s32 1, %s2353_s12  }
 0x1a7   : > { %p10_p4 = scmp.ge.s32.totalorder %s13_s12, 4  }
 0x1a9   :  { %12 = sbr.rel (!%p10_p4) target bundleno = 1 (0x1), region = 70 }

</bundles_post_ra>
